<compile_context>
chip_gen: v7x
topology: tpu7x:2x2x1
jax: 0.10.0
libtpu: 0.0.40
codegen_flags: <defaults>
</compile_context>

<pallas_src>
import numpy as np
import jax
import jax.numpy as jnp
from jax.experimental import pallas as pl
from jax.experimental.pallas import tpu as pltpu


SHAPE_BEFORE_FLATTENING = (128, 4, 4)   # (C, H, W), as in the PyTorch module
_MXU_DTYPE = jnp.bfloat16               # MXU input dtype (f32 accumulation)


# ----------------------------------------------------------------------------
# In-kernel helpers (trace-time Python; everything lowers to VPU/MXU ops)
# ----------------------------------------------------------------------------
def _shift_flat(x, dh, dw, H, W):
    """view[c, i*W + j] = x[c, (i+dh)*W + (j+dw)], zero outside the HxW grid.

    `x` is a (C, H*W) value holding an HxW image flattened row-major on the
    lane axis, |dh| <= 1, |dw| <= 1.  Row (dh) overflow is handled by the zero
    padding of the flat shift; column wrap-around is killed by a lane mask.
    """
    C, HW = x.shape
    s = dh * W + dw
    if s > 0:
        y = jnp.concatenate([x[:, s:], jnp.zeros((C, s), x.dtype)], axis=1)
    elif s < 0:
        y = jnp.concatenate([jnp.zeros((C, -s), x.dtype), x[:, :s]], axis=1)
    else:
        y = x
    if dw != 0:
        col = jax.lax.broadcasted_iota(jnp.int32, (1, HW), 1) % W
        bad = W - 1 if dw > 0 else 0
        y = y * (col != bad).astype(y.dtype)
    return y


# Polyphase taps of a k=3 / stride=2 / pad=1 / output_padding=1 transposed
# conv (per spatial axis, using the spatially *flipped* weights):
#   output parity 0 -> flipped-kernel index 1, input shift 0
#   output parity 1 -> index 0 with shift 0  and  index 2 with shift +1
_TCONV_TAPS = {0: ((1, 0),), 1: ((0, 0), (2, 1))}


def _tconv_phases(x_bf, w_ref, H, W):
    """4 polyphase outputs of a stride-2 transposed conv (f32 accumulators).

    x_bf:  (Cin, H*W) bf16 activation.
    w_ref: (3, 3, Cout, Cin) ref of spatially flipped weights.
    Returns [(Cout, H*W)] * 4 in output-parity order (0,0),(0,1),(1,0),(1,1);
    phase (ph, pw) element (i, j) is output pixel (2i+ph, 2j+pw).
    """
    views = {}

    def view(dh, dw):
        if (dh, dw) not in views:
            views[(dh, dw)] = _shift_flat(x_bf, dh, dw, H, W)
        return views[(dh, dw)]

    phases = []
    for ph in (0, 1):
        for pw in (0, 1):
            acc = None
            for kh, dh in _TCONV_TAPS[ph]:
                for kw, dw in _TCONV_TAPS[pw]:
                    t = jnp.dot(w_ref[kh, kw], view(dh, dw),
                                preferred_element_type=jnp.float32)
                    acc = t if acc is None else acc + t
            phases.append(acc)
    return phases


def _decoder_kernel(z_ref, wfc_ref, bfc_ref,
                    w1_ref, b1_ref, s1_ref,
                    w2_ref, b2_ref, s2_ref,
                    w3_ref, b3_ref,
                    wcp_ref, bc_ref,
                    out_ref):
    bf = _MXU_DTYPE

    # ---- fc: Linear(2 -> 2048) as a VPU multiply-add (K=2 never hits the MXU)
    zv = z_ref[...]                                         # (1, 2) f32
    x0 = zv[:, 0:1] * wfc_ref[0] + zv[:, 1:2] * wfc_ref[1] + bfc_ref[...]
    # x0: (128, 16) == x.view(128, 4, 4) flattened row-major on lanes.

    # ---- ConvTranspose2d #1: 4x4 -> 8x8, 128 -> 128 channels, + ReLU
    p = _tconv_phases(x0.astype(bf), w1_ref, 4, 4)          # 4 x (128, 16)
    x1 = jnp.dot(jnp.concatenate(p, axis=1).astype(bf), s1_ref[...],
                 preferred_element_type=jnp.float32)        # (128, 64): 8x8 grid
    x1 = jnp.maximum(x1 + b1_ref[...], 0.0)

    # ---- ConvTranspose2d #2: 8x8 -> 16x16, 128 -> 64 channels, + ReLU
    p = _tconv_phases(x1.astype(bf), w2_ref, 8, 8)          # 4 x (64, 64)
    x2 = jnp.dot(jnp.concatenate(p, axis=1).astype(bf), s2_ref[...],
                 preferred_element_type=jnp.float32)        # (64, 256): 16x16 grid
    x2 = jnp.maximum(x2 + b2_ref[...], 0.0)

    # ---- ConvTranspose2d #3: 16x16 -> 32x32, 64 -> 32 channels, + ReLU
    #      Kept phase-separated: the final conv consumes the phases directly,
    #      so the big 32x32 interleave is never materialized in-kernel.
    p3 = _tconv_phases(x2.astype(bf), w3_ref, 16, 16)       # 4 x (32, 256)
    q = [jnp.maximum(pp + b3_ref[...], 0.0).astype(bf) for pp in p3]

    # ---- Conv2d(32 -> 1, k=3, pad=1) + sigmoid, evaluated in the phase domain.
    #      For output phase (fp, fq), source offset (th, tw) in [-1, 2]^2 maps
    #      to ct3 phase (th%2, tw%2) shifted by (th//2, tw//2); the per-view
    #      (4, 32) weight blocks are packed on the host (zeros where no tap).
    acc = jnp.zeros((4, 16 * 16), jnp.float32)
    for th in range(-1, 3):
        sph, da = th % 2, th // 2
        for tw in range(-1, 3):
            spw, db = tw % 2, tw // 2
            v = _shift_flat(q[2 * sph + spw], da, db, 16, 16)    # (32, 256)
            acc = acc + jnp.dot(wcp_ref[(th + 1) * 4 + (tw + 1)], v,
                                preferred_element_type=jnp.float32)
    logits = acc + bc_ref[...]
    out_ref[...] = 1.0 / (1.0 + jnp.exp(-logits))           # (4, 256), lane-dense


# ----------------------------------------------------------------------------
# Host-side parameter packing (one-off layout work, not in the hot path)
# ----------------------------------------------------------------------------
def _flip_tconv_weight(w_t):
    """PyTorch ConvTranspose2d weight (Cin,Cout,KH,KW) -> flipped (KH,KW,Cout,Cin)."""
    return jnp.flip(w_t, axis=(2, 3)).transpose(2, 3, 1, 0)


def _make_phase_scatter(H, W):
    """(4HW, 4HW) 0/1 matrix: phase-major (ph,pw,i,j) -> interleaved pixel (2i+ph, 2j+pw)."""
    HW = H * W
    S = np.zeros((4 * HW, 4 * HW), np.float32)
    for ph in range(2):
        for pw in range(2):
            for i in range(H):
                for j in range(W):
                    S[(2 * ph + pw) * HW + i * W + j,
                      (2 * i + ph) * (2 * W) + (2 * j + pw)] = 1.0
    return S


def _pack_final_conv(conv_w):
    """Pack Conv2d(32->1,k=3) weights for phase-domain evaluation.

    packed[(th+1)*4+(tw+1), 2*fp+fq, ci] = w[0, ci, th+1-fp, tw+1-fq] when that
    kernel tap exists, else 0.
    """
    w = np.asarray(conv_w)                      # (1, Cin, 3, 3)
    packed = np.zeros((16, 4, w.shape[1]), np.float32)
    for th in range(-1, 3):
        for tw in range(-1, 3):
            for fp in range(2):
                for fq in range(2):
                    dh, dw = th + 1 - fp, tw + 1 - fq
                    if 0 <= dh <= 2 and 0 <= dw <= 2:
                        packed[(th + 1) * 4 + (tw + 1), 2 * fp + fq] = w[0, :, dh, dw]
    return packed


def prepare_params(params):
    """Convert PyTorch-layout float32 params into the kernel's packed layout."""
    c0, h0, w0 = SHAPE_BEFORE_FLATTENING
    bf = _MXU_DTYPE
    return {
        # fc, reshaped so the VPU multiply-add directly yields x.view(128, 4, 4)
        "wfc": params["fc_w"].T.reshape(2, c0, h0 * w0).astype(jnp.float32),
        "bfc": params["fc_b"].reshape(c0, h0 * w0).astype(jnp.float32),
        "w1": _flip_tconv_weight(params["ct1_w"]).astype(bf),
        "b1": params["ct1_b"].reshape(-1, 1),
        "S1": jnp.asarray(_make_phase_scatter(4, 4), bf),
        "w2": _flip_tconv_weight(params["ct2_w"]).astype(bf),
        "b2": params["ct2_b"].reshape(-1, 1),
        "S2": jnp.asarray(_make_phase_scatter(8, 8), bf),
        "w3": _flip_tconv_weight(params["ct3_w"]).astype(bf),
        "b3": params["ct3_b"].reshape(-1, 1),
        "wcp": jnp.asarray(_pack_final_conv(params["conv_w"]), bf),
        "bc": params["conv_b"].reshape(1, 1),
    }


_PREP_KEYS = ("wfc", "bfc", "w1", "b1", "S1", "w2", "b2", "S2",
              "w3", "b3", "wcp", "bc")


def decoder_forward(z, prep):
    """z: (B, 2) float32 -> (B, 1, 32, 32) float32 (PyTorch NCHW semantics)."""
    B = z.shape[0]

    def const_spec(x):
        nd = x.ndim
        return pl.BlockSpec(x.shape, lambda b: (0,) * nd)

    in_specs = [pl.BlockSpec((None, 1, 2), lambda b: (b, 0, 0))]
    in_specs += [const_spec(prep[k]) for k in _PREP_KEYS]

    out = pl.pallas_call(
        _decoder_kernel,
        out_shape=jax.ShapeDtypeStruct((B, 4, 256), jnp.float32),
        grid=(B,),
        in_specs=in_specs,
        out_specs=pl.BlockSpec((None, 4, 256), lambda b: (b, 0, 0)),
        compiler_params=pltpu.CompilerParams(
            dimension_semantics=("parallel",)),
    )(z.reshape(B, 1, 2), *[prep[k] for k in _PREP_KEYS])

    # (B, phase=(fp,fq), i*16+j) -> NCHW (B, 1, 32, 32): pixel (2i+fp, 2j+fq).
    out = out.reshape(B, 2, 2, 16, 16).transpose(0, 3, 1, 4, 2)
    return out.reshape(B, 1, 32, 32)


# ----------------------------------------------------------------------------
# Parameters + pure-JAX reference (for a numerical cross-check)
# ----------------------------------------------------------------------------
def init_params(key):
    ks = jax.random.split(key, 10)
    s = 0.05
    return {
        # PyTorch layouts: Linear (out,in); ConvTranspose2d (Cin,Cout,KH,KW);
        # Conv2d (Cout,Cin,KH,KW).
        "fc_w":   s * jax.random.normal(ks[0], (2048, 2), jnp.float32),
        "fc_b":   s * jax.random.normal(ks[1], (2048,), jnp.float32),
        "ct1_w":  s * jax.random.normal(ks[2], (128, 128, 3, 3), jnp.float32),
        "ct1_b":  s * jax.random.normal(ks[3], (128,), jnp.float32),
        "ct2_w":  s * jax.random.normal(ks[4], (128, 64, 3, 3), jnp.float32),
        "ct2_b":  s * jax.random.normal(ks[5], (64,), jnp.float32),
        "ct3_w":  s * jax.random.normal(ks[6], (64, 32, 3, 3), jnp.float32),
        "ct3_b":  s * jax.random.normal(ks[7], (32,), jnp.float32),
        "conv_w": s * jax.random.normal(ks[8], (1, 32, 3, 3), jnp.float32),
        "conv_b": s * jax.random.normal(ks[9], (1,), jnp.float32),
    }


def _dilate2d(x, stride):
    n, h, w, c = x.shape
    out = jnp.zeros((n, (h - 1) * stride + 1, (w - 1) * stride + 1, c), x.dtype)
    return out.at[:, ::stride, ::stride, :].set(x)


def decoder_reference(z, params):
    """Pure-JAX float32 reference with identical semantics to the PyTorch module."""
    B = z.shape[0]
    c0, h0, w0 = SHAPE_BEFORE_FLATTENING
    x = z @ params["fc_w"].T + params["fc_b"]
    x = x.reshape(B, c0, h0, w0).transpose(0, 2, 3, 1)               # NHWC
    for wk, bk in (("ct1_w", "ct1_b"), ("ct2_w", "ct2_b"), ("ct3_w", "ct3_b")):
        w_hwio = jnp.flip(params[wk], axis=(2, 3)).transpose(2, 3, 0, 1)
        xp = jnp.pad(_dilate2d(x, 2), ((0, 0), (1, 2), (1, 2), (0, 0)))
        x = jax.lax.conv_general_dilated(
            xp, w_hwio, (1, 1), "VALID",
            dimension_numbers=("NHWC", "HWIO", "NHWC"),
            precision=jax.lax.Precision.HIGHEST) + params[bk]
        x = jax.nn.relu(x)
    w_hwio = params["conv_w"].transpose(2, 3, 1, 0)
    xp = jnp.pad(x, ((0, 0), (1, 1), (1, 1), (0, 0)))
    x = jax.lax.conv_general_dilated(
        xp, w_hwio, (1, 1), "VALID",
        dimension_numbers=("NHWC", "HWIO", "NHWC"),
        precision=jax.lax.Precision.HIGHEST) + params["conv_b"]
    x = jax.nn.sigmoid(x)
    return x.transpose(0, 3, 1, 2)


if __name__ == "__main__":
    key = jax.random.PRNGKey(0)
    k_param, k_z = jax.random.split(key)
    params = init_params(k_param)
    prep = prepare_params(params)

    batch = 2
    z = jax.random.normal(k_z, (batch, 2), jnp.float32)   # latent dim = 2

    out = jax.jit(decoder_forward)(z, prep)
    out = jax.block_until_ready(out)

    assert out.shape == (batch, 1, 32, 32), out.shape
    assert out.dtype == jnp.float32
    assert bool(jnp.all(jnp.isfinite(out)))
    assert bool(jnp.all((out >= 0.0) & (out <= 1.0)))      # sigmoid output range

    # Numerical cross-check against the pure-JAX float32 reference (kernel uses
    # bf16 MXU inputs with f32 accumulation -> small absolute tolerance).
    ref = decoder_reference(z, params)
    max_err = float(jnp.max(jnp.abs(out - ref)))
    assert max_err < 1e-2, max_err

    print("KERNEL_OK")
</pallas_src>

<mosaic_0001>
module attributes {stable_mosaic.version = 11 : i64} {
  func.func @_decoder_kernel(%arg0: i32, %arg1: memref<1x1x2xf32, #tpu.memory_space<vmem>>, %arg2: memref<2x128x16xf32, #tpu.memory_space<vmem>>, %arg3: memref<128x16xf32, #tpu.memory_space<vmem>>, %arg4: memref<3x3x128x128xbf16, #tpu.memory_space<vmem>>, %arg5: memref<128x1xf32, #tpu.memory_space<vmem>>, %arg6: memref<64x64xbf16, #tpu.memory_space<vmem>>, %arg7: memref<3x3x64x128xbf16, #tpu.memory_space<vmem>>, %arg8: memref<64x1xf32, #tpu.memory_space<vmem>>, %arg9: memref<256x256xbf16, #tpu.memory_space<vmem>>, %arg10: memref<3x3x32x64xbf16, #tpu.memory_space<vmem>>, %arg11: memref<32x1xf32, #tpu.memory_space<vmem>>, %arg12: memref<16x4x32xbf16, #tpu.memory_space<vmem>>, %arg13: memref<1x1xf32, #tpu.memory_space<vmem>>, %arg14: memref<1x4x256xf32, #tpu.memory_space<vmem>>) attributes {dimension_semantics = [#tpu.dimension_semantics<parallel>], iteration_bounds = array<i64: 2>, scalar_prefetch = 0 : i64, scratch_operands = 0 : i64, tpu.core_type = #tpu.core_type<tc>, window_params = [{transform_indices = @transform_0, window_bounds = array<i64: 1, 1, 2>}, {pipeline_mode = #tpu.pipeline_mode<synchronous>, transform_indices = @transform_1, window_bounds = array<i64: 2, 128, 16>}, {pipeline_mode = #tpu.pipeline_mode<synchronous>, transform_indices = @transform_2, window_bounds = array<i64: 128, 16>}, {pipeline_mode = #tpu.pipeline_mode<synchronous>, transform_indices = @transform_3, window_bounds = array<i64: 3, 3, 128, 128>}, {pipeline_mode = #tpu.pipeline_mode<synchronous>, transform_indices = @transform_4, window_bounds = array<i64: 128, 1>}, {pipeline_mode = #tpu.pipeline_mode<synchronous>, transform_indices = @transform_5, window_bounds = array<i64: 64, 64>}, {pipeline_mode = #tpu.pipeline_mode<synchronous>, transform_indices = @transform_6, window_bounds = array<i64: 3, 3, 64, 128>}, {pipeline_mode = #tpu.pipeline_mode<synchronous>, transform_indices = @transform_7, window_bounds = array<i64: 64, 1>}, {pipeline_mode = #tpu.pipeline_mode<synchronous>, transform_indices = @transform_8, window_bounds = array<i64: 256, 256>}, {pipeline_mode = #tpu.pipeline_mode<synchronous>, transform_indices = @transform_9, window_bounds = array<i64: 3, 3, 32, 64>}, {pipeline_mode = #tpu.pipeline_mode<synchronous>, transform_indices = @transform_10, window_bounds = array<i64: 32, 1>}, {pipeline_mode = #tpu.pipeline_mode<synchronous>, transform_indices = @transform_11, window_bounds = array<i64: 16, 4, 32>}, {pipeline_mode = #tpu.pipeline_mode<synchronous>, transform_indices = @transform_12, window_bounds = array<i64: 1, 1>}, {transform_indices = @transform_13, window_bounds = array<i64: 1, 4, 256>}]} {
    %c0 = arith.constant 0 : index
    %c0_0 = arith.constant 0 : index
    %c0_1 = arith.constant 0 : index
    %0 = vector.load %arg1[%c0, %c0_0, %c0_1] : memref<1x1x2xf32, #tpu.memory_space<vmem>>, vector<1x1x2xf32>
    %1 = vector.shape_cast %0 : vector<1x1x2xf32> to vector<1x2xf32>
    %2 = vector.extract_strided_slice %1 {offsets = [0, 0], sizes = [1, 1], strides = [1, 1]} : vector<1x2xf32> to vector<1x1xf32>
    %c0_2 = arith.constant 0 : index
    %c0_3 = arith.constant 0 : index
    %c0_4 = arith.constant 0 : index
    %3 = vector.load %arg2[%c0_2, %c0_3, %c0_4] : memref<2x128x16xf32, #tpu.memory_space<vmem>>, vector<1x128x16xf32>
    %4 = vector.shape_cast %3 : vector<1x128x16xf32> to vector<128x16xf32>
    %5 = vector.broadcast %2 : vector<1x1xf32> to vector<128x16xf32>
    %6 = arith.mulf %5, %4 : vector<128x16xf32>
    %7 = vector.extract_strided_slice %1 {offsets = [0, 1], sizes = [1, 1], strides = [1, 1]} : vector<1x2xf32> to vector<1x1xf32>
    %c1 = arith.constant 1 : index
    %c0_5 = arith.constant 0 : index
    %c0_6 = arith.constant 0 : index
    %8 = vector.load %arg2[%c1, %c0_5, %c0_6] : memref<2x128x16xf32, #tpu.memory_space<vmem>>, vector<1x128x16xf32>
    %9 = vector.shape_cast %8 : vector<1x128x16xf32> to vector<128x16xf32>
    %10 = vector.broadcast %7 : vector<1x1xf32> to vector<128x16xf32>
    %11 = arith.mulf %10, %9 : vector<128x16xf32>
    %12 = arith.addf %6, %11 : vector<128x16xf32>
    %c0_7 = arith.constant 0 : index
    %c0_8 = arith.constant 0 : index
    %13 = vector.load %arg3[%c0_7, %c0_8] : memref<128x16xf32, #tpu.memory_space<vmem>>, vector<128x16xf32>
    %14 = arith.addf %12, %13 : vector<128x16xf32>
    %15 = arith.truncf %14 : vector<128x16xf32> to vector<128x16xbf16>
    %c1_9 = arith.constant 1 : index
    %c1_10 = arith.constant 1 : index
    %c0_11 = arith.constant 0 : index
    %c0_12 = arith.constant 0 : index
    %16 = vector.load %arg4[%c1_9, %c1_10, %c0_11, %c0_12] : memref<3x3x128x128xbf16, #tpu.memory_space<vmem>>, vector<1x1x128x128xbf16>
    %17 = vector.shape_cast %16 : vector<1x1x128x128xbf16> to vector<128x128xbf16>
    %cst = arith.constant dense<0.000000e+00> : vector<128x16xf32>
    %18 = tpu.matmul %17, %15, %cst {dimension_numbers = #tpu.dot_dimension_numbers<[1], [0], [0], [1], [0, 0, 1, 1], [], []>} : vector<128x128xbf16>, vector<128x16xbf16>, vector<128x16xf32> -> vector<128x16xf32>
    %c1_13 = arith.constant 1 : index
    %c0_14 = arith.constant 0 : index
    %c0_15 = arith.constant 0 : index
    %c0_16 = arith.constant 0 : index
    %19 = vector.load %arg4[%c1_13, %c0_14, %c0_15, %c0_16] : memref<3x3x128x128xbf16, #tpu.memory_space<vmem>>, vector<1x1x128x128xbf16>
    %20 = vector.shape_cast %19 : vector<1x1x128x128xbf16> to vector<128x128xbf16>
    %cst_17 = arith.constant dense<0.000000e+00> : vector<128x16xf32>
    %21 = tpu.matmul %20, %15, %cst_17 {dimension_numbers = #tpu.dot_dimension_numbers<[1], [0], [0], [1], [0, 0, 1, 1], [], []>} : vector<128x128xbf16>, vector<128x16xbf16>, vector<128x16xf32> -> vector<128x16xf32>
    %c1_18 = arith.constant 1 : index
    %c2 = arith.constant 2 : index
    %c0_19 = arith.constant 0 : index
    %c0_20 = arith.constant 0 : index
    %22 = vector.load %arg4[%c1_18, %c2, %c0_19, %c0_20] : memref<3x3x128x128xbf16, #tpu.memory_space<vmem>>, vector<1x1x128x128xbf16>
    %23 = vector.shape_cast %22 : vector<1x1x128x128xbf16> to vector<128x128xbf16>
    %24 = vector.extract_strided_slice %15 {offsets = [0, 1], sizes = [128, 15], strides = [1, 1]} : vector<128x16xbf16> to vector<128x15xbf16>
    %cst_21 = arith.constant 0.000000e+00 : bf16
    %25 = vector.broadcast %cst_21 : bf16 to vector<128x1xbf16>
    %26 = tpu.concatenate %24, %25 in 1 : vector<128x15xbf16>, vector<128x1xbf16> -> vector<128x16xbf16>
    %27 = tpu.iota {dimensions = array<i32: 1>} : vector<1x16xi32>
    %c4_i32 = arith.constant 4 : i32
    %c0_i32 = arith.constant 0 : i32
    %28 = arith.cmpi eq, %c4_i32, %c0_i32 : i32
    %c1_i32 = arith.constant 1 : i32
    %29 = arith.select %28, %c1_i32, %c4_i32 : i32
    %30 = vector.broadcast %29 : i32 to vector<1x16xi32>
    %31 = arith.remsi %27, %30 : vector<1x16xi32>
    %c0_i32_22 = arith.constant 0 : i32
    %32 = vector.broadcast %c0_i32_22 : i32 to vector<1x16xi32>
    %33 = arith.cmpi ne, %31, %32 : vector<1x16xi32>
    %c0_i32_23 = arith.constant 0 : i32
    %34 = vector.broadcast %c0_i32_23 : i32 to vector<1x16xi32>
    %35 = arith.cmpi slt, %31, %34 : vector<1x16xi32>
    %c0_i32_24 = arith.constant 0 : i32
    %36 = arith.cmpi slt, %29, %c0_i32_24 : i32
    %37 = vector.broadcast %36 : i1 to vector<1x16xi1>
    %38 = vector.broadcast %37 : vector<1x16xi1> to vector<1x16xi1>
    %39 = arith.xori %35, %38 : vector<1x16xi1>
    %40 = arith.andi %39, %33 : vector<1x16xi1>
    %41 = vector.broadcast %29 : i32 to vector<1x16xi32>
    %42 = arith.addi %31, %41 : vector<1x16xi32>
    %43 = arith.select %40, %42, %31 : vector<1x16xi1>, vector<1x16xi32>
    %c3_i32 = arith.constant 3 : i32
    %44 = vector.broadcast %c3_i32 : i32 to vector<1x16xi32>
    %45 = arith.cmpi ne, %43, %44 : vector<1x16xi32>
    %46 = arith.extui %45 : vector<1x16xi1> to vector<1x16xi32>
    %47 = arith.sitofp %46 : vector<1x16xi32> to vector<1x16xf32>
    %48 = arith.truncf %47 : vector<1x16xf32> to vector<1x16xbf16>
    %49 = vector.broadcast %48 : vector<1x16xbf16> to vector<128x16xbf16>
    %50 = arith.mulf %26, %49 : vector<128x16xbf16>
    %cst_25 = arith.constant dense<0.000000e+00> : vector<128x16xf32>
    %51 = tpu.matmul %23, %50, %cst_25 {dimension_numbers = #tpu.dot_dimension_numbers<[1], [0], [0], [1], [0, 0, 1, 1], [], []>} : vector<128x128xbf16>, vector<128x16xbf16>, vector<128x16xf32> -> vector<128x16xf32>
    %52 = arith.addf %21, %51 : vector<128x16xf32>
    %c0_26 = arith.constant 0 : index
    %c1_27 = arith.constant 1 : index
    %c0_28 = arith.constant 0 : index
    %c0_29 = arith.constant 0 : index
    %53 = vector.load %arg4[%c0_26, %c1_27, %c0_28, %c0_29] : memref<3x3x128x128xbf16, #tpu.memory_space<vmem>>, vector<1x1x128x128xbf16>
    %54 = vector.shape_cast %53 : vector<1x1x128x128xbf16> to vector<128x128xbf16>
    %cst_30 = arith.constant dense<0.000000e+00> : vector<128x16xf32>
    %55 = tpu.matmul %54, %15, %cst_30 {dimension_numbers = #tpu.dot_dimension_numbers<[1], [0], [0], [1], [0, 0, 1, 1], [], []>} : vector<128x128xbf16>, vector<128x16xbf16>, vector<128x16xf32> -> vector<128x16xf32>
    %c2_31 = arith.constant 2 : index
    %c1_32 = arith.constant 1 : index
    %c0_33 = arith.constant 0 : index
    %c0_34 = arith.constant 0 : index
    %56 = vector.load %arg4[%c2_31, %c1_32, %c0_33, %c0_34] : memref<3x3x128x128xbf16, #tpu.memory_space<vmem>>, vector<1x1x128x128xbf16>
    %57 = vector.shape_cast %56 : vector<1x1x128x128xbf16> to vector<128x128xbf16>
    %58 = vector.extract_strided_slice %15 {offsets = [0, 4], sizes = [128, 12], strides = [1, 1]} : vector<128x16xbf16> to vector<128x12xbf16>
    %cst_35 = arith.constant 0.000000e+00 : bf16
    %59 = vector.broadcast %cst_35 : bf16 to vector<128x4xbf16>
    %60 = tpu.concatenate %58, %59 in 1 : vector<128x12xbf16>, vector<128x4xbf16> -> vector<128x16xbf16>
    %cst_36 = arith.constant dense<0.000000e+00> : vector<128x16xf32>
    %61 = tpu.matmul %57, %60, %cst_36 {dimension_numbers = #tpu.dot_dimension_numbers<[1], [0], [0], [1], [0, 0, 1, 1], [], []>} : vector<128x128xbf16>, vector<128x16xbf16>, vector<128x16xf32> -> vector<128x16xf32>
    %62 = arith.addf %55, %61 : vector<128x16xf32>
    %c0_37 = arith.constant 0 : index
    %c0_38 = arith.constant 0 : index
    %c0_39 = arith.constant 0 : index
    %c0_40 = arith.constant 0 : index
    %63 = vector.load %arg4[%c0_37, %c0_38, %c0_39, %c0_40] : memref<3x3x128x128xbf16, #tpu.memory_space<vmem>>, vector<1x1x128x128xbf16>
    %64 = vector.shape_cast %63 : vector<1x1x128x128xbf16> to vector<128x128xbf16>
    %cst_41 = arith.constant dense<0.000000e+00> : vector<128x16xf32>
    %65 = tpu.matmul %64, %15, %cst_41 {dimension_numbers = #tpu.dot_dimension_numbers<[1], [0], [0], [1], [0, 0, 1, 1], [], []>} : vector<128x128xbf16>, vector<128x16xbf16>, vector<128x16xf32> -> vector<128x16xf32>
    %c0_42 = arith.constant 0 : index
    %c2_43 = arith.constant 2 : index
    %c0_44 = arith.constant 0 : index
    %c0_45 = arith.constant 0 : index
    %66 = vector.load %arg4[%c0_42, %c2_43, %c0_44, %c0_45] : memref<3x3x128x128xbf16, #tpu.memory_space<vmem>>, vector<1x1x128x128xbf16>
    %67 = vector.shape_cast %66 : vector<1x1x128x128xbf16> to vector<128x128xbf16>
    %cst_46 = arith.constant dense<0.000000e+00> : vector<128x16xf32>
    %68 = tpu.matmul %67, %50, %cst_46 {dimension_numbers = #tpu.dot_dimension_numbers<[1], [0], [0], [1], [0, 0, 1, 1], [], []>} : vector<128x128xbf16>, vector<128x16xbf16>, vector<128x16xf32> -> vector<128x16xf32>
    %69 = arith.addf %65, %68 : vector<128x16xf32>
    %c2_47 = arith.constant 2 : index
    %c0_48 = arith.constant 0 : index
    %c0_49 = arith.constant 0 : index
    %c0_50 = arith.constant 0 : index
    %70 = vector.load %arg4[%c2_47, %c0_48, %c0_49, %c0_50] : memref<3x3x128x128xbf16, #tpu.memory_space<vmem>>, vector<1x1x128x128xbf16>
    %71 = vector.shape_cast %70 : vector<1x1x128x128xbf16> to vector<128x128xbf16>
    %cst_51 = arith.constant dense<0.000000e+00> : vector<128x16xf32>
    %72 = tpu.matmul %71, %60, %cst_51 {dimension_numbers = #tpu.dot_dimension_numbers<[1], [0], [0], [1], [0, 0, 1, 1], [], []>} : vector<128x128xbf16>, vector<128x16xbf16>, vector<128x16xf32> -> vector<128x16xf32>
    %73 = arith.addf %69, %72 : vector<128x16xf32>
    %c2_52 = arith.constant 2 : index
    %c2_53 = arith.constant 2 : index
    %c0_54 = arith.constant 0 : index
    %c0_55 = arith.constant 0 : index
    %74 = vector.load %arg4[%c2_52, %c2_53, %c0_54, %c0_55] : memref<3x3x128x128xbf16, #tpu.memory_space<vmem>>, vector<1x1x128x128xbf16>
    %75 = vector.shape_cast %74 : vector<1x1x128x128xbf16> to vector<128x128xbf16>
    %76 = vector.extract_strided_slice %15 {offsets = [0, 5], sizes = [128, 11], strides = [1, 1]} : vector<128x16xbf16> to vector<128x11xbf16>
    %cst_56 = arith.constant 0.000000e+00 : bf16
    %77 = vector.broadcast %cst_56 : bf16 to vector<128x5xbf16>
    %78 = tpu.concatenate %76, %77 in 1 : vector<128x11xbf16>, vector<128x5xbf16> -> vector<128x16xbf16>
    %79 = tpu.iota {dimensions = array<i32: 1>} : vector<1x16xi32>
    %c4_i32_57 = arith.constant 4 : i32
    %c0_i32_58 = arith.constant 0 : i32
    %80 = arith.cmpi eq, %c4_i32_57, %c0_i32_58 : i32
    %c1_i32_59 = arith.constant 1 : i32
    %81 = arith.select %80, %c1_i32_59, %c4_i32_57 : i32
    %82 = vector.broadcast %81 : i32 to vector<1x16xi32>
    %83 = arith.remsi %79, %82 : vector<1x16xi32>
    %c0_i32_60 = arith.constant 0 : i32
    %84 = vector.broadcast %c0_i32_60 : i32 to vector<1x16xi32>
    %85 = arith.cmpi ne, %83, %84 : vector<1x16xi32>
    %c0_i32_61 = arith.constant 0 : i32
    %86 = vector.broadcast %c0_i32_61 : i32 to vector<1x16xi32>
    %87 = arith.cmpi slt, %83, %86 : vector<1x16xi32>
    %c0_i32_62 = arith.constant 0 : i32
    %88 = arith.cmpi slt, %81, %c0_i32_62 : i32
    %89 = vector.broadcast %88 : i1 to vector<1x16xi1>
    %90 = vector.broadcast %89 : vector<1x16xi1> to vector<1x16xi1>
    %91 = arith.xori %87, %90 : vector<1x16xi1>
    %92 = arith.andi %91, %85 : vector<1x16xi1>
    %93 = vector.broadcast %81 : i32 to vector<1x16xi32>
    %94 = arith.addi %83, %93 : vector<1x16xi32>
    %95 = arith.select %92, %94, %83 : vector<1x16xi1>, vector<1x16xi32>
    %c3_i32_63 = arith.constant 3 : i32
    %96 = vector.broadcast %c3_i32_63 : i32 to vector<1x16xi32>
    %97 = arith.cmpi ne, %95, %96 : vector<1x16xi32>
    %98 = arith.extui %97 : vector<1x16xi1> to vector<1x16xi32>
    %99 = arith.sitofp %98 : vector<1x16xi32> to vector<1x16xf32>
    %100 = arith.truncf %99 : vector<1x16xf32> to vector<1x16xbf16>
    %101 = vector.broadcast %100 : vector<1x16xbf16> to vector<128x16xbf16>
    %102 = arith.mulf %78, %101 : vector<128x16xbf16>
    %cst_64 = arith.constant dense<0.000000e+00> : vector<128x16xf32>
    %103 = tpu.matmul %75, %102, %cst_64 {dimension_numbers = #tpu.dot_dimension_numbers<[1], [0], [0], [1], [0, 0, 1, 1], [], []>} : vector<128x128xbf16>, vector<128x16xbf16>, vector<128x16xf32> -> vector<128x16xf32>
    %104 = arith.addf %73, %103 : vector<128x16xf32>
    %105 = tpu.concatenate %18, %52, %62, %104 in 1 : vector<128x16xf32>, vector<128x16xf32>, vector<128x16xf32>, vector<128x16xf32> -> vector<128x64xf32>
    %106 = arith.truncf %105 : vector<128x64xf32> to vector<128x64xbf16>
    %c0_65 = arith.constant 0 : index
    %c0_66 = arith.constant 0 : index
    %107 = vector.load %arg6[%c0_65, %c0_66] : memref<64x64xbf16, #tpu.memory_space<vmem>>, vector<64x64xbf16>
    %cst_67 = arith.constant dense<0.000000e+00> : vector<128x64xf32>
    %108 = tpu.matmul %106, %107, %cst_67 {dimension_numbers = #tpu.dot_dimension_numbers<[1], [0], [0], [1], [0, 0, 1, 1], [], []>} : vector<128x64xbf16>, vector<64x64xbf16>, vector<128x64xf32> -> vector<128x64xf32>
    %c0_68 = arith.constant 0 : index
    %c0_69 = arith.constant 0 : index
    %109 = vector.load %arg5[%c0_68, %c0_69] : memref<128x1xf32, #tpu.memory_space<vmem>>, vector<128x1xf32>
    %110 = vector.broadcast %109 : vector<128x1xf32> to vector<128x64xf32>
    %111 = arith.addf %108, %110 : vector<128x64xf32>
    %cst_70 = arith.constant 0.000000e+00 : f32
    %112 = vector.broadcast %cst_70 : f32 to vector<128x64xf32>
    %113 = arith.maximumf %111, %112 : vector<128x64xf32>
    %114 = arith.truncf %113 : vector<128x64xf32> to vector<128x64xbf16>
    %c1_71 = arith.constant 1 : index
    %c1_72 = arith.constant 1 : index
    %c0_73 = arith.constant 0 : index
    %c0_74 = arith.constant 0 : index
    %115 = vector.load %arg7[%c1_71, %c1_72, %c0_73, %c0_74] : memref<3x3x64x128xbf16, #tpu.memory_space<vmem>>, vector<1x1x64x128xbf16>
    %116 = vector.shape_cast %115 : vector<1x1x64x128xbf16> to vector<64x128xbf16>
    %cst_75 = arith.constant dense<0.000000e+00> : vector<64x64xf32>
    %117 = tpu.matmul %116, %114, %cst_75 {dimension_numbers = #tpu.dot_dimension_numbers<[1], [0], [0], [1], [0, 0, 1, 1], [], []>} : vector<64x128xbf16>, vector<128x64xbf16>, vector<64x64xf32> -> vector<64x64xf32>
    %c1_76 = arith.constant 1 : index
    %c0_77 = arith.constant 0 : index
    %c0_78 = arith.constant 0 : index
    %c0_79 = arith.constant 0 : index
    %118 = vector.load %arg7[%c1_76, %c0_77, %c0_78, %c0_79] : memref<3x3x64x128xbf16, #tpu.memory_space<vmem>>, vector<1x1x64x128xbf16>
    %119 = vector.shape_cast %118 : vector<1x1x64x128xbf16> to vector<64x128xbf16>
    %cst_80 = arith.constant dense<0.000000e+00> : vector<64x64xf32>
    %120 = tpu.matmul %119, %114, %cst_80 {dimension_numbers = #tpu.dot_dimension_numbers<[1], [0], [0], [1], [0, 0, 1, 1], [], []>} : vector<64x128xbf16>, vector<128x64xbf16>, vector<64x64xf32> -> vector<64x64xf32>
    %c1_81 = arith.constant 1 : index
    %c2_82 = arith.constant 2 : index
    %c0_83 = arith.constant 0 : index
    %c0_84 = arith.constant 0 : index
    %121 = vector.load %arg7[%c1_81, %c2_82, %c0_83, %c0_84] : memref<3x3x64x128xbf16, #tpu.memory_space<vmem>>, vector<1x1x64x128xbf16>
    %122 = vector.shape_cast %121 : vector<1x1x64x128xbf16> to vector<64x128xbf16>
    %123 = vector.extract_strided_slice %114 {offsets = [0, 1], sizes = [128, 63], strides = [1, 1]} : vector<128x64xbf16> to vector<128x63xbf16>
    %cst_85 = arith.constant 0.000000e+00 : bf16
    %124 = vector.broadcast %cst_85 : bf16 to vector<128x1xbf16>
    %125 = tpu.concatenate %123, %124 in 1 : vector<128x63xbf16>, vector<128x1xbf16> -> vector<128x64xbf16>
    %126 = tpu.iota {dimensions = array<i32: 1>} : vector<1x64xi32>
    %c8_i32 = arith.constant 8 : i32
    %c0_i32_86 = arith.constant 0 : i32
    %127 = arith.cmpi eq, %c8_i32, %c0_i32_86 : i32
    %c1_i32_87 = arith.constant 1 : i32
    %128 = arith.select %127, %c1_i32_87, %c8_i32 : i32
    %129 = vector.broadcast %128 : i32 to vector<1x64xi32>
    %130 = arith.remsi %126, %129 : vector<1x64xi32>
    %c0_i32_88 = arith.constant 0 : i32
    %131 = vector.broadcast %c0_i32_88 : i32 to vector<1x64xi32>
    %132 = arith.cmpi ne, %130, %131 : vector<1x64xi32>
    %c0_i32_89 = arith.constant 0 : i32
    %133 = vector.broadcast %c0_i32_89 : i32 to vector<1x64xi32>
    %134 = arith.cmpi slt, %130, %133 : vector<1x64xi32>
    %c0_i32_90 = arith.constant 0 : i32
    %135 = arith.cmpi slt, %128, %c0_i32_90 : i32
    %136 = vector.broadcast %135 : i1 to vector<1x64xi1>
    %137 = vector.broadcast %136 : vector<1x64xi1> to vector<1x64xi1>
    %138 = arith.xori %134, %137 : vector<1x64xi1>
    %139 = arith.andi %138, %132 : vector<1x64xi1>
    %140 = vector.broadcast %128 : i32 to vector<1x64xi32>
    %141 = arith.addi %130, %140 : vector<1x64xi32>
    %142 = arith.select %139, %141, %130 : vector<1x64xi1>, vector<1x64xi32>
    %c7_i32 = arith.constant 7 : i32
    %143 = vector.broadcast %c7_i32 : i32 to vector<1x64xi32>
    %144 = arith.cmpi ne, %142, %143 : vector<1x64xi32>
    %145 = arith.extui %144 : vector<1x64xi1> to vector<1x64xi32>
    %146 = arith.sitofp %145 : vector<1x64xi32> to vector<1x64xf32>
    %147 = arith.truncf %146 : vector<1x64xf32> to vector<1x64xbf16>
    %148 = vector.broadcast %147 : vector<1x64xbf16> to vector<128x64xbf16>
    %149 = arith.mulf %125, %148 : vector<128x64xbf16>
    %cst_91 = arith.constant dense<0.000000e+00> : vector<64x64xf32>
    %150 = tpu.matmul %122, %149, %cst_91 {dimension_numbers = #tpu.dot_dimension_numbers<[1], [0], [0], [1], [0, 0, 1, 1], [], []>} : vector<64x128xbf16>, vector<128x64xbf16>, vector<64x64xf32> -> vector<64x64xf32>
    %151 = arith.addf %120, %150 : vector<64x64xf32>
    %c0_92 = arith.constant 0 : index
    %c1_93 = arith.constant 1 : index
    %c0_94 = arith.constant 0 : index
    %c0_95 = arith.constant 0 : index
    %152 = vector.load %arg7[%c0_92, %c1_93, %c0_94, %c0_95] : memref<3x3x64x128xbf16, #tpu.memory_space<vmem>>, vector<1x1x64x128xbf16>
    %153 = vector.shape_cast %152 : vector<1x1x64x128xbf16> to vector<64x128xbf16>
    %cst_96 = arith.constant dense<0.000000e+00> : vector<64x64xf32>
    %154 = tpu.matmul %153, %114, %cst_96 {dimension_numbers = #tpu.dot_dimension_numbers<[1], [0], [0], [1], [0, 0, 1, 1], [], []>} : vector<64x128xbf16>, vector<128x64xbf16>, vector<64x64xf32> -> vector<64x64xf32>
    %c2_97 = arith.constant 2 : index
    %c1_98 = arith.constant 1 : index
    %c0_99 = arith.constant 0 : index
    %c0_100 = arith.constant 0 : index
    %155 = vector.load %arg7[%c2_97, %c1_98, %c0_99, %c0_100] : memref<3x3x64x128xbf16, #tpu.memory_space<vmem>>, vector<1x1x64x128xbf16>
    %156 = vector.shape_cast %155 : vector<1x1x64x128xbf16> to vector<64x128xbf16>
    %157 = vector.extract_strided_slice %114 {offsets = [0, 8], sizes = [128, 56], strides = [1, 1]} : vector<128x64xbf16> to vector<128x56xbf16>
    %cst_101 = arith.constant 0.000000e+00 : bf16
    %158 = vector.broadcast %cst_101 : bf16 to vector<128x8xbf16>
    %159 = tpu.concatenate %157, %158 in 1 : vector<128x56xbf16>, vector<128x8xbf16> -> vector<128x64xbf16>
    %cst_102 = arith.constant dense<0.000000e+00> : vector<64x64xf32>
    %160 = tpu.matmul %156, %159, %cst_102 {dimension_numbers = #tpu.dot_dimension_numbers<[1], [0], [0], [1], [0, 0, 1, 1], [], []>} : vector<64x128xbf16>, vector<128x64xbf16>, vector<64x64xf32> -> vector<64x64xf32>
    %161 = arith.addf %154, %160 : vector<64x64xf32>
    %c0_103 = arith.constant 0 : index
    %c0_104 = arith.constant 0 : index
    %c0_105 = arith.constant 0 : index
    %c0_106 = arith.constant 0 : index
    %162 = vector.load %arg7[%c0_103, %c0_104, %c0_105, %c0_106] : memref<3x3x64x128xbf16, #tpu.memory_space<vmem>>, vector<1x1x64x128xbf16>
    %163 = vector.shape_cast %162 : vector<1x1x64x128xbf16> to vector<64x128xbf16>
    %cst_107 = arith.constant dense<0.000000e+00> : vector<64x64xf32>
    %164 = tpu.matmul %163, %114, %cst_107 {dimension_numbers = #tpu.dot_dimension_numbers<[1], [0], [0], [1], [0, 0, 1, 1], [], []>} : vector<64x128xbf16>, vector<128x64xbf16>, vector<64x64xf32> -> vector<64x64xf32>
    %c0_108 = arith.constant 0 : index
    %c2_109 = arith.constant 2 : index
    %c0_110 = arith.constant 0 : index
    %c0_111 = arith.constant 0 : index
    %165 = vector.load %arg7[%c0_108, %c2_109, %c0_110, %c0_111] : memref<3x3x64x128xbf16, #tpu.memory_space<vmem>>, vector<1x1x64x128xbf16>
    %166 = vector.shape_cast %165 : vector<1x1x64x128xbf16> to vector<64x128xbf16>
    %cst_112 = arith.constant dense<0.000000e+00> : vector<64x64xf32>
    %167 = tpu.matmul %166, %149, %cst_112 {dimension_numbers = #tpu.dot_dimension_numbers<[1], [0], [0], [1], [0, 0, 1, 1], [], []>} : vector<64x128xbf16>, vector<128x64xbf16>, vector<64x64xf32> -> vector<64x64xf32>
    %168 = arith.addf %164, %167 : vector<64x64xf32>
    %c2_113 = arith.constant 2 : index
    %c0_114 = arith.constant 0 : index
    %c0_115 = arith.constant 0 : index
    %c0_116 = arith.constant 0 : index
    %169 = vector.load %arg7[%c2_113, %c0_114, %c0_115, %c0_116] : memref<3x3x64x128xbf16, #tpu.memory_space<vmem>>, vector<1x1x64x128xbf16>
    %170 = vector.shape_cast %169 : vector<1x1x64x128xbf16> to vector<64x128xbf16>
    %cst_117 = arith.constant dense<0.000000e+00> : vector<64x64xf32>
    %171 = tpu.matmul %170, %159, %cst_117 {dimension_numbers = #tpu.dot_dimension_numbers<[1], [0], [0], [1], [0, 0, 1, 1], [], []>} : vector<64x128xbf16>, vector<128x64xbf16>, vector<64x64xf32> -> vector<64x64xf32>
    %172 = arith.addf %168, %171 : vector<64x64xf32>
    %c2_118 = arith.constant 2 : index
    %c2_119 = arith.constant 2 : index
    %c0_120 = arith.constant 0 : index
    %c0_121 = arith.constant 0 : index
    %173 = vector.load %arg7[%c2_118, %c2_119, %c0_120, %c0_121] : memref<3x3x64x128xbf16, #tpu.memory_space<vmem>>, vector<1x1x64x128xbf16>
    %174 = vector.shape_cast %173 : vector<1x1x64x128xbf16> to vector<64x128xbf16>
    %175 = vector.extract_strided_slice %114 {offsets = [0, 9], sizes = [128, 55], strides = [1, 1]} : vector<128x64xbf16> to vector<128x55xbf16>
    %cst_122 = arith.constant 0.000000e+00 : bf16
    %176 = vector.broadcast %cst_122 : bf16 to vector<128x9xbf16>
    %177 = tpu.concatenate %175, %176 in 1 : vector<128x55xbf16>, vector<128x9xbf16> -> vector<128x64xbf16>
    %178 = tpu.iota {dimensions = array<i32: 1>} : vector<1x64xi32>
    %c8_i32_123 = arith.constant 8 : i32
    %c0_i32_124 = arith.constant 0 : i32
    %179 = arith.cmpi eq, %c8_i32_123, %c0_i32_124 : i32
    %c1_i32_125 = arith.constant 1 : i32
    %180 = arith.select %179, %c1_i32_125, %c8_i32_123 : i32
    %181 = vector.broadcast %180 : i32 to vector<1x64xi32>
    %182 = arith.remsi %178, %181 : vector<1x64xi32>
    %c0_i32_126 = arith.constant 0 : i32
    %183 = vector.broadcast %c0_i32_126 : i32 to vector<1x64xi32>
    %184 = arith.cmpi ne, %182, %183 : vector<1x64xi32>
    %c0_i32_127 = arith.constant 0 : i32
    %185 = vector.broadcast %c0_i32_127 : i32 to vector<1x64xi32>
    %186 = arith.cmpi slt, %182, %185 : vector<1x64xi32>
    %c0_i32_128 = arith.constant 0 : i32
    %187 = arith.cmpi slt, %180, %c0_i32_128 : i32
    %188 = vector.broadcast %187 : i1 to vector<1x64xi1>
    %189 = vector.broadcast %188 : vector<1x64xi1> to vector<1x64xi1>
    %190 = arith.xori %186, %189 : vector<1x64xi1>
    %191 = arith.andi %190, %184 : vector<1x64xi1>
    %192 = vector.broadcast %180 : i32 to vector<1x64xi32>
    %193 = arith.addi %182, %192 : vector<1x64xi32>
    %194 = arith.select %191, %193, %182 : vector<1x64xi1>, vector<1x64xi32>
    %c7_i32_129 = arith.constant 7 : i32
    %195 = vector.broadcast %c7_i32_129 : i32 to vector<1x64xi32>
    %196 = arith.cmpi ne, %194, %195 : vector<1x64xi32>
    %197 = arith.extui %196 : vector<1x64xi1> to vector<1x64xi32>
    %198 = arith.sitofp %197 : vector<1x64xi32> to vector<1x64xf32>
    %199 = arith.truncf %198 : vector<1x64xf32> to vector<1x64xbf16>
    %200 = vector.broadcast %199 : vector<1x64xbf16> to vector<128x64xbf16>
    %201 = arith.mulf %177, %200 : vector<128x64xbf16>
    %cst_130 = arith.constant dense<0.000000e+00> : vector<64x64xf32>
    %202 = tpu.matmul %174, %201, %cst_130 {dimension_numbers = #tpu.dot_dimension_numbers<[1], [0], [0], [1], [0, 0, 1, 1], [], []>} : vector<64x128xbf16>, vector<128x64xbf16>, vector<64x64xf32> -> vector<64x64xf32>
    %203 = arith.addf %172, %202 : vector<64x64xf32>
    %204 = tpu.concatenate %117, %151, %161, %203 in 1 : vector<64x64xf32>, vector<64x64xf32>, vector<64x64xf32>, vector<64x64xf32> -> vector<64x256xf32>
    %205 = arith.truncf %204 : vector<64x256xf32> to vector<64x256xbf16>
    %c0_131 = arith.constant 0 : index
    %c0_132 = arith.constant 0 : index
    %206 = vector.load %arg9[%c0_131, %c0_132] : memref<256x256xbf16, #tpu.memory_space<vmem>>, vector<256x256xbf16>
    %cst_133 = arith.constant dense<0.000000e+00> : vector<64x256xf32>
    %207 = tpu.matmul %205, %206, %cst_133 {dimension_numbers = #tpu.dot_dimension_numbers<[1], [0], [0], [1], [0, 0, 1, 1], [], []>} : vector<64x256xbf16>, vector<256x256xbf16>, vector<64x256xf32> -> vector<64x256xf32>
    %c0_134 = arith.constant 0 : index
    %c0_135 = arith.constant 0 : index
    %208 = vector.load %arg8[%c0_134, %c0_135] : memref<64x1xf32, #tpu.memory_space<vmem>>, vector<64x1xf32>
    %209 = vector.broadcast %208 : vector<64x1xf32> to vector<64x256xf32>
    %210 = arith.addf %207, %209 : vector<64x256xf32>
    %cst_136 = arith.constant 0.000000e+00 : f32
    %211 = vector.broadcast %cst_136 : f32 to vector<64x256xf32>
    %212 = arith.maximumf %210, %211 : vector<64x256xf32>
    %213 = arith.truncf %212 : vector<64x256xf32> to vector<64x256xbf16>
    %c1_137 = arith.constant 1 : index
    %c1_138 = arith.constant 1 : index
    %c0_139 = arith.constant 0 : index
    %c0_140 = arith.constant 0 : index
    %214 = vector.load %arg10[%c1_137, %c1_138, %c0_139, %c0_140] : memref<3x3x32x64xbf16, #tpu.memory_space<vmem>>, vector<1x1x32x64xbf16>
    %215 = vector.shape_cast %214 : vector<1x1x32x64xbf16> to vector<32x64xbf16>
    %cst_141 = arith.constant dense<0.000000e+00> : vector<32x256xf32>
    %216 = tpu.matmul %215, %213, %cst_141 {dimension_numbers = #tpu.dot_dimension_numbers<[1], [0], [0], [1], [0, 0, 1, 1], [], []>} : vector<32x64xbf16>, vector<64x256xbf16>, vector<32x256xf32> -> vector<32x256xf32>
    %c1_142 = arith.constant 1 : index
    %c0_143 = arith.constant 0 : index
    %c0_144 = arith.constant 0 : index
    %c0_145 = arith.constant 0 : index
    %217 = vector.load %arg10[%c1_142, %c0_143, %c0_144, %c0_145] : memref<3x3x32x64xbf16, #tpu.memory_space<vmem>>, vector<1x1x32x64xbf16>
    %218 = vector.shape_cast %217 : vector<1x1x32x64xbf16> to vector<32x64xbf16>
    %cst_146 = arith.constant dense<0.000000e+00> : vector<32x256xf32>
    %219 = tpu.matmul %218, %213, %cst_146 {dimension_numbers = #tpu.dot_dimension_numbers<[1], [0], [0], [1], [0, 0, 1, 1], [], []>} : vector<32x64xbf16>, vector<64x256xbf16>, vector<32x256xf32> -> vector<32x256xf32>
    %c1_147 = arith.constant 1 : index
    %c2_148 = arith.constant 2 : index
    %c0_149 = arith.constant 0 : index
    %c0_150 = arith.constant 0 : index
    %220 = vector.load %arg10[%c1_147, %c2_148, %c0_149, %c0_150] : memref<3x3x32x64xbf16, #tpu.memory_space<vmem>>, vector<1x1x32x64xbf16>
    %221 = vector.shape_cast %220 : vector<1x1x32x64xbf16> to vector<32x64xbf16>
    %222 = vector.extract_strided_slice %213 {offsets = [0, 1], sizes = [64, 255], strides = [1, 1]} : vector<64x256xbf16> to vector<64x255xbf16>
    %cst_151 = arith.constant 0.000000e+00 : bf16
    %223 = vector.broadcast %cst_151 : bf16 to vector<64x1xbf16>
    %224 = tpu.concatenate %222, %223 in 1 : vector<64x255xbf16>, vector<64x1xbf16> -> vector<64x256xbf16>
    %225 = tpu.iota {dimensions = array<i32: 1>} : vector<1x256xi32>
    %c16_i32 = arith.constant 16 : i32
    %c0_i32_152 = arith.constant 0 : i32
    %226 = arith.cmpi eq, %c16_i32, %c0_i32_152 : i32
    %c1_i32_153 = arith.constant 1 : i32
    %227 = arith.select %226, %c1_i32_153, %c16_i32 : i32
    %228 = vector.broadcast %227 : i32 to vector<1x256xi32>
    %229 = arith.remsi %225, %228 : vector<1x256xi32>
    %c0_i32_154 = arith.constant 0 : i32
    %230 = vector.broadcast %c0_i32_154 : i32 to vector<1x256xi32>
    %231 = arith.cmpi ne, %229, %230 : vector<1x256xi32>
    %c0_i32_155 = arith.constant 0 : i32
    %232 = vector.broadcast %c0_i32_155 : i32 to vector<1x256xi32>
    %233 = arith.cmpi slt, %229, %232 : vector<1x256xi32>
    %c0_i32_156 = arith.constant 0 : i32
    %234 = arith.cmpi slt, %227, %c0_i32_156 : i32
    %235 = vector.broadcast %234 : i1 to vector<1x256xi1>
    %236 = vector.broadcast %235 : vector<1x256xi1> to vector<1x256xi1>
    %237 = arith.xori %233, %236 : vector<1x256xi1>
    %238 = arith.andi %237, %231 : vector<1x256xi1>
    %239 = vector.broadcast %227 : i32 to vector<1x256xi32>
    %240 = arith.addi %229, %239 : vector<1x256xi32>
    %241 = arith.select %238, %240, %229 : vector<1x256xi1>, vector<1x256xi32>
    %c15_i32 = arith.constant 15 : i32
    %242 = vector.broadcast %c15_i32 : i32 to vector<1x256xi32>
    %243 = arith.cmpi ne, %241, %242 : vector<1x256xi32>
    %244 = arith.extui %243 : vector<1x256xi1> to vector<1x256xi32>
    %245 = arith.sitofp %244 : vector<1x256xi32> to vector<1x256xf32>
    %246 = arith.truncf %245 : vector<1x256xf32> to vector<1x256xbf16>
    %247 = vector.broadcast %246 : vector<1x256xbf16> to vector<64x256xbf16>
    %248 = arith.mulf %224, %247 : vector<64x256xbf16>
    %cst_157 = arith.constant dense<0.000000e+00> : vector<32x256xf32>
    %249 = tpu.matmul %221, %248, %cst_157 {dimension_numbers = #tpu.dot_dimension_numbers<[1], [0], [0], [1], [0, 0, 1, 1], [], []>} : vector<32x64xbf16>, vector<64x256xbf16>, vector<32x256xf32> -> vector<32x256xf32>
    %250 = arith.addf %219, %249 : vector<32x256xf32>
    %c0_158 = arith.constant 0 : index
    %c1_159 = arith.constant 1 : index
    %c0_160 = arith.constant 0 : index
    %c0_161 = arith.constant 0 : index
    %251 = vector.load %arg10[%c0_158, %c1_159, %c0_160, %c0_161] : memref<3x3x32x64xbf16, #tpu.memory_space<vmem>>, vector<1x1x32x64xbf16>
    %252 = vector.shape_cast %251 : vector<1x1x32x64xbf16> to vector<32x64xbf16>
    %cst_162 = arith.constant dense<0.000000e+00> : vector<32x256xf32>
    %253 = tpu.matmul %252, %213, %cst_162 {dimension_numbers = #tpu.dot_dimension_numbers<[1], [0], [0], [1], [0, 0, 1, 1], [], []>} : vector<32x64xbf16>, vector<64x256xbf16>, vector<32x256xf32> -> vector<32x256xf32>
    %c2_163 = arith.constant 2 : index
    %c1_164 = arith.constant 1 : index
    %c0_165 = arith.constant 0 : index
    %c0_166 = arith.constant 0 : index
    %254 = vector.load %arg10[%c2_163, %c1_164, %c0_165, %c0_166] : memref<3x3x32x64xbf16, #tpu.memory_space<vmem>>, vector<1x1x32x64xbf16>
    %255 = vector.shape_cast %254 : vector<1x1x32x64xbf16> to vector<32x64xbf16>
    %256 = vector.extract_strided_slice %213 {offsets = [0, 16], sizes = [64, 240], strides = [1, 1]} : vector<64x256xbf16> to vector<64x240xbf16>
    %cst_167 = arith.constant 0.000000e+00 : bf16
    %257 = vector.broadcast %cst_167 : bf16 to vector<64x16xbf16>
    %258 = tpu.concatenate %256, %257 in 1 : vector<64x240xbf16>, vector<64x16xbf16> -> vector<64x256xbf16>
    %cst_168 = arith.constant dense<0.000000e+00> : vector<32x256xf32>
    %259 = tpu.matmul %255, %258, %cst_168 {dimension_numbers = #tpu.dot_dimension_numbers<[1], [0], [0], [1], [0, 0, 1, 1], [], []>} : vector<32x64xbf16>, vector<64x256xbf16>, vector<32x256xf32> -> vector<32x256xf32>
    %260 = arith.addf %253, %259 : vector<32x256xf32>
    %c0_169 = arith.constant 0 : index
    %c0_170 = arith.constant 0 : index
    %c0_171 = arith.constant 0 : index
    %c0_172 = arith.constant 0 : index
    %261 = vector.load %arg10[%c0_169, %c0_170, %c0_171, %c0_172] : memref<3x3x32x64xbf16, #tpu.memory_space<vmem>>, vector<1x1x32x64xbf16>
    %262 = vector.shape_cast %261 : vector<1x1x32x64xbf16> to vector<32x64xbf16>
    %cst_173 = arith.constant dense<0.000000e+00> : vector<32x256xf32>
    %263 = tpu.matmul %262, %213, %cst_173 {dimension_numbers = #tpu.dot_dimension_numbers<[1], [0], [0], [1], [0, 0, 1, 1], [], []>} : vector<32x64xbf16>, vector<64x256xbf16>, vector<32x256xf32> -> vector<32x256xf32>
    %c0_174 = arith.constant 0 : index
    %c2_175 = arith.constant 2 : index
    %c0_176 = arith.constant 0 : index
    %c0_177 = arith.constant 0 : index
    %264 = vector.load %arg10[%c0_174, %c2_175, %c0_176, %c0_177] : memref<3x3x32x64xbf16, #tpu.memory_space<vmem>>, vector<1x1x32x64xbf16>
    %265 = vector.shape_cast %264 : vector<1x1x32x64xbf16> to vector<32x64xbf16>
    %cst_178 = arith.constant dense<0.000000e+00> : vector<32x256xf32>
    %266 = tpu.matmul %265, %248, %cst_178 {dimension_numbers = #tpu.dot_dimension_numbers<[1], [0], [0], [1], [0, 0, 1, 1], [], []>} : vector<32x64xbf16>, vector<64x256xbf16>, vector<32x256xf32> -> vector<32x256xf32>
    %267 = arith.addf %263, %266 : vector<32x256xf32>
    %c2_179 = arith.constant 2 : index
    %c0_180 = arith.constant 0 : index
    %c0_181 = arith.constant 0 : index
    %c0_182 = arith.constant 0 : index
    %268 = vector.load %arg10[%c2_179, %c0_180, %c0_181, %c0_182] : memref<3x3x32x64xbf16, #tpu.memory_space<vmem>>, vector<1x1x32x64xbf16>
    %269 = vector.shape_cast %268 : vector<1x1x32x64xbf16> to vector<32x64xbf16>
    %cst_183 = arith.constant dense<0.000000e+00> : vector<32x256xf32>
    %270 = tpu.matmul %269, %258, %cst_183 {dimension_numbers = #tpu.dot_dimension_numbers<[1], [0], [0], [1], [0, 0, 1, 1], [], []>} : vector<32x64xbf16>, vector<64x256xbf16>, vector<32x256xf32> -> vector<32x256xf32>
    %271 = arith.addf %267, %270 : vector<32x256xf32>
    %c2_184 = arith.constant 2 : index
    %c2_185 = arith.constant 2 : index
    %c0_186 = arith.constant 0 : index
    %c0_187 = arith.constant 0 : index
    %272 = vector.load %arg10[%c2_184, %c2_185, %c0_186, %c0_187] : memref<3x3x32x64xbf16, #tpu.memory_space<vmem>>, vector<1x1x32x64xbf16>
    %273 = vector.shape_cast %272 : vector<1x1x32x64xbf16> to vector<32x64xbf16>
    %274 = vector.extract_strided_slice %213 {offsets = [0, 17], sizes = [64, 239], strides = [1, 1]} : vector<64x256xbf16> to vector<64x239xbf16>
    %cst_188 = arith.constant 0.000000e+00 : bf16
    %275 = vector.broadcast %cst_188 : bf16 to vector<64x17xbf16>
    %276 = tpu.concatenate %274, %275 in 1 : vector<64x239xbf16>, vector<64x17xbf16> -> vector<64x256xbf16>
    %277 = tpu.iota {dimensions = array<i32: 1>} : vector<1x256xi32>
    %c16_i32_189 = arith.constant 16 : i32
    %c0_i32_190 = arith.constant 0 : i32
    %278 = arith.cmpi eq, %c16_i32_189, %c0_i32_190 : i32
    %c1_i32_191 = arith.constant 1 : i32
    %279 = arith.select %278, %c1_i32_191, %c16_i32_189 : i32
    %280 = vector.broadcast %279 : i32 to vector<1x256xi32>
    %281 = arith.remsi %277, %280 : vector<1x256xi32>
    %c0_i32_192 = arith.constant 0 : i32
    %282 = vector.broadcast %c0_i32_192 : i32 to vector<1x256xi32>
    %283 = arith.cmpi ne, %281, %282 : vector<1x256xi32>
    %c0_i32_193 = arith.constant 0 : i32
    %284 = vector.broadcast %c0_i32_193 : i32 to vector<1x256xi32>
    %285 = arith.cmpi slt, %281, %284 : vector<1x256xi32>
    %c0_i32_194 = arith.constant 0 : i32
    %286 = arith.cmpi slt, %279, %c0_i32_194 : i32
    %287 = vector.broadcast %286 : i1 to vector<1x256xi1>
    %288 = vector.broadcast %287 : vector<1x256xi1> to vector<1x256xi1>
    %289 = arith.xori %285, %288 : vector<1x256xi1>
    %290 = arith.andi %289, %283 : vector<1x256xi1>
    %291 = vector.broadcast %279 : i32 to vector<1x256xi32>
    %292 = arith.addi %281, %291 : vector<1x256xi32>
    %293 = arith.select %290, %292, %281 : vector<1x256xi1>, vector<1x256xi32>
    %c15_i32_195 = arith.constant 15 : i32
    %294 = vector.broadcast %c15_i32_195 : i32 to vector<1x256xi32>
    %295 = arith.cmpi ne, %293, %294 : vector<1x256xi32>
    %296 = arith.extui %295 : vector<1x256xi1> to vector<1x256xi32>
    %297 = arith.sitofp %296 : vector<1x256xi32> to vector<1x256xf32>
    %298 = arith.truncf %297 : vector<1x256xf32> to vector<1x256xbf16>
    %299 = vector.broadcast %298 : vector<1x256xbf16> to vector<64x256xbf16>
    %300 = arith.mulf %276, %299 : vector<64x256xbf16>
    %cst_196 = arith.constant dense<0.000000e+00> : vector<32x256xf32>
    %301 = tpu.matmul %273, %300, %cst_196 {dimension_numbers = #tpu.dot_dimension_numbers<[1], [0], [0], [1], [0, 0, 1, 1], [], []>} : vector<32x64xbf16>, vector<64x256xbf16>, vector<32x256xf32> -> vector<32x256xf32>
    %302 = arith.addf %271, %301 : vector<32x256xf32>
    %c0_197 = arith.constant 0 : index
    %c0_198 = arith.constant 0 : index
    %303 = vector.load %arg11[%c0_197, %c0_198] : memref<32x1xf32, #tpu.memory_space<vmem>>, vector<32x1xf32>
    %304 = vector.broadcast %303 : vector<32x1xf32> to vector<32x256xf32>
    %305 = arith.addf %216, %304 : vector<32x256xf32>
    %cst_199 = arith.constant 0.000000e+00 : f32
    %306 = vector.broadcast %cst_199 : f32 to vector<32x256xf32>
    %307 = arith.maximumf %305, %306 : vector<32x256xf32>
    %308 = arith.truncf %307 : vector<32x256xf32> to vector<32x256xbf16>
    %c0_200 = arith.constant 0 : index
    %c0_201 = arith.constant 0 : index
    %309 = vector.load %arg11[%c0_200, %c0_201] : memref<32x1xf32, #tpu.memory_space<vmem>>, vector<32x1xf32>
    %310 = vector.broadcast %309 : vector<32x1xf32> to vector<32x256xf32>
    %311 = arith.addf %250, %310 : vector<32x256xf32>
    %cst_202 = arith.constant 0.000000e+00 : f32
    %312 = vector.broadcast %cst_202 : f32 to vector<32x256xf32>
    %313 = arith.maximumf %311, %312 : vector<32x256xf32>
    %314 = arith.truncf %313 : vector<32x256xf32> to vector<32x256xbf16>
    %c0_203 = arith.constant 0 : index
    %c0_204 = arith.constant 0 : index
    %315 = vector.load %arg11[%c0_203, %c0_204] : memref<32x1xf32, #tpu.memory_space<vmem>>, vector<32x1xf32>
    %316 = vector.broadcast %315 : vector<32x1xf32> to vector<32x256xf32>
    %317 = arith.addf %260, %316 : vector<32x256xf32>
    %cst_205 = arith.constant 0.000000e+00 : f32
    %318 = vector.broadcast %cst_205 : f32 to vector<32x256xf32>
    %319 = arith.maximumf %317, %318 : vector<32x256xf32>
    %320 = arith.truncf %319 : vector<32x256xf32> to vector<32x256xbf16>
    %c0_206 = arith.constant 0 : index
    %c0_207 = arith.constant 0 : index
    %321 = vector.load %arg11[%c0_206, %c0_207] : memref<32x1xf32, #tpu.memory_space<vmem>>, vector<32x1xf32>
    %322 = vector.broadcast %321 : vector<32x1xf32> to vector<32x256xf32>
    %323 = arith.addf %302, %322 : vector<32x256xf32>
    %cst_208 = arith.constant 0.000000e+00 : f32
    %324 = vector.broadcast %cst_208 : f32 to vector<32x256xf32>
    %325 = arith.maximumf %323, %324 : vector<32x256xf32>
    %326 = arith.truncf %325 : vector<32x256xf32> to vector<32x256xbf16>
    %cst_209 = arith.constant 0.000000e+00 : f32
    %327 = vector.broadcast %cst_209 : f32 to vector<4x256xf32>
    %cst_210 = arith.constant 0.000000e+00 : bf16
    %328 = vector.broadcast %cst_210 : bf16 to vector<32x17xbf16>
    %329 = vector.extract_strided_slice %326 {offsets = [0, 0], sizes = [32, 239], strides = [1, 1]} : vector<32x256xbf16> to vector<32x239xbf16>
    %330 = tpu.concatenate %328, %329 in 1 : vector<32x17xbf16>, vector<32x239xbf16> -> vector<32x256xbf16>
    %331 = tpu.iota {dimensions = array<i32: 1>} : vector<1x256xi32>
    %c16_i32_211 = arith.constant 16 : i32
    %c0_i32_212 = arith.constant 0 : i32
    %332 = arith.cmpi eq, %c16_i32_211, %c0_i32_212 : i32
    %c1_i32_213 = arith.constant 1 : i32
    %333 = arith.select %332, %c1_i32_213, %c16_i32_211 : i32
    %334 = vector.broadcast %333 : i32 to vector<1x256xi32>
    %335 = arith.remsi %331, %334 : vector<1x256xi32>
    %c0_i32_214 = arith.constant 0 : i32
    %336 = vector.broadcast %c0_i32_214 : i32 to vector<1x256xi32>
    %337 = arith.cmpi ne, %335, %336 : vector<1x256xi32>
    %c0_i32_215 = arith.constant 0 : i32
    %338 = vector.broadcast %c0_i32_215 : i32 to vector<1x256xi32>
    %339 = arith.cmpi slt, %335, %338 : vector<1x256xi32>
    %c0_i32_216 = arith.constant 0 : i32
    %340 = arith.cmpi slt, %333, %c0_i32_216 : i32
    %341 = vector.broadcast %340 : i1 to vector<1x256xi1>
    %342 = vector.broadcast %341 : vector<1x256xi1> to vector<1x256xi1>
    %343 = arith.xori %339, %342 : vector<1x256xi1>
    %344 = arith.andi %343, %337 : vector<1x256xi1>
    %345 = vector.broadcast %333 : i32 to vector<1x256xi32>
    %346 = arith.addi %335, %345 : vector<1x256xi32>
    %347 = arith.select %344, %346, %335 : vector<1x256xi1>, vector<1x256xi32>
    %c0_i32_217 = arith.constant 0 : i32
    %348 = vector.broadcast %c0_i32_217 : i32 to vector<1x256xi32>
    %349 = arith.cmpi ne, %347, %348 : vector<1x256xi32>
    %350 = arith.extui %349 : vector<1x256xi1> to vector<1x256xi32>
    %351 = arith.sitofp %350 : vector<1x256xi32> to vector<1x256xf32>
    %352 = arith.truncf %351 : vector<1x256xf32> to vector<1x256xbf16>
    %353 = vector.broadcast %352 : vector<1x256xbf16> to vector<32x256xbf16>
    %354 = arith.mulf %330, %353 : vector<32x256xbf16>
    %c0_218 = arith.constant 0 : index
    %c0_219 = arith.constant 0 : index
    %c0_220 = arith.constant 0 : index
    %355 = vector.load %arg12[%c0_218, %c0_219, %c0_220] : memref<16x4x32xbf16, #tpu.memory_space<vmem>>, vector<1x4x32xbf16>
    %356 = vector.shape_cast %355 : vector<1x4x32xbf16> to vector<4x32xbf16>
    %cst_221 = arith.constant dense<0.000000e+00> : vector<4x256xf32>
    %357 = tpu.matmul %356, %354, %cst_221 {dimension_numbers = #tpu.dot_dimension_numbers<[1], [0], [0], [1], [0, 0, 1, 1], [], []>} : vector<4x32xbf16>, vector<32x256xbf16>, vector<4x256xf32> -> vector<4x256xf32>
    %358 = arith.addf %327, %357 : vector<4x256xf32>
    %cst_222 = arith.constant 0.000000e+00 : bf16
    %359 = vector.broadcast %cst_222 : bf16 to vector<32x16xbf16>
    %360 = vector.extract_strided_slice %320 {offsets = [0, 0], sizes = [32, 240], strides = [1, 1]} : vector<32x256xbf16> to vector<32x240xbf16>
    %361 = tpu.concatenate %359, %360 in 1 : vector<32x16xbf16>, vector<32x240xbf16> -> vector<32x256xbf16>
    %c1_223 = arith.constant 1 : index
    %c0_224 = arith.constant 0 : index
    %c0_225 = arith.constant 0 : index
    %362 = vector.load %arg12[%c1_223, %c0_224, %c0_225] : memref<16x4x32xbf16, #tpu.memory_space<vmem>>, vector<1x4x32xbf16>
    %363 = vector.shape_cast %362 : vector<1x4x32xbf16> to vector<4x32xbf16>
    %cst_226 = arith.constant dense<0.000000e+00> : vector<4x256xf32>
    %364 = tpu.matmul %363, %361, %cst_226 {dimension_numbers = #tpu.dot_dimension_numbers<[1], [0], [0], [1], [0, 0, 1, 1], [], []>} : vector<4x32xbf16>, vector<32x256xbf16>, vector<4x256xf32> -> vector<4x256xf32>
    %365 = arith.addf %358, %364 : vector<4x256xf32>
    %cst_227 = arith.constant 0.000000e+00 : bf16
    %366 = vector.broadcast %cst_227 : bf16 to vector<32x16xbf16>
    %367 = vector.extract_strided_slice %326 {offsets = [0, 0], sizes = [32, 240], strides = [1, 1]} : vector<32x256xbf16> to vector<32x240xbf16>
    %368 = tpu.concatenate %366, %367 in 1 : vector<32x16xbf16>, vector<32x240xbf16> -> vector<32x256xbf16>
    %c2_228 = arith.constant 2 : index
    %c0_229 = arith.constant 0 : index
    %c0_230 = arith.constant 0 : index
    %369 = vector.load %arg12[%c2_228, %c0_229, %c0_230] : memref<16x4x32xbf16, #tpu.memory_space<vmem>>, vector<1x4x32xbf16>
    %370 = vector.shape_cast %369 : vector<1x4x32xbf16> to vector<4x32xbf16>
    %cst_231 = arith.constant dense<0.000000e+00> : vector<4x256xf32>
    %371 = tpu.matmul %370, %368, %cst_231 {dimension_numbers = #tpu.dot_dimension_numbers<[1], [0], [0], [1], [0, 0, 1, 1], [], []>} : vector<4x32xbf16>, vector<32x256xbf16>, vector<4x256xf32> -> vector<4x256xf32>
    %372 = arith.addf %365, %371 : vector<4x256xf32>
    %cst_232 = arith.constant 0.000000e+00 : bf16
    %373 = vector.broadcast %cst_232 : bf16 to vector<32x15xbf16>
    %374 = vector.extract_strided_slice %320 {offsets = [0, 0], sizes = [32, 241], strides = [1, 1]} : vector<32x256xbf16> to vector<32x241xbf16>
    %375 = tpu.concatenate %373, %374 in 1 : vector<32x15xbf16>, vector<32x241xbf16> -> vector<32x256xbf16>
    %376 = tpu.iota {dimensions = array<i32: 1>} : vector<1x256xi32>
    %c16_i32_233 = arith.constant 16 : i32
    %c0_i32_234 = arith.constant 0 : i32
    %377 = arith.cmpi eq, %c16_i32_233, %c0_i32_234 : i32
    %c1_i32_235 = arith.constant 1 : i32
    %378 = arith.select %377, %c1_i32_235, %c16_i32_233 : i32
    %379 = vector.broadcast %378 : i32 to vector<1x256xi32>
    %380 = arith.remsi %376, %379 : vector<1x256xi32>
    %c0_i32_236 = arith.constant 0 : i32
    %381 = vector.broadcast %c0_i32_236 : i32 to vector<1x256xi32>
    %382 = arith.cmpi ne, %380, %381 : vector<1x256xi32>
    %c0_i32_237 = arith.constant 0 : i32
    %383 = vector.broadcast %c0_i32_237 : i32 to vector<1x256xi32>
    %384 = arith.cmpi slt, %380, %383 : vector<1x256xi32>
    %c0_i32_238 = arith.constant 0 : i32
    %385 = arith.cmpi slt, %378, %c0_i32_238 : i32
    %386 = vector.broadcast %385 : i1 to vector<1x256xi1>
    %387 = vector.broadcast %386 : vector<1x256xi1> to vector<1x256xi1>
    %388 = arith.xori %384, %387 : vector<1x256xi1>
    %389 = arith.andi %388, %382 : vector<1x256xi1>
    %390 = vector.broadcast %378 : i32 to vector<1x256xi32>
    %391 = arith.addi %380, %390 : vector<1x256xi32>
    %392 = arith.select %389, %391, %380 : vector<1x256xi1>, vector<1x256xi32>
    %c15_i32_239 = arith.constant 15 : i32
    %393 = vector.broadcast %c15_i32_239 : i32 to vector<1x256xi32>
    %394 = arith.cmpi ne, %392, %393 : vector<1x256xi32>
    %395 = arith.extui %394 : vector<1x256xi1> to vector<1x256xi32>
    %396 = arith.sitofp %395 : vector<1x256xi32> to vector<1x256xf32>
    %397 = arith.truncf %396 : vector<1x256xf32> to vector<1x256xbf16>
    %398 = vector.broadcast %397 : vector<1x256xbf16> to vector<32x256xbf16>
    %399 = arith.mulf %375, %398 : vector<32x256xbf16>
    %c3 = arith.constant 3 : index
    %c0_240 = arith.constant 0 : index
    %c0_241 = arith.constant 0 : index
    %400 = vector.load %arg12[%c3, %c0_240, %c0_241] : memref<16x4x32xbf16, #tpu.memory_space<vmem>>, vector<1x4x32xbf16>
    %401 = vector.shape_cast %400 : vector<1x4x32xbf16> to vector<4x32xbf16>
    %cst_242 = arith.constant dense<0.000000e+00> : vector<4x256xf32>
    %402 = tpu.matmul %401, %399, %cst_242 {dimension_numbers = #tpu.dot_dimension_numbers<[1], [0], [0], [1], [0, 0, 1, 1], [], []>} : vector<4x32xbf16>, vector<32x256xbf16>, vector<4x256xf32> -> vector<4x256xf32>
    %403 = arith.addf %372, %402 : vector<4x256xf32>
    %cst_243 = arith.constant 0.000000e+00 : bf16
    %404 = vector.broadcast %cst_243 : bf16 to vector<32x1xbf16>
    %405 = vector.extract_strided_slice %314 {offsets = [0, 0], sizes = [32, 255], strides = [1, 1]} : vector<32x256xbf16> to vector<32x255xbf16>
    %406 = tpu.concatenate %404, %405 in 1 : vector<32x1xbf16>, vector<32x255xbf16> -> vector<32x256xbf16>
    %407 = tpu.iota {dimensions = array<i32: 1>} : vector<1x256xi32>
    %c16_i32_244 = arith.constant 16 : i32
    %c0_i32_245 = arith.constant 0 : i32
    %408 = arith.cmpi eq, %c16_i32_244, %c0_i32_245 : i32
    %c1_i32_246 = arith.constant 1 : i32
    %409 = arith.select %408, %c1_i32_246, %c16_i32_244 : i32
    %410 = vector.broadcast %409 : i32 to vector<1x256xi32>
    %411 = arith.remsi %407, %410 : vector<1x256xi32>
    %c0_i32_247 = arith.constant 0 : i32
    %412 = vector.broadcast %c0_i32_247 : i32 to vector<1x256xi32>
    %413 = arith.cmpi ne, %411, %412 : vector<1x256xi32>
    %c0_i32_248 = arith.constant 0 : i32
    %414 = vector.broadcast %c0_i32_248 : i32 to vector<1x256xi32>
    %415 = arith.cmpi slt, %411, %414 : vector<1x256xi32>
    %c0_i32_249 = arith.constant 0 : i32
    %416 = arith.cmpi slt, %409, %c0_i32_249 : i32
    %417 = vector.broadcast %416 : i1 to vector<1x256xi1>
    %418 = vector.broadcast %417 : vector<1x256xi1> to vector<1x256xi1>
    %419 = arith.xori %415, %418 : vector<1x256xi1>
    %420 = arith.andi %419, %413 : vector<1x256xi1>
    %421 = vector.broadcast %409 : i32 to vector<1x256xi32>
    %422 = arith.addi %411, %421 : vector<1x256xi32>
    %423 = arith.select %420, %422, %411 : vector<1x256xi1>, vector<1x256xi32>
    %c0_i32_250 = arith.constant 0 : i32
    %424 = vector.broadcast %c0_i32_250 : i32 to vector<1x256xi32>
    %425 = arith.cmpi ne, %423, %424 : vector<1x256xi32>
    %426 = arith.extui %425 : vector<1x256xi1> to vector<1x256xi32>
    %427 = arith.sitofp %426 : vector<1x256xi32> to vector<1x256xf32>
    %428 = arith.truncf %427 : vector<1x256xf32> to vector<1x256xbf16>
    %429 = vector.broadcast %428 : vector<1x256xbf16> to vector<32x256xbf16>
    %430 = arith.mulf %406, %429 : vector<32x256xbf16>
    %c4 = arith.constant 4 : index
    %c0_251 = arith.constant 0 : index
    %c0_252 = arith.constant 0 : index
    %431 = vector.load %arg12[%c4, %c0_251, %c0_252] : memref<16x4x32xbf16, #tpu.memory_space<vmem>>, vector<1x4x32xbf16>
    %432 = vector.shape_cast %431 : vector<1x4x32xbf16> to vector<4x32xbf16>
    %cst_253 = arith.constant dense<0.000000e+00> : vector<4x256xf32>
    %433 = tpu.matmul %432, %430, %cst_253 {dimension_numbers = #tpu.dot_dimension_numbers<[1], [0], [0], [1], [0, 0, 1, 1], [], []>} : vector<4x32xbf16>, vector<32x256xbf16>, vector<4x256xf32> -> vector<4x256xf32>
    %434 = arith.addf %403, %433 : vector<4x256xf32>
    %c5 = arith.constant 5 : index
    %c0_254 = arith.constant 0 : index
    %c0_255 = arith.constant 0 : index
    %435 = vector.load %arg12[%c5, %c0_254, %c0_255] : memref<16x4x32xbf16, #tpu.memory_space<vmem>>, vector<1x4x32xbf16>
    %436 = vector.shape_cast %435 : vector<1x4x32xbf16> to vector<4x32xbf16>
    %cst_256 = arith.constant dense<0.000000e+00> : vector<4x256xf32>
    %437 = tpu.matmul %436, %308, %cst_256 {dimension_numbers = #tpu.dot_dimension_numbers<[1], [0], [0], [1], [0, 0, 1, 1], [], []>} : vector<4x32xbf16>, vector<32x256xbf16>, vector<4x256xf32> -> vector<4x256xf32>
    %438 = arith.addf %434, %437 : vector<4x256xf32>
    %c6 = arith.constant 6 : index
    %c0_257 = arith.constant 0 : index
    %c0_258 = arith.constant 0 : index
    %439 = vector.load %arg12[%c6, %c0_257, %c0_258] : memref<16x4x32xbf16, #tpu.memory_space<vmem>>, vector<1x4x32xbf16>
    %440 = vector.shape_cast %439 : vector<1x4x32xbf16> to vector<4x32xbf16>
    %cst_259 = arith.constant dense<0.000000e+00> : vector<4x256xf32>
    %441 = tpu.matmul %440, %314, %cst_259 {dimension_numbers = #tpu.dot_dimension_numbers<[1], [0], [0], [1], [0, 0, 1, 1], [], []>} : vector<4x32xbf16>, vector<32x256xbf16>, vector<4x256xf32> -> vector<4x256xf32>
    %442 = arith.addf %438, %441 : vector<4x256xf32>
    %443 = vector.extract_strided_slice %308 {offsets = [0, 1], sizes = [32, 255], strides = [1, 1]} : vector<32x256xbf16> to vector<32x255xbf16>
    %cst_260 = arith.constant 0.000000e+00 : bf16
    %444 = vector.broadcast %cst_260 : bf16 to vector<32x1xbf16>
    %445 = tpu.concatenate %443, %444 in 1 : vector<32x255xbf16>, vector<32x1xbf16> -> vector<32x256xbf16>
    %446 = tpu.iota {dimensions = array<i32: 1>} : vector<1x256xi32>
    %c16_i32_261 = arith.constant 16 : i32
    %c0_i32_262 = arith.constant 0 : i32
    %447 = arith.cmpi eq, %c16_i32_261, %c0_i32_262 : i32
    %c1_i32_263 = arith.constant 1 : i32
    %448 = arith.select %447, %c1_i32_263, %c16_i32_261 : i32
    %449 = vector.broadcast %448 : i32 to vector<1x256xi32>
    %450 = arith.remsi %446, %449 : vector<1x256xi32>
    %c0_i32_264 = arith.constant 0 : i32
    %451 = vector.broadcast %c0_i32_264 : i32 to vector<1x256xi32>
    %452 = arith.cmpi ne, %450, %451 : vector<1x256xi32>
    %c0_i32_265 = arith.constant 0 : i32
    %453 = vector.broadcast %c0_i32_265 : i32 to vector<1x256xi32>
    %454 = arith.cmpi slt, %450, %453 : vector<1x256xi32>
    %c0_i32_266 = arith.constant 0 : i32
    %455 = arith.cmpi slt, %448, %c0_i32_266 : i32
    %456 = vector.broadcast %455 : i1 to vector<1x256xi1>
    %457 = vector.broadcast %456 : vector<1x256xi1> to vector<1x256xi1>
    %458 = arith.xori %454, %457 : vector<1x256xi1>
    %459 = arith.andi %458, %452 : vector<1x256xi1>
    %460 = vector.broadcast %448 : i32 to vector<1x256xi32>
    %461 = arith.addi %450, %460 : vector<1x256xi32>
    %462 = arith.select %459, %461, %450 : vector<1x256xi1>, vector<1x256xi32>
    %c15_i32_267 = arith.constant 15 : i32
    %463 = vector.broadcast %c15_i32_267 : i32 to vector<1x256xi32>
    %464 = arith.cmpi ne, %462, %463 : vector<1x256xi32>
    %465 = arith.extui %464 : vector<1x256xi1> to vector<1x256xi32>
    %466 = arith.sitofp %465 : vector<1x256xi32> to vector<1x256xf32>
    %467 = arith.truncf %466 : vector<1x256xf32> to vector<1x256xbf16>
    %468 = vector.broadcast %467 : vector<1x256xbf16> to vector<32x256xbf16>
    %469 = arith.mulf %445, %468 : vector<32x256xbf16>
    %c7 = arith.constant 7 : index
    %c0_268 = arith.constant 0 : index
    %c0_269 = arith.constant 0 : index
    %470 = vector.load %arg12[%c7, %c0_268, %c0_269] : memref<16x4x32xbf16, #tpu.memory_space<vmem>>, vector<1x4x32xbf16>
    %471 = vector.shape_cast %470 : vector<1x4x32xbf16> to vector<4x32xbf16>
    %cst_270 = arith.constant dense<0.000000e+00> : vector<4x256xf32>
    %472 = tpu.matmul %471, %469, %cst_270 {dimension_numbers = #tpu.dot_dimension_numbers<[1], [0], [0], [1], [0, 0, 1, 1], [], []>} : vector<4x32xbf16>, vector<32x256xbf16>, vector<4x256xf32> -> vector<4x256xf32>
    %473 = arith.addf %442, %472 : vector<4x256xf32>
    %cst_271 = arith.constant 0.000000e+00 : bf16
    %474 = vector.broadcast %cst_271 : bf16 to vector<32x1xbf16>
    %475 = vector.extract_strided_slice %326 {offsets = [0, 0], sizes = [32, 255], strides = [1, 1]} : vector<32x256xbf16> to vector<32x255xbf16>
    %476 = tpu.concatenate %474, %475 in 1 : vector<32x1xbf16>, vector<32x255xbf16> -> vector<32x256xbf16>
    %477 = tpu.iota {dimensions = array<i32: 1>} : vector<1x256xi32>
    %c16_i32_272 = arith.constant 16 : i32
    %c0_i32_273 = arith.constant 0 : i32
    %478 = arith.cmpi eq, %c16_i32_272, %c0_i32_273 : i32
    %c1_i32_274 = arith.constant 1 : i32
    %479 = arith.select %478, %c1_i32_274, %c16_i32_272 : i32
    %480 = vector.broadcast %479 : i32 to vector<1x256xi32>
    %481 = arith.remsi %477, %480 : vector<1x256xi32>
    %c0_i32_275 = arith.constant 0 : i32
    %482 = vector.broadcast %c0_i32_275 : i32 to vector<1x256xi32>
    %483 = arith.cmpi ne, %481, %482 : vector<1x256xi32>
    %c0_i32_276 = arith.constant 0 : i32
    %484 = vector.broadcast %c0_i32_276 : i32 to vector<1x256xi32>
    %485 = arith.cmpi slt, %481, %484 : vector<1x256xi32>
    %c0_i32_277 = arith.constant 0 : i32
    %486 = arith.cmpi slt, %479, %c0_i32_277 : i32
    %487 = vector.broadcast %486 : i1 to vector<1x256xi1>
    %488 = vector.broadcast %487 : vector<1x256xi1> to vector<1x256xi1>
    %489 = arith.xori %485, %488 : vector<1x256xi1>
    %490 = arith.andi %489, %483 : vector<1x256xi1>
    %491 = vector.broadcast %479 : i32 to vector<1x256xi32>
    %492 = arith.addi %481, %491 : vector<1x256xi32>
    %493 = arith.select %490, %492, %481 : vector<1x256xi1>, vector<1x256xi32>
    %c0_i32_278 = arith.constant 0 : i32
    %494 = vector.broadcast %c0_i32_278 : i32 to vector<1x256xi32>
    %495 = arith.cmpi ne, %493, %494 : vector<1x256xi32>
    %496 = arith.extui %495 : vector<1x256xi1> to vector<1x256xi32>
    %497 = arith.sitofp %496 : vector<1x256xi32> to vector<1x256xf32>
    %498 = arith.truncf %497 : vector<1x256xf32> to vector<1x256xbf16>
    %499 = vector.broadcast %498 : vector<1x256xbf16> to vector<32x256xbf16>
    %500 = arith.mulf %476, %499 : vector<32x256xbf16>
    %c8 = arith.constant 8 : index
    %c0_279 = arith.constant 0 : index
    %c0_280 = arith.constant 0 : index
    %501 = vector.load %arg12[%c8, %c0_279, %c0_280] : memref<16x4x32xbf16, #tpu.memory_space<vmem>>, vector<1x4x32xbf16>
    %502 = vector.shape_cast %501 : vector<1x4x32xbf16> to vector<4x32xbf16>
    %cst_281 = arith.constant dense<0.000000e+00> : vector<4x256xf32>
    %503 = tpu.matmul %502, %500, %cst_281 {dimension_numbers = #tpu.dot_dimension_numbers<[1], [0], [0], [1], [0, 0, 1, 1], [], []>} : vector<4x32xbf16>, vector<32x256xbf16>, vector<4x256xf32> -> vector<4x256xf32>
    %504 = arith.addf %473, %503 : vector<4x256xf32>
    %c9 = arith.constant 9 : index
    %c0_282 = arith.constant 0 : index
    %c0_283 = arith.constant 0 : index
    %505 = vector.load %arg12[%c9, %c0_282, %c0_283] : memref<16x4x32xbf16, #tpu.memory_space<vmem>>, vector<1x4x32xbf16>
    %506 = vector.shape_cast %505 : vector<1x4x32xbf16> to vector<4x32xbf16>
    %cst_284 = arith.constant dense<0.000000e+00> : vector<4x256xf32>
    %507 = tpu.matmul %506, %320, %cst_284 {dimension_numbers = #tpu.dot_dimension_numbers<[1], [0], [0], [1], [0, 0, 1, 1], [], []>} : vector<4x32xbf16>, vector<32x256xbf16>, vector<4x256xf32> -> vector<4x256xf32>
    %508 = arith.addf %504, %507 : vector<4x256xf32>
    %c10 = arith.constant 10 : index
    %c0_285 = arith.constant 0 : index
    %c0_286 = arith.constant 0 : index
    %509 = vector.load %arg12[%c10, %c0_285, %c0_286] : memref<16x4x32xbf16, #tpu.memory_space<vmem>>, vector<1x4x32xbf16>
    %510 = vector.shape_cast %509 : vector<1x4x32xbf16> to vector<4x32xbf16>
    %cst_287 = arith.constant dense<0.000000e+00> : vector<4x256xf32>
    %511 = tpu.matmul %510, %326, %cst_287 {dimension_numbers = #tpu.dot_dimension_numbers<[1], [0], [0], [1], [0, 0, 1, 1], [], []>} : vector<4x32xbf16>, vector<32x256xbf16>, vector<4x256xf32> -> vector<4x256xf32>
    %512 = arith.addf %508, %511 : vector<4x256xf32>
    %513 = vector.extract_strided_slice %320 {offsets = [0, 1], sizes = [32, 255], strides = [1, 1]} : vector<32x256xbf16> to vector<32x255xbf16>
    %cst_288 = arith.constant 0.000000e+00 : bf16
    %514 = vector.broadcast %cst_288 : bf16 to vector<32x1xbf16>
    %515 = tpu.concatenate %513, %514 in 1 : vector<32x255xbf16>, vector<32x1xbf16> -> vector<32x256xbf16>
    %516 = tpu.iota {dimensions = array<i32: 1>} : vector<1x256xi32>
    %c16_i32_289 = arith.constant 16 : i32
    %c0_i32_290 = arith.constant 0 : i32
    %517 = arith.cmpi eq, %c16_i32_289, %c0_i32_290 : i32
    %c1_i32_291 = arith.constant 1 : i32
    %518 = arith.select %517, %c1_i32_291, %c16_i32_289 : i32
    %519 = vector.broadcast %518 : i32 to vector<1x256xi32>
    %520 = arith.remsi %516, %519 : vector<1x256xi32>
    %c0_i32_292 = arith.constant 0 : i32
    %521 = vector.broadcast %c0_i32_292 : i32 to vector<1x256xi32>
    %522 = arith.cmpi ne, %520, %521 : vector<1x256xi32>
    %c0_i32_293 = arith.constant 0 : i32
    %523 = vector.broadcast %c0_i32_293 : i32 to vector<1x256xi32>
    %524 = arith.cmpi slt, %520, %523 : vector<1x256xi32>
    %c0_i32_294 = arith.constant 0 : i32
    %525 = arith.cmpi slt, %518, %c0_i32_294 : i32
    %526 = vector.broadcast %525 : i1 to vector<1x256xi1>
    %527 = vector.broadcast %526 : vector<1x256xi1> to vector<1x256xi1>
    %528 = arith.xori %524, %527 : vector<1x256xi1>
    %529 = arith.andi %528, %522 : vector<1x256xi1>
    %530 = vector.broadcast %518 : i32 to vector<1x256xi32>
    %531 = arith.addi %520, %530 : vector<1x256xi32>
    %532 = arith.select %529, %531, %520 : vector<1x256xi1>, vector<1x256xi32>
    %c15_i32_295 = arith.constant 15 : i32
    %533 = vector.broadcast %c15_i32_295 : i32 to vector<1x256xi32>
    %534 = arith.cmpi ne, %532, %533 : vector<1x256xi32>
    %535 = arith.extui %534 : vector<1x256xi1> to vector<1x256xi32>
    %536 = arith.sitofp %535 : vector<1x256xi32> to vector<1x256xf32>
    %537 = arith.truncf %536 : vector<1x256xf32> to vector<1x256xbf16>
    %538 = vector.broadcast %537 : vector<1x256xbf16> to vector<32x256xbf16>
    %539 = arith.mulf %515, %538 : vector<32x256xbf16>
    %c11 = arith.constant 11 : index
    %c0_296 = arith.constant 0 : index
    %c0_297 = arith.constant 0 : index
    %540 = vector.load %arg12[%c11, %c0_296, %c0_297] : memref<16x4x32xbf16, #tpu.memory_space<vmem>>, vector<1x4x32xbf16>
    %541 = vector.shape_cast %540 : vector<1x4x32xbf16> to vector<4x32xbf16>
    %cst_298 = arith.constant dense<0.000000e+00> : vector<4x256xf32>
    %542 = tpu.matmul %541, %539, %cst_298 {dimension_numbers = #tpu.dot_dimension_numbers<[1], [0], [0], [1], [0, 0, 1, 1], [], []>} : vector<4x32xbf16>, vector<32x256xbf16>, vector<4x256xf32> -> vector<4x256xf32>
    %543 = arith.addf %512, %542 : vector<4x256xf32>
    %544 = vector.extract_strided_slice %314 {offsets = [0, 15], sizes = [32, 241], strides = [1, 1]} : vector<32x256xbf16> to vector<32x241xbf16>
    %cst_299 = arith.constant 0.000000e+00 : bf16
    %545 = vector.broadcast %cst_299 : bf16 to vector<32x15xbf16>
    %546 = tpu.concatenate %544, %545 in 1 : vector<32x241xbf16>, vector<32x15xbf16> -> vector<32x256xbf16>
    %547 = tpu.iota {dimensions = array<i32: 1>} : vector<1x256xi32>
    %c16_i32_300 = arith.constant 16 : i32
    %c0_i32_301 = arith.constant 0 : i32
    %548 = arith.cmpi eq, %c16_i32_300, %c0_i32_301 : i32
    %c1_i32_302 = arith.constant 1 : i32
    %549 = arith.select %548, %c1_i32_302, %c16_i32_300 : i32
    %550 = vector.broadcast %549 : i32 to vector<1x256xi32>
    %551 = arith.remsi %547, %550 : vector<1x256xi32>
    %c0_i32_303 = arith.constant 0 : i32
    %552 = vector.broadcast %c0_i32_303 : i32 to vector<1x256xi32>
    %553 = arith.cmpi ne, %551, %552 : vector<1x256xi32>
    %c0_i32_304 = arith.constant 0 : i32
    %554 = vector.broadcast %c0_i32_304 : i32 to vector<1x256xi32>
    %555 = arith.cmpi slt, %551, %554 : vector<1x256xi32>
    %c0_i32_305 = arith.constant 0 : i32
    %556 = arith.cmpi slt, %549, %c0_i32_305 : i32
    %557 = vector.broadcast %556 : i1 to vector<1x256xi1>
    %558 = vector.broadcast %557 : vector<1x256xi1> to vector<1x256xi1>
    %559 = arith.xori %555, %558 : vector<1x256xi1>
    %560 = arith.andi %559, %553 : vector<1x256xi1>
    %561 = vector.broadcast %549 : i32 to vector<1x256xi32>
    %562 = arith.addi %551, %561 : vector<1x256xi32>
    %563 = arith.select %560, %562, %551 : vector<1x256xi1>, vector<1x256xi32>
    %c0_i32_306 = arith.constant 0 : i32
    %564 = vector.broadcast %c0_i32_306 : i32 to vector<1x256xi32>
    %565 = arith.cmpi ne, %563, %564 : vector<1x256xi32>
    %566 = arith.extui %565 : vector<1x256xi1> to vector<1x256xi32>
    %567 = arith.sitofp %566 : vector<1x256xi32> to vector<1x256xf32>
    %568 = arith.truncf %567 : vector<1x256xf32> to vector<1x256xbf16>
    %569 = vector.broadcast %568 : vector<1x256xbf16> to vector<32x256xbf16>
    %570 = arith.mulf %546, %569 : vector<32x256xbf16>
    %c12 = arith.constant 12 : index
    %c0_307 = arith.constant 0 : index
    %c0_308 = arith.constant 0 : index
    %571 = vector.load %arg12[%c12, %c0_307, %c0_308] : memref<16x4x32xbf16, #tpu.memory_space<vmem>>, vector<1x4x32xbf16>
    %572 = vector.shape_cast %571 : vector<1x4x32xbf16> to vector<4x32xbf16>
    %cst_309 = arith.constant dense<0.000000e+00> : vector<4x256xf32>
    %573 = tpu.matmul %572, %570, %cst_309 {dimension_numbers = #tpu.dot_dimension_numbers<[1], [0], [0], [1], [0, 0, 1, 1], [], []>} : vector<4x32xbf16>, vector<32x256xbf16>, vector<4x256xf32> -> vector<4x256xf32>
    %574 = arith.addf %543, %573 : vector<4x256xf32>
    %575 = vector.extract_strided_slice %308 {offsets = [0, 16], sizes = [32, 240], strides = [1, 1]} : vector<32x256xbf16> to vector<32x240xbf16>
    %cst_310 = arith.constant 0.000000e+00 : bf16
    %576 = vector.broadcast %cst_310 : bf16 to vector<32x16xbf16>
    %577 = tpu.concatenate %575, %576 in 1 : vector<32x240xbf16>, vector<32x16xbf16> -> vector<32x256xbf16>
    %c13 = arith.constant 13 : index
    %c0_311 = arith.constant 0 : index
    %c0_312 = arith.constant 0 : index
    %578 = vector.load %arg12[%c13, %c0_311, %c0_312] : memref<16x4x32xbf16, #tpu.memory_space<vmem>>, vector<1x4x32xbf16>
    %579 = vector.shape_cast %578 : vector<1x4x32xbf16> to vector<4x32xbf16>
    %cst_313 = arith.constant dense<0.000000e+00> : vector<4x256xf32>
    %580 = tpu.matmul %579, %577, %cst_313 {dimension_numbers = #tpu.dot_dimension_numbers<[1], [0], [0], [1], [0, 0, 1, 1], [], []>} : vector<4x32xbf16>, vector<32x256xbf16>, vector<4x256xf32> -> vector<4x256xf32>
    %581 = arith.addf %574, %580 : vector<4x256xf32>
    %582 = vector.extract_strided_slice %314 {offsets = [0, 16], sizes = [32, 240], strides = [1, 1]} : vector<32x256xbf16> to vector<32x240xbf16>
    %cst_314 = arith.constant 0.000000e+00 : bf16
    %583 = vector.broadcast %cst_314 : bf16 to vector<32x16xbf16>
    %584 = tpu.concatenate %582, %583 in 1 : vector<32x240xbf16>, vector<32x16xbf16> -> vector<32x256xbf16>
    %c14 = arith.constant 14 : index
    %c0_315 = arith.constant 0 : index
    %c0_316 = arith.constant 0 : index
    %585 = vector.load %arg12[%c14, %c0_315, %c0_316] : memref<16x4x32xbf16, #tpu.memory_space<vmem>>, vector<1x4x32xbf16>
    %586 = vector.shape_cast %585 : vector<1x4x32xbf16> to vector<4x32xbf16>
    %cst_317 = arith.constant dense<0.000000e+00> : vector<4x256xf32>
    %587 = tpu.matmul %586, %584, %cst_317 {dimension_numbers = #tpu.dot_dimension_numbers<[1], [0], [0], [1], [0, 0, 1, 1], [], []>} : vector<4x32xbf16>, vector<32x256xbf16>, vector<4x256xf32> -> vector<4x256xf32>
    %588 = arith.addf %581, %587 : vector<4x256xf32>
    %589 = vector.extract_strided_slice %308 {offsets = [0, 17], sizes = [32, 239], strides = [1, 1]} : vector<32x256xbf16> to vector<32x239xbf16>
    %cst_318 = arith.constant 0.000000e+00 : bf16
    %590 = vector.broadcast %cst_318 : bf16 to vector<32x17xbf16>
    %591 = tpu.concatenate %589, %590 in 1 : vector<32x239xbf16>, vector<32x17xbf16> -> vector<32x256xbf16>
    %592 = tpu.iota {dimensions = array<i32: 1>} : vector<1x256xi32>
    %c16_i32_319 = arith.constant 16 : i32
    %c0_i32_320 = arith.constant 0 : i32
    %593 = arith.cmpi eq, %c16_i32_319, %c0_i32_320 : i32
    %c1_i32_321 = arith.constant 1 : i32
    %594 = arith.select %593, %c1_i32_321, %c16_i32_319 : i32
    %595 = vector.broadcast %594 : i32 to vector<1x256xi32>
    %596 = arith.remsi %592, %595 : vector<1x256xi32>
    %c0_i32_322 = arith.constant 0 : i32
    %597 = vector.broadcast %c0_i32_322 : i32 to vector<1x256xi32>
    %598 = arith.cmpi ne, %596, %597 : vector<1x256xi32>
    %c0_i32_323 = arith.constant 0 : i32
    %599 = vector.broadcast %c0_i32_323 : i32 to vector<1x256xi32>
    %600 = arith.cmpi slt, %596, %599 : vector<1x256xi32>
    %c0_i32_324 = arith.constant 0 : i32
    %601 = arith.cmpi slt, %594, %c0_i32_324 : i32
    %602 = vector.broadcast %601 : i1 to vector<1x256xi1>
    %603 = vector.broadcast %602 : vector<1x256xi1> to vector<1x256xi1>
    %604 = arith.xori %600, %603 : vector<1x256xi1>
    %605 = arith.andi %604, %598 : vector<1x256xi1>
    %606 = vector.broadcast %594 : i32 to vector<1x256xi32>
    %607 = arith.addi %596, %606 : vector<1x256xi32>
    %608 = arith.select %605, %607, %596 : vector<1x256xi1>, vector<1x256xi32>
    %c15_i32_325 = arith.constant 15 : i32
    %609 = vector.broadcast %c15_i32_325 : i32 to vector<1x256xi32>
    %610 = arith.cmpi ne, %608, %609 : vector<1x256xi32>
    %611 = arith.extui %610 : vector<1x256xi1> to vector<1x256xi32>
    %612 = arith.sitofp %611 : vector<1x256xi32> to vector<1x256xf32>
    %613 = arith.truncf %612 : vector<1x256xf32> to vector<1x256xbf16>
    %614 = vector.broadcast %613 : vector<1x256xbf16> to vector<32x256xbf16>
    %615 = arith.mulf %591, %614 : vector<32x256xbf16>
    %c15 = arith.constant 15 : index
    %c0_326 = arith.constant 0 : index
    %c0_327 = arith.constant 0 : index
    %616 = vector.load %arg12[%c15, %c0_326, %c0_327] : memref<16x4x32xbf16, #tpu.memory_space<vmem>>, vector<1x4x32xbf16>
    %617 = vector.shape_cast %616 : vector<1x4x32xbf16> to vector<4x32xbf16>
    %cst_328 = arith.constant dense<0.000000e+00> : vector<4x256xf32>
    %618 = tpu.matmul %617, %615, %cst_328 {dimension_numbers = #tpu.dot_dimension_numbers<[1], [0], [0], [1], [0, 0, 1, 1], [], []>} : vector<4x32xbf16>, vector<32x256xbf16>, vector<4x256xf32> -> vector<4x256xf32>
    %619 = arith.addf %588, %618 : vector<4x256xf32>
    %c0_329 = arith.constant 0 : index
    %c0_330 = arith.constant 0 : index
    %620 = vector.load %arg13[%c0_329, %c0_330] : memref<1x1xf32, #tpu.memory_space<vmem>>, vector<1x1xf32>
    %621 = vector.broadcast %620 : vector<1x1xf32> to vector<4x256xf32>
    %622 = arith.addf %619, %621 : vector<4x256xf32>
    %cst_331 = arith.constant 0.000000e+00 : f32
    %623 = vector.broadcast %cst_331 : f32 to vector<4x256xf32>
    %624 = arith.subf %623, %622 : vector<4x256xf32>
    %625 = math.exp %624 : vector<4x256xf32>
    %cst_332 = arith.constant 1.000000e+00 : f32
    %626 = vector.broadcast %cst_332 : f32 to vector<4x256xf32>
    %627 = arith.addf %626, %625 : vector<4x256xf32>
    %cst_333 = arith.constant 1.000000e+00 : f32
    %628 = vector.broadcast %cst_333 : f32 to vector<4x256xf32>
    %629 = arith.divf %628, %627 : vector<4x256xf32>
    %c0_334 = arith.constant 0 : index
    %c0_335 = arith.constant 0 : index
    %c0_336 = arith.constant 0 : index
    %630 = vector.load %arg14[%c0_334, %c0_335, %c0_336] : memref<1x4x256xf32, #tpu.memory_space<vmem>>, vector<1x4x256xf32>
    %631 = vector.shape_cast %630 : vector<1x4x256xf32> to vector<4x256xf32>
    %632 = vector.shape_cast %629 : vector<4x256xf32> to vector<1x4x256xf32>
    tpu.vector_store %arg14[%c0_334, %c0_335, %c0_336], %632 {strides = array<i32>} : memref<1x4x256xf32, #tpu.memory_space<vmem>>, vector<1x4x256xf32>,
    return
  }
  func.func @transform_0(%arg0: i32) -> (i32, i32, i32) {
    %c0_i32 = arith.constant 0 : i32
    %c0_i32_0 = arith.constant 0 : i32
    %c0_i32_1 = arith.constant 0 : i32
    return %arg0, %c0_i32, %c0_i32_0 : i32, i32, i32
  }
  func.func @transform_1(%arg0: i32) -> (i32, i32, i32) {
    %c0_i32 = arith.constant 0 : i32
    %c0_i32_0 = arith.constant 0 : i32
    %c0_i32_1 = arith.constant 0 : i32
    %c0_i32_2 = arith.constant 0 : i32
    return %c0_i32, %c0_i32_0, %c0_i32_1 : i32, i32, i32
  }
  func.func @transform_2(%arg0: i32) -> (i32, i32) {
    %c0_i32 = arith.constant 0 : i32
    %c0_i32_0 = arith.constant 0 : i32
    %c0_i32_1 = arith.constant 0 : i32
    return %c0_i32, %c0_i32_0 : i32, i32
  }
  func.func @transform_3(%arg0: i32) -> (i32, i32, i32, i32) {
    %c0_i32 = arith.constant 0 : i32
    %c0_i32_0 = arith.constant 0 : i32
    %c0_i32_1 = arith.constant 0 : i32
    %c0_i32_2 = arith.constant 0 : i32
    %c0_i32_3 = arith.constant 0 : i32
    return %c0_i32, %c0_i32_0, %c0_i32_1, %c0_i32_2 : i32, i32, i32, i32
  }
  func.func @transform_4(%arg0: i32) -> (i32, i32) {
    %c0_i32 = arith.constant 0 : i32
    %c0_i32_0 = arith.constant 0 : i32
    %c0_i32_1 = arith.constant 0 : i32
    return %c0_i32, %c0_i32_0 : i32, i32
  }
  func.func @transform_5(%arg0: i32) -> (i32, i32) {
    %c0_i32 = arith.constant 0 : i32
    %c0_i32_0 = arith.constant 0 : i32
    %c0_i32_1 = arith.constant 0 : i32
    return %c0_i32, %c0_i32_0 : i32, i32
  }
  func.func @transform_6(%arg0: i32) -> (i32, i32, i32, i32) {
    %c0_i32 = arith.constant 0 : i32
    %c0_i32_0 = arith.constant 0 : i32
    %c0_i32_1 = arith.constant 0 : i32
    %c0_i32_2 = arith.constant 0 : i32
    %c0_i32_3 = arith.constant 0 : i32
    return %c0_i32, %c0_i32_0, %c0_i32_1, %c0_i32_2 : i32, i32, i32, i32
  }
  func.func @transform_7(%arg0: i32) -> (i32, i32) {
    %c0_i32 = arith.constant 0 : i32
    %c0_i32_0 = arith.constant 0 : i32
    %c0_i32_1 = arith.constant 0 : i32
    return %c0_i32, %c0_i32_0 : i32, i32
  }
  func.func @transform_8(%arg0: i32) -> (i32, i32) {
    %c0_i32 = arith.constant 0 : i32
    %c0_i32_0 = arith.constant 0 : i32
    %c0_i32_1 = arith.constant 0 : i32
    return %c0_i32, %c0_i32_0 : i32, i32
  }
  func.func @transform_9(%arg0: i32) -> (i32, i32, i32, i32) {
    %c0_i32 = arith.constant 0 : i32
    %c0_i32_0 = arith.constant 0 : i32
    %c0_i32_1 = arith.constant 0 : i32
    %c0_i32_2 = arith.constant 0 : i32
    %c0_i32_3 = arith.constant 0 : i32
    return %c0_i32, %c0_i32_0, %c0_i32_1, %c0_i32_2 : i32, i32, i32, i32
  }
  func.func @transform_10(%arg0: i32) -> (i32, i32) {
    %c0_i32 = arith.constant 0 : i32
    %c0_i32_0 = arith.constant 0 : i32
    %c0_i32_1 = arith.constant 0 : i32
    return %c0_i32, %c0_i32_0 : i32, i32
  }
  func.func @transform_11(%arg0: i32) -> (i32, i32, i32) {
    %c0_i32 = arith.constant 0 : i32
    %c0_i32_0 = arith.constant 0 : i32
    %c0_i32_1 = arith.constant 0 : i32
    %c0_i32_2 = arith.constant 0 : i32
    return %c0_i32, %c0_i32_0, %c0_i32_1 : i32, i32, i32
  }
  func.func @transform_12(%arg0: i32) -> (i32, i32) {
    %c0_i32 = arith.constant 0 : i32
    %c0_i32_0 = arith.constant 0 : i32
    %c0_i32_1 = arith.constant 0 : i32
    return %c0_i32, %c0_i32_0 : i32, i32
  }
  func.func @transform_13(%arg0: i32) -> (i32, i32, i32) {
    %c0_i32 = arith.constant 0 : i32
    %c0_i32_0 = arith.constant 0 : i32
    %c0_i32_1 = arith.constant 0 : i32
    return %arg0, %c0_i32, %c0_i32_0 : i32, i32, i32
  }
}

</mosaic_0001>

<bundles_post_ra>
// kernel: decoder_forward.1
= control target key start
LH: loop header
LB: loop body
LE: loop exit
PB: predicated region body
PF: predicated region fallthrough
CT: control target
= control target key end

     0   :  { %s10432_s0 = inlined_call_operand.vmem [shape: f32[2,1,2], index: 0, kind: input, shape index: {}]   ;;  %s10433_s1 = inlined_call_operand.vmem [shape: f32[2,128,16], index: 1, kind: input, shape index: {}]   ;;  %s10434_s2 = inlined_call_operand.vmem [shape: f32[128,16], index: 2, kind: input, shape index: {}]   ;;  %s10435_s3 = inlined_call_operand.vmem [shape: bf16[3,3,128,128], index: 3, kind: input, shape index: {}]   ;;  %s10436_s4 = inlined_call_operand.vmem [shape: f32[128,1], index: 4, kind: input, shape index: {}]   ;;  %s10437_s5 = inlined_call_operand.vmem [shape: bf16[64,64], index: 5, kind: input, shape index: {}]   ;;  %s10438_s6 = inlined_call_operand.hbm [shape: bf16[3,3,64,128], index: 6, kind: input, shape index: {}]   ;;  %s10439_s7 = inlined_call_operand.vmem [shape: f32[64,1], index: 7, kind: input, shape index: {}]   ;;  %s10440_s8 = inlined_call_operand.hbm [shape: bf16[256,256], index: 8, kind: input, shape index: {}]   ;;  %s10441_s9 = inlined_call_operand.hbm [shape: bf16[3,3,32,64], index: 9, kind: input, shape index: {}]   ;;  %s10442_s10 = inlined_call_operand.vmem [shape: f32[32,1], index: 10, kind: input, shape index: {}]   ;;  %s10443_s11 = inlined_call_operand.vmem [shape: bf16[16,4,32], index: 11, kind: input, shape index: {}]   ;;  %s10444_s12 = inlined_call_operand.<no memory space> [shape: f32[1,1], index: 12, kind: input, shape index: {}]   ;;  %s10445_s13 = inlined_call_operand.vmem [shape: f32[2,4,256], index: 13, kind: output, shape index: {}]  }
   0x1   :  { %v18_v0 = vstv %s10444_s12 }
   0x2   :  { %19 = vst [vmem:[#allocation2] sm:$0x1] %v18_v0 }
   0x3   :  { %20 = vsyncpa [#allocation4], 0 }
   0x4   :  { %21 = vsyncpa [#allocation6], 0  ;;  %s8385_s27 = smov 0  }
   0x5 LB: > { %10449 = sst [smem:[#allocation10_spill]] %s8285_s27  ;;  %s8287_s28 = smov [#allocation5]   ;;  %s8285_s27 = sphi %s8385_s27, %s27_s27  }
   0x6   : > { %s379_s29 = sshll.u32 %s8287_s28, 4  ;;  %s8391_s30 = sadd.s32 4294967295, %s8285_s27   ;;  %s8400_s29 = int_to_ptr.vmem [resolvable:$true] %s379_s29 }
   0x7   : > { %p6387_p0 = scmp.ge.s32.totalorder %s8285_s27, 1  ;;  %p336_p1 = scmp.lt.s32.totalorder %s8285_s27, 3 }
   0x8   : > { %p10447_p2 = scmp.eq.s32.totalorder %s8391_s30, 0  ;;  %s8288_s14 = smov [#allocation3]  }
   0x9   : > { %p8396_p3 = pnand %p6387_p0, %p336_p1  ;;  %s363_s15 = sshll.u32 %s8288_s14, 4  ;;  %s8404_s15 = int_to_ptr.vmem [resolvable:$true] %s363_s15 }
   0xa   : > { %s8289_s17 = smov [#allocation7]   ;;  %s8187_s21 = scalar_lea.hbm %s10440_s8, 4096 }
   0xb   : > { %s10450_s12 = scalar_select %p8396_p3, 1, 0 }
   0xc   : > { %p7788_p4 = pneg %p8396_p3  ;;  %s8412_s18 = sshll.u32 %s8289_s17, 4  ;;  %s393_s18 = int_to_ptr.vmem [resolvable:$true] %s8412_s18 }
   0xd   : > { %p8188_p6 = scmp.ne.s32.totalorder %s10440_s8, %s8187_s21  ;;  %p8194_p10 = scmp.lt.u32.totalorder %s8187_s21, %s10440_s8 }
   0xe   : > { %p8408_p5 = pnand %p10447_p2, %p7788_p4 }
  0x10   : > { %p8422_p7 = pneg %p8408_p5 }
  0x12   : > { %p8190_p8 = pnand %p8422_p7, %p8188_p6 }
  0x14   : > { %p8191_p9 = pneg %p8190_p8 }
  0x16   : > { %p8196_p11 = pnand %p8194_p10, %p8191_p9 }
  0x18   : > { %8199 = shalt.err (!%p8196_p11)
}
  0x19   : > { %s8200_s28 = scalar_lea.vmem %s8400_s29, 4096  ;;  %p8208_p1 = scmp.lt.s32.totalorder %s8400_s29, %s8400_s29 }
  0x1a   : > { %p8201_p12 = scmp.ne.s32.totalorder %s8400_s29, %s8200_s28  ;;  %p8209_p4 = scmp.lt.s32.totalorder %s8200_s28, %s8200_s28 }
  0x1c   : > { %p8203_p13 = pnand %p8201_p12, %p8422_p7  ;;  %p8210_p6 = por %p8209_p4, %p8208_p1 }
  0x1e   : > { %p8204_p0 = pneg %p8203_p13 }
  0x20   : > { %p8211_p8 = pnand %p8210_p6, %p8204_p0 }
  0x22   : > { %8214 = shalt.err (!%p8211_p8)
}
  0x23   : > { %s8290_s14 = smov 128   ;;  %s8291_s17 = smov 8  }
  0x24   : > { %7794 = dma.hbm_to_vmem [thread:$0]  (!%p8408_p5), %s10440_s8, 4096, %s8400_s29, [#allocation6], %s8290_s14, %s8290_s14, %s8291_s17  }
  0x25   : > { %s8215_s23 = scalar_lea.hbm %s10438_s6, 4608 }
  0x26   : > { %p8216_p9 = scmp.ne.s32.totalorder %s10438_s6, %s8215_s23  ;;  %p8222_p12 = scmp.lt.u32.totalorder %s8215_s23, %s10438_s6 }
  0x28   : > { %p8218_p10 = pnand %p8216_p9, %p8422_p7 }
  0x2a   : > { %p8219_p11 = pneg %p8218_p10 }
  0x2c   : > { %p8224_p13 = pnand %p8222_p12, %p8219_p11 }
  0x2e   : > { %8227 = shalt.err (!%p8224_p13)
}
  0x2f   : > { %s8228_s29 = scalar_lea.vmem %s8404_s15, 4608  ;;  %p8236_p6 = scmp.lt.s32.totalorder %s8404_s15, %s8404_s15 }
  0x30   : > { %p8229_p0 = scmp.ne.s32.totalorder %s8404_s15, %s8228_s29  ;;  %p8237_p8 = scmp.lt.s32.totalorder %s8228_s29, %s8228_s29 }
  0x32   : > { %p8231_p1 = pnand %p8229_p0, %p8422_p7  ;;  %p8238_p9 = por %p8237_p8, %p8236_p6 }
  0x34   : > { %p8232_p4 = pneg %p8231_p1 }
  0x36   : > { %p8239_p10 = pnand %p8238_p9, %p8232_p4 }
  0x38   : > { %8242 = shalt.err (!%p8239_p10)
}
  0x39   : > { %s8292_s14 = smov 64   ;;  %s8293_s27 = smov 4  }
  0x3a   : > { %7791 = dma.hbm_to_vmem [thread:$0]  (!%p8408_p5), %s10438_s6, 4608, %s8404_s15, [#allocation4], %s8292_s14, %s8292_s14, %s8293_s27  }
  0x3b   : > { %s8243_s22 = scalar_lea.hbm %s10441_s9, 2304 }
  0x3c   : > { %p8244_p11 = scmp.ne.s32.totalorder %s10441_s9, %s8243_s22  ;;  %p8250_p0 = scmp.lt.u32.totalorder %s8243_s22, %s10441_s9 }
  0x3e   : > { %p8246_p12 = pnand %p8244_p11, %p8422_p7 }
  0x40   : > { %p8247_p13 = pneg %p8246_p12 }
  0x42   : > { %p8252_p1 = pnand %p8250_p0, %p8247_p13 }
  0x44   : > { %8255 = shalt.err (!%p8252_p1)
}
  0x45   : > { %s8256_s29 = scalar_lea.vmem %s393_s18, 2304  ;;  %p8264_p9 = scmp.lt.s32.totalorder %s393_s18, %s393_s18 }
  0x46   : > { %p8257_p4 = scmp.ne.s32.totalorder %s393_s18, %s8256_s29  ;;  %p8265_p10 = scmp.lt.s32.totalorder %s8256_s29, %s8256_s29 }
  0x48   : > { %p8259_p6 = pnand %p8257_p4, %p8422_p7  ;;  %p8266_p2 = por %p8265_p10, %p8264_p9 }
  0x4a   : > { %p8260_p8 = pneg %p8259_p6 }
  0x4c   : > { %p8267_p3 = pnand %p8266_p2, %p8260_p8 }
  0x4e   : > { %8270 = shalt.err (!%p8267_p3)
}
  0x4f   : > { %7797 = dma.hbm_to_vmem [thread:$0]  (!%p8408_p5), %s10441_s9, 2304, %s393_s18, [#allocation6], %s8292_s14, %s8292_s14, %s8293_s27  }
  0x50   : > { %p10453_p11 = scmp.ne.s32.totalorder %s10450_s12, 0 }
  0x51   : > { %p10454_p12 = scmp.eq.s32.totalorder (!%p10453_p11), %s8391_s30, 0 }
  0x52   : > { %423 = sbr.rel (%p10453_p11) target bundleno = 2870 (0xb36), region = 72 }
  0x59   : > { %8276 = dma.done.wait (%p10454_p12), [#allocation4], 4608   ;;  %p10455_p7 = pmov %p10454_p12 }
  0x5b   : > { %8278 = vsyncadd (%p10455_p7), [#allocation4], 4294962688  ;;  %p10456_p13 = pmov %p10455_p7 }
  0x5c   : > { %p10457_p2 = pmov %p10455_p7 }
  0x5d   : > { %8280 = dma.done.wait (%p10456_p13), [#allocation6], 6400  }
  0x5e   : > { %8282 = vsyncadd (%p10457_p2), [#allocation6], 4294960896  ;;  %p473_p3 = scmp.lt.s32.totalorder %s8391_s30, 1  ;;  %v8294_v1 = vmov 0   ;;  %v8295_v3 = vmov 1   ;;  %v489_v4 = vld [vmem:[%s10433_s1 + $0x30] sm:$0xff] }
  0x5f   : > { %7837 = vset.pattern.permute.xlu0 %v8294_v1  ;;  %7959 = vset.pattern.permute.xlu1 %v8294_v1  ;;  %v490_v5 = vld [vmem:[%s10433_s1 + $0x38] sm:$0xff]  ;;  %v483_v6 = vld [vmem:[%s10433_s1] sm:$0xff]  ;;  %v484_v7 = vld [vmem:[%s10433_s1 + $0x8] sm:$0xff]  ;;  %s8296_s12 = smov 127   ;;  %s8297_s16 = smov 124   ;;  %vm837_vm1 = vcmask 121856  }
  0x60   : > { %s10462_s30 = smov (!%p473_p3, %s8391_s30), 1  ;;  %v485_v8 = vld [vmem:[%s10433_s1 + $0x10] sm:$0xff]  ;;  %v486_v9 = vld [vmem:[%s10433_s1 + $0x18] sm:$0xff]  ;;  %v487_v13 = vld [vmem:[%s10433_s1 + $0x20] sm:$0xff]  ;;  %s8298_s14 = smov 123   ;;  %vm1229_vm2 = vcmask 97280  }
  0x61   : > { %s475_s18 = scalar_lea.vmem %s10432_s0, %s10462_s30  ;;  %v493_v10 = vld [vmem:[%s10433_s1 + $0x50] sm:$0xff]  ;;  %v494_v12 = vld [vmem:[%s10433_s1 + $0x58] sm:$0xff]  ;;  %v488_v14 = vld [vmem:[%s10433_s1 + $0x28] sm:$0xff]  ;;  %vm2078_vm3 = vcmask 89088   ;;  %s8302_s25 = smov 48   ;;  %vm2464_vm4 = vcmask 130048  }
  0x62   : > { %v6398_v2 = vld [vmem:[%s475_s18] ss:$0 sm:$0xff]  ;;  %v6405_v15 = vld [vmem:[%s10433_s1 + $0xb0] sm:$0xff]  ;;  %v6406_v16 = vld [vmem:[%s10433_s1 + $0xb8] sm:$0xff]  ;;  %s8301_s18 = smov 16   ;;  %vm2481_vm5 = vcmask 261120  }
  0x63   : > { %505 = vperm.xlu0 %7837, %v6398_v2   ;;  %v497_v17 = vld [vmem:[%s10433_s1 + $0x70] sm:$0xff]  ;;  %v498_v20 = vld [vmem:[%s10433_s1 + $0x78] sm:$0xff]  ;;  %v491_v21 = vld [vmem:[%s10433_s1 + $0x40] sm:$0xff]  ;;  %vm2498_vm6 = vcmask 392192   ;;  %vm2651_vm7 = vcmask 523264   ;;  %s8303_s29 = smov 120  }
  0x64   : > { %v492_v22 = vld [vmem:[%s10433_s1 + $0x48] sm:$0xff]  ;;  %v6399_v25 = vld [vmem:[%s10433_s1 + $0x80] sm:$0xff]  ;;  %v6401_v29 = vld [vmem:[%s10433_s1 + $0x90] sm:$0xff]  ;;  %s8304_s15 = smov 119   ;;  %vm2937_vm9 = vcmask 515072   ;;  %vm3198_vm10 = vcmask 457728  }
  0x65   : > { %v6400_v26 = vld [vmem:[%s10433_s1 + $0x88] sm:$0xff]  ;;  %v6402_v30 = vld [vmem:[%s10433_s1 + $0x98] sm:$0xff]  ;;  %v6409_v33 = vld [vmem:[%s10433_s1 + $0xd0] sm:$0xff]  ;;  %vm3727_vm11 = vcmask 449536   ;;  %s8305_s17 = smov 64   ;;  %s8307_s27 = smov 111  }
  0x66   : > { %v6410_v34 = vld [vmem:[%s10433_s1 + $0xd8] sm:$0xff]  ;;  %v583_v44 = vld [vmem:[%s10434_s2 + $0x30] sm:$0xff]  ;;  %v577_v48 = vld [vmem:[%s10434_s2] sm:$0xff]  ;;  %vm4321_vm14 = vcmask 1039360   ;;  %vm4548_vm15 = vcmask 916480   ;;  %s8308_s28 = smov 15  }
  0x67   : > { %7838 = vset.pattern.permute.xlu0 %v8295_v3  ;;  %v584_v45 = vld [vmem:[%s10434_s2 + $0x38] sm:$0xff]  ;;  %v578_v49 = vld [vmem:[%s10434_s2 + $0x8] sm:$0xff]  ;;  %v579_v52 = vld [vmem:[%s10434_s2 + $0x10] sm:$0xff] }
  0x68   : > { %542 = vperm.xlu0 %7838, %v6398_v2   ;;  %v580_v59 = vld [vmem:[%s10434_s2 + $0x18] sm:$0xff]  ;;  %v587_v60 = vld [vmem:[%s10434_s2 + $0x50] sm:$0xff]  ;;  %v6403_v3 = vld [vmem:[%s10433_s1 + $0xa0] sm:$0xff] }
  0x69   : > { %v588_v61 = vld [vmem:[%s10434_s2 + $0x58] sm:$0xff] }
  0x6c   : > { %7960 = vset.pattern.permute.xlu0 %v8294_v1 }
  0xe2   : > { %v8527_v11 = vpop.permute.xlu0 %505 }
  0xe3   : > { %v514_v18 = vmul.f32 %v8527_v11, %v489_v4  ;;  %v515_v19 = vmul.f32 %v8527_v11, %v490_v5  ;;  %v508_v23 = vmul.f32 %v8527_v11, %v483_v6  ;;  %v509_v24 = vmul.f32 %v8527_v11, %v484_v7  ;;  %v6404_v4 = vld [vmem:[%s10433_s1 + $0xa8] sm:$0xff] }
  0xe4   : > { %v510_v27 = vmul.f32 %v8527_v11, %v485_v8  ;;  %v511_v28 = vmul.f32 %v8527_v11, %v486_v9  ;;  %v518_v31 = vmul.f32 %v8527_v11, %v493_v10  ;;  %v519_v32 = vmul.f32 %v8527_v11, %v494_v12  ;;  %v6413_v9 = vld [vmem:[%s10433_s1 + $0xf0] sm:$0xff]  ;;  %v6414_v10 = vld [vmem:[%s10433_s1 + $0xf8] sm:$0xff] }
  0xe5   : > { %v512_v35 = vmul.f32 %v8527_v11, %v487_v13  ;;  %v513_v36 = vmul.f32 %v8527_v11, %v488_v14  ;;  %v8587_v38 = vmul.f32 %v8527_v11, %v497_v17  ;;  %v8590_v39 = vmul.f32 %v8527_v11, %v498_v20 }
  0xe6   : > { %v8593_v40 = vmul.f32 %v8527_v11, %v491_v21  ;;  %v8596_v41 = vmul.f32 %v8527_v11, %v492_v22  ;;  %v6408_v21 = vld [vmem:[%s10433_s1 + $0xc8] sm:$0xff]  ;;  %v495_v22 = vld [vmem:[%s10433_s1 + $0x60] sm:$0xff] }
  0xe7   : > { %v8584_v37 = vpop.permute.xlu0 %542 }
  0xe8   : > { %v551_v42 = vmul.f32 %v6405_v15, %v8584_v37  ;;  %v552_v43 = vmul.f32 %v6406_v16, %v8584_v37  ;;  %v545_v46 = vmul.f32 %v6399_v25, %v8584_v37  ;;  %v546_v47 = vmul.f32 %v6400_v26, %v8584_v37  ;;  %v6407_v16 = vld [vmem:[%s10433_s1 + $0xc0] sm:$0xff] }
  0xe9   : > { %v547_v50 = vmul.f32 %v6401_v29, %v8584_v37  ;;  %v548_v51 = vmul.f32 %v6402_v30, %v8584_v37  ;;  %v555_v53 = vmul.f32 %v6409_v33, %v8584_v37  ;;  %v556_v54 = vmul.f32 %v6410_v34, %v8584_v37  ;;  %v581_v26 = vld [vmem:[%s10434_s2 + $0x20] sm:$0xff]  ;;  %v6412_v30 = vld [vmem:[%s10433_s1 + $0xe8] sm:$0xff]  ;;  %v591_v33 = vld [vmem:[%s10434_s2 + $0x70] sm:$0xff] }
  0xea   : > { %v567_v55 = vadd.f32 %v551_v42, %v514_v18  ;;  %v568_v56 = vadd.f32 %v552_v43, %v515_v19  ;;  %v561_v57 = vadd.f32 %v545_v46, %v508_v23  ;;  %v562_v58 = vadd.f32 %v546_v47, %v509_v24  ;;  %v6411_v23 = vld [vmem:[%s10433_s1 + $0xe0] sm:$0xff]  ;;  %v592_v34 = vld [vmem:[%s10434_s2 + $0x78] sm:$0xff] }
  0xeb   : > { %v563_v62 = vadd.f32 %v547_v50, %v510_v27  ;;  %v564_v63 = vadd.f32 %v548_v51, %v511_v28  ;;  %v571_v0 = vadd.f32 %v555_v53, %v518_v31  ;;  %v572_v2 = vadd.f32 %v556_v54, %v519_v32  ;;  %v582_v27 = vld [vmem:[%s10434_s2 + $0x28] sm:$0xff] }
  0xec   : > { %v599_v5 = vadd.f32 %v583_v44, %v567_v55  ;;  %v600_v6 = vadd.f32 %v584_v45, %v568_v56  ;;  %v593_v7 = vadd.f32 %v577_v48, %v561_v57  ;;  %v594_v8 = vadd.f32 %v578_v49, %v562_v58 }
  0xed   : > { %v595_v12 = vadd.f32 %v579_v52, %v563_v62  ;;  %v596_v13 = vadd.f32 %v580_v59, %v564_v63  ;;  %v603_v14 = vadd.f32 %v587_v60, %v571_v0  ;;  %v604_v15 = vadd.f32 %v588_v61, %v572_v2  ;;  %v586_v52 = vld [vmem:[%s10434_s2 + $0x48] sm:$0xff]  ;;  %v8005_v0 = vld [vmem:[%s10435_s3 + $0x140] sm:$0xff]  }
  0xee   : > { %v8645_v17 = vpack.c.bf16 %v600_v6, %v599_v5  ;;  %v8647_v18 = vpack.c.bf16 %v594_v8, %v593_v7  ;;  %v549_v19 = vmul.f32 %v6403_v3, %v8584_v37  ;;  %v550_v20 = vmul.f32 %v6404_v4, %v8584_v37  ;;  %v590_v59 = vld [vmem:[%s10434_s2 + $0x68] sm:$0xff]  ;;  %7104 = vmatprep.mubr.bf16.mxu1 %v8005_v0  ;;  %v8003_v3 = vld [vmem:[%s10435_s3 + $0x110] sm:$0xff]   ;;  %v8004_v4 = vld [vmem:[%s10435_s3 + $0x118] sm:$0xff]  }
  0xef   : > { %v8660_v24 = vpack.c.bf16 %v596_v13, %v595_v12  ;;  %v8662_v25 = vpack.c.bf16 %v604_v15, %v603_v14  ;;  %v559_v28 = vmul.f32 %v6413_v9, %v8584_v37  ;;  %v560_v29 = vmul.f32 %v6414_v10, %v8584_v37  ;;  %v8002_v2 = vld [vmem:[%s10435_s3 + $0x108] sm:$0xff]   ;;  %v8007_v5 = vld [vmem:[%s10435_s3 + $0x120] sm:$0xff]   ;;  %v8011_v7 = vld [vmem:[%s10435_s3 + $0x130] sm:$0xff]  }
  0xf0   : > { %827 = vrot.lane.b32.xlu0 %v8645_v17, %s8296_s12  ;;  %821 = vrot.lane.b32.xlu1 %v8647_v18, %s8296_s12  ;;  %v565_v31 = vadd.f32 %v549_v19, %v512_v35  ;;  %v566_v32 = vadd.f32 %v550_v20, %v513_v36  ;;  %v553_v42 = vmul.f32 %v6407_v16, %v8584_v37  ;;  %v496_v35 = vld [vmem:[%s10433_s1 + $0x68] sm:$0xff]  ;;  %v8012_v8 = vld [vmem:[%s10435_s3 + $0x138] sm:$0xff]   ;;  %v863_v10 = vlaneseq }
  0xf1   : > { %7056 = vmatprep.subr.bf16.mxu0 %v8647_v18  ;;  %v575_v43 = vadd.f32 %v559_v28, %v8587_v38  ;;  %v576_v44 = vadd.f32 %v560_v29, %v8590_v39  ;;  %v554_v45 = vmul.f32 %v6408_v21, %v8584_v37  ;;  %v557_v36 = vmul.f32 %v6411_v23, %v8584_v37  ;;  %v585_v38 = vld [vmem:[%s10434_s2 + $0x40] sm:$0xff]  ;;  %v8008_v6 = vld [vmem:[%s10435_s3 + $0x128] sm:$0xff]  }
  0xf2   : > { %7057 = vmatpush3.bf16.msra.mxu0 %v8647_v18  ;;  %v597_v46 = vadd.f32 %v581_v26, %v565_v31  ;;  %v598_v47 = vadd.f32 %v582_v27, %v566_v32  ;;  %v569_v48 = vadd.f32 %v553_v42, %v8593_v40  ;;  %v558_v39 = vmul.f32 %v6412_v30, %v8584_v37  ;;  %v8001_v40 = vld [vmem:[%s10435_s3 + $0x100] sm:$0xff]  }
  0xf3   : > { %7058 = vmatprep.subr.bf16.mxu0 %v8660_v24  ;;  %v607_v49 = vadd.f32 %v591_v33, %v575_v43  ;;  %v608_v50 = vadd.f32 %v592_v34, %v576_v44  ;;  %v570_v51 = vadd.f32 %v554_v45, %v8596_v41  ;;  %v520_v53 = vmul.f32 %v8527_v11, %v495_v22  ;;  %v8015_v9 = vld [vmem:[%s10435_s3 + $0x1c0] sm:$0xff]  }
  0xf4   : > { %831 = vrot.lane.b32.xlu0 %v8662_v25, %s8296_s12  ;;  %823 = vrot.lane.b32.xlu1 %v8660_v24, %s8296_s12  ;;  %v521_v37 = vmul.f32 %v8527_v11, %v496_v35  ;;  %v8714_v54 = vpack.c.bf16 %v598_v47, %v597_v46  ;;  %v601_v41 = vadd.f32 %v585_v38, %v569_v48  ;;  %v589_v11 = vld [vmem:[%s10434_s2 + $0x60] sm:$0xff]  ;;  %v8792_v12 = vand.u32 127, %v863_v10  ;;  %v8020_v10 = vld [vmem:[%s10435_s3 + $0x1d8] sm:$0xff]  }
  0xf5   : > { %v573_v55 = vadd.f32 %v557_v36, %v520_v53  ;;  %v8717_v56 = vpack.c.bf16 %v608_v50, %v607_v49  ;;  %v602_v57 = vadd.f32 %v586_v52, %v570_v51  ;;  %7072 = vmatprep.mubr.bf16.mxu0 %v8001_v40  ;;  %v8299_v14 = vmov 0.0   ;;  %v8006_v40 = vld [vmem:[%s10435_s3 + $0x148] sm:$0xff]  }
  0xf6   : > { %7059 = vmatpush3.bf16.msra.mxu0 %v8660_v24  ;;  %v574_v58 = vadd.f32 %v558_v39, %v521_v37  ;;  %v869_v13 = vand.u32 3, %v8792_v12 }
  0xf7   : > { %7060 = vmatprep.subr.bf16.mxu0 %v8714_v54  ;;  %v8731_v60 = vpack.c.bf16 %v602_v57, %v601_v41  ;;  %v605_v61 = vadd.f32 %v589_v11, %v573_v55  ;;  %v8009_v55 = vld [vmem:[%s10435_s3 + $0x150] sm:$0xff]  }
  0xf8   : > { %835 = vrot.lane.b32.xlu0 %v8717_v56, %s8296_s12  ;;  %825 = vrot.lane.b32.xlu1 %v8714_v54, %s8296_s12  ;;  %v606_v62 = vadd.f32 %v590_v59, %v574_v58  ;;  %vm877_vm0 = vcmp.ne.s32.totalorder %v869_v13, 3  ;;  %v8010_v59 = vld [vmem:[%s10435_s3 + $0x158] sm:$0xff]   ;;  %v8021_v13 = vld [vmem:[%s10435_s3 + $0xc0] sm:$0xff]  }
  0xf9   : > { %v6471_v15 = vsel %vm877_vm0, 1.0, %v8299_v14  ;;  %vm4958_vm0 = vcmask 908288  }
  0xfa   : > { %7061 = vmatpush3.bf16.msra.mxu0 %v8714_v54  ;;  %v8738_v63 = vpack.c.bf16 %v606_v62, %v605_v61  ;;  %v8796_v16 = vpack.c.bf16 %v6471_v15, %v6471_v15  ;;  %v8013_v62 = vld [vmem:[%s10435_s3 + $0x160] sm:$0xff]  }
  0xfb   : > { %7062 = vmatprep.subr.bf16.mxu0 %v8645_v17  ;;  %v8023_v15 = vld [vmem:[%s10435_s3 + $0x1e0] sm:$0xff]  }
  0xfc   : > { %1215 = vrot.lane.b32.xlu0 %v8660_v24, %s8297_s16  ;;  %829 = vrot.lane.b32.xlu1 %v8731_v60, %s8296_s12 }
  0xfe   : > { %7063 = vmatpush3.bf16.msra.mxu0 %v8645_v17 }
  0xff   : > { %7064 = vmatprep.subr.bf16.mxu0 %v8731_v60 }
 0x100   : > { %1219 = vrot.lane.b32.xlu0 %v8645_v17, %s8297_s16  ;;  %833 = vrot.lane.b32.xlu1 %v8738_v63, %s8296_s12 }
 0x102   : > { %7065 = vmatpush3.bf16.msra.mxu0 %v8731_v60 }
 0x103   : > { %7066 = vmatprep.subr.bf16.mxu0 %v8662_v25 }
 0x104   : > { %1223 = vrot.lane.b32.xlu0 %v8662_v25, %s8297_s16  ;;  %1213 = vrot.lane.b32.xlu1 %v8647_v18, %s8297_s16 }
 0x106   : > { %7067 = vmatpush3.bf16.msra.mxu0 %v8662_v25 }
 0x107   : > { %7068 = vmatprep.subr.bf16.mxu0 %v8738_v63 }
 0x108   : > { %1227 = vrot.lane.b32.xlu0 %v8717_v56, %s8297_s16  ;;  %1217 = vrot.lane.b32.xlu1 %v8714_v54, %s8297_s16 }
 0x10a   : > { %7069 = vmatpush3.bf16.msra.mxu0 %v8738_v63 }
 0x10b   : > { %7070 = vmatprep.subr.bf16.mxu0 %v8717_v56 }
 0x10c   : > { %2064 = vrot.lane.b32.xlu0 %v8660_v24, %s8298_s14  ;;  %1221 = vrot.lane.b32.xlu1 %v8731_v60, %s8297_s16 }
 0x10e   : > { %7071 = vmatpush3.bf16.msra.mxu0 %v8717_v56 }
 0x110   : > { %2068 = vrot.lane.b32.xlu0 %v8645_v17, %s8298_s14  ;;  %1225 = vrot.lane.b32.xlu1 %v8738_v63, %s8297_s16  ;;  %s8300_s16 = smov 32  }
 0x111   : > { %7073 = vmatmul.mubr.bf16.vlgmr.msra.gmra.mrb[0].mxu0 %v8002_v2 }
 0x112   : > { %7076 = vmatprep.mubr.bf16.mxu0 %v8003_v3 }
 0x114   : > { %2072 = vrot.lane.b32.xlu0 %v8662_v25, %s8298_s14  ;;  %2062 = vrot.lane.b32.xlu1 %v8647_v18, %s8298_s14 }
 0x118   : > { %2076 = vrot.lane.b32.xlu0 %v8717_v56, %s8298_s14  ;;  %2066 = vrot.lane.b32.xlu1 %v8714_v54, %s8298_s14 }
 0x119   : > { %7077 = vmatmul.mubr.bf16.gmra.mrb[4].mxu0 %v8004_v4  ;;  %v8014_v4 = vld [vmem:[%s10435_s3 + $0x168] sm:$0xff]  }
 0x11a   : > { %7080 = vmatprep.mubr.bf16.mxu0 %v8007_v5 }
 0x11c   : > { %2070 = vrot.lane.b32.xlu1 %v8731_v60, %s8298_s14 }
 0x120   : > { %2074 = vrot.lane.b32.xlu1 %v8738_v63, %s8298_s14 }
 0x121   : > { %7081 = vmatmul.mubr.bf16.gmra.mrb[8].mxu0 %v8008_v6  ;;  %v8016_v6 = vld [vmem:[%s10435_s3 + $0x1c8] sm:$0xff]  }
 0x122   : > { %7084 = vmatprep.mubr.bf16.mxu0 %v8011_v7  ;;  %v8017_v7 = vld [vmem:[%s10435_s3 + $0x170] sm:$0xff]  }
 0x129   : > { %7085 = vmatmul.mubr.bf16.gmra.mrb[12].mxu0 %v8012_v8  ;;  %v8019_v8 = vld [vmem:[%s10435_s3 + $0x1d0] sm:$0xff]  }
 0x12a   : > { %7168 = vmatprep.mubr.bf16.mxu0 %v8015_v9  ;;  %v8018_v9 = vld [vmem:[%s10435_s3 + $0x178] sm:$0xff]  }
 0x162   : > { %v822_v19 = vpop.permute.xlu1 %821  ;;  %v828_v22 = vpop.permute.xlu0 %827 }
 0x163   : > { %v840_v20 = vsel %vm837_vm1, %v822_v19, 0  ;;  %v849_v29 = vsel %vm837_vm1, %v828_v22, 0  ;;  %v8022_v19 = vld [vmem:[%s10435_s3 + $0xc8] sm:$0xff]   ;;  %v8025_v22 = vld [vmem:[%s10435_s3 + $0xd0] sm:$0xff]  }
 0x164   : > { %v8800_v21 = vmul.bf16 %v8796_v16, %v840_v20  ;;  %v8816_v33 = vmul.bf16 %v8796_v16, %v849_v29  ;;  %v8024_v20 = vld [vmem:[%s10435_s3 + $0x1e8] sm:$0xff]   ;;  %v8031_v29 = vld [vmem:[%s10435_s3 + $0x40] sm:$0xff]  }
 0x166   : > { %7088 = vmatprep.subr.bf16.mxu1 %v8800_v21  ;;  %v824_v23 = vpop.permute.xlu1 %823  ;;  %v832_v31 = vpop.permute.xlu0 %831 }
 0x167   : > { %v843_v26 = vsel %vm837_vm1, %v824_v23, 0  ;;  %7089 = vmatpush3.bf16.msra.mxu1 %v8800_v21  ;;  %v855_v35 = vsel %vm837_vm1, %v832_v31, 0  ;;  %v8027_v23 = vld [vmem:[%s10435_s3 + $0x1f0] sm:$0xff]  }
 0x168   : > { %v8806_v27 = vmul.bf16 %v8796_v16, %v843_v26  ;;  %v8829_v36 = vmul.bf16 %v8796_v16, %v855_v35  ;;  %v8026_v26 = vld [vmem:[%s10435_s3 + $0xd8] sm:$0xff]   ;;  %v8033_v31 = vld [vmem:[%s10435_s3 + $0xf0] sm:$0xff]   ;;  %v8054_v35 = vld [vmem:[%s10435_s3 + $0x68] sm:$0xff]  }
 0x16a   : > { %7090 = vmatprep.subr.bf16.mxu1 %v8806_v27  ;;  %v826_v28 = vpop.permute.xlu1 %825  ;;  %v836_v43 = vpop.permute.xlu0 %835 }
 0x16b   : > { %v846_v30 = vsel %vm837_vm1, %v826_v28, 0  ;;  %7091 = vmatpush3.bf16.msra.mxu1 %v8806_v27  ;;  %v861_v49 = vsel %vm837_vm1, %v836_v43, 0  ;;  %v8028_v28 = vld [vmem:[%s10435_s3 + $0x1f8] sm:$0xff]   ;;  %v8052_v43 = vld [vmem:[%s10435_s3 + $0x60] sm:$0xff]  }
 0x16c   : > { %v8813_v32 = vmul.bf16 %v8796_v16, %v846_v30  ;;  %v8863_v52 = vmul.bf16 %v8796_v16, %v861_v49  ;;  %v8032_v30 = vld [vmem:[%s10435_s3 + $0x48] sm:$0xff]   ;;  %v8043_v49 = vld [vmem:[%s10435_s3 + $0xb0] sm:$0xff]  }
 0x16e   : > { %7092 = vmatprep.subr.bf16.mxu1 %v8813_v32  ;;  %v830_v34 = vpop.permute.xlu1 %829  ;;  %v8841_v38 = vpop.permute.xlu0 %1215 }
 0x16f   : > { %v852_v42 = vsel %vm837_vm1, %v830_v34, 0  ;;  %7093 = vmatpush3.bf16.msra.mxu1 %v8813_v32  ;;  %v8854_v50 = vsel %vm1229_vm2, %v8841_v38, 0  ;;  %v8036_v34 = vld [vmem:[%s10435_s3 + $0x58] sm:$0xff]  }
 0x170   : > { %7094 = vmatprep.subr.bf16.mxu1 %v8816_v33  ;;  %v8823_v44 = vmul.bf16 %v8796_v16, %v852_v42  ;;  %v8037_v42 = vld [vmem:[%s10435_s3 + $0x80] sm:$0xff]  }
 0x172   : > { %v834_v45 = vpop.permute.xlu1 %833  ;;  %v8870_v37 = vpop.permute.xlu0 %1219 }
 0x173   : > { %7095 = vmatpush3.bf16.msra.mxu1 %v8816_v33  ;;  %v858_v47 = vsel %vm837_vm1, %v834_v45, 0  ;;  %v8882_v41 = vsel %vm1229_vm2, %v8870_v37, 0  ;;  %v8039_v45 = vld [vmem:[%s10435_s3 + $0x90] sm:$0xff]  }
 0x174   : > { %7096 = vmatprep.subr.bf16.mxu1 %v8823_v44  ;;  %v8848_v39 = vmul.bf16 %v8796_v16, %v858_v47  ;;  %v8040_v47 = vld [vmem:[%s10435_s3 + $0x98] sm:$0xff]  }
 0x176   : > { %v8831_v46 = vpop.permute.xlu1 %1213  ;;  %v8898_v11 = vpop.permute.xlu0 %1223 }
 0x177   : > { %7097 = vmatpush3.bf16.msra.mxu1 %v8823_v44  ;;  %7744 = vmatprep.subr.msk.bf16.mxu0 %vm1229_vm2, %v8831_v46  ;;  %v8839_v48 = vsel %vm1229_vm2, %v8831_v46, 0  ;;  %v8910_v61 = vsel %vm1229_vm2, %v8898_v11, 0 }
 0x178   : > { %7098 = vmatprep.subr.bf16.mxu1 %v8829_v36  ;;  %7153 = vmatpush3.bf16.msra.mxu0 %v8839_v48 }
 0x179   : > { %7745 = vmatprep.subr.msk.bf16.mxu0 %vm1229_vm2, %v8841_v38 }
 0x17a   : > { %v8856_v51 = vpop.permute.xlu1 %1217  ;;  %v8926_v3 = vpop.permute.xlu0 %1227 }
 0x17b   : > { %7099 = vmatpush3.bf16.msra.mxu1 %v8829_v36  ;;  %v8868_v53 = vsel %vm1229_vm2, %v8856_v51, 0  ;;  %v8938_v5 = vsel %vm1229_vm2, %v8926_v3, 0 }
 0x17c   : > { %7100 = vmatprep.subr.bf16.mxu1 %v8848_v39  ;;  %7155 = vmatpush3.bf16.msra.mxu0 %v8854_v50 }
 0x17d   : > { %7746 = vmatprep.subr.msk.bf16.mxu0 %vm1229_vm2, %v8856_v51 }
 0x17e   : > { %v8887_v57 = vpop.permute.xlu1 %1221 }
 0x17f   : > { %7101 = vmatpush3.bf16.msra.mxu1 %v8848_v39  ;;  %v8896_v58 = vsel %vm1229_vm2, %v8887_v57, 0 }
 0x180   : > { %7102 = vmatprep.subr.bf16.mxu1 %v8863_v52  ;;  %7157 = vmatpush3.bf16.msra.mxu0 %v8868_v53 }
 0x181   : > { %7747 = vmatprep.subr.msk.bf16.mxu0 %vm1229_vm2, %v8870_v37 }
 0x182   : > { %v8915_v0 = vpop.permute.xlu1 %1225 }
 0x183   : > { %7103 = vmatpush3.bf16.msra.mxu1 %v8863_v52  ;;  %v8924_v2 = vsel %vm1229_vm2, %v8915_v0, 0 }
 0x184   : > { %7120 = vmatprep.subr.bf16.mxu1 %v8647_v18  ;;  %7159 = vmatpush3.bf16.msra.mxu0 %v8882_v41 }
 0x185   : > { %7748 = vmatprep.subr.msk.bf16.mxu0 %vm1229_vm2, %v8887_v57 }
 0x186   : > { %7105 = vmatmul.mubr.bf16.vlgmr.msra.gmra.mrb[0].mxu1 %v8006_v40 }
 0x187   : > { %7121 = vmatpush3.bf16.msra.mxu1 %v8647_v18  ;;  %7108 = vmatprep.mubr.bf16.mxu1 %v8009_v55 }
 0x188   : > { %7122 = vmatprep.subr.bf16.mxu1 %v8660_v24  ;;  %7161 = vmatpush3.bf16.msra.mxu0 %v8896_v58 }
 0x189   : > { %7749 = vmatprep.subr.msk.bf16.mxu0 %vm1229_vm2, %v8898_v11 }
 0x18b   : > { %7123 = vmatpush3.bf16.msra.mxu1 %v8660_v24 }
 0x18c   : > { %7124 = vmatprep.subr.bf16.mxu1 %v8714_v54  ;;  %7163 = vmatpush3.bf16.msra.mxu0 %v8910_v61 }
 0x18d   : > { %7750 = vmatprep.subr.msk.bf16.mxu0 %vm1229_vm2, %v8915_v0 }
 0x18e   : > { %7109 = vmatmul.mubr.bf16.gmra.mrb[4].mxu1 %v8010_v59 }
 0x18f   : > { %7125 = vmatpush3.bf16.msra.mxu1 %v8714_v54  ;;  %7112 = vmatprep.mubr.bf16.mxu1 %v8013_v62  ;;  %v8057_v62 = vld [vmem:[%s10435_s3 + $0x188] sm:$0xff]  }
 0x190   : > { %7126 = vmatprep.subr.bf16.mxu1 %v8645_v17  ;;  %7165 = vmatpush3.bf16.msra.mxu0 %v8924_v2 }
 0x191   : > { %7751 = vmatprep.subr.msk.bf16.mxu0 %vm1229_vm2, %v8926_v3 }
 0x193   : > { %7127 = vmatpush3.bf16.msra.mxu1 %v8645_v17 }
 0x194   : > { %7128 = vmatprep.subr.bf16.mxu1 %v8731_v60  ;;  %7167 = vmatpush3.bf16.msra.mxu0 %v8938_v5 }
 0x195   : > { %7184 = vmatprep.subr.bf16.mxu0 %v8647_v18 }
 0x196   : > { %7113 = vmatmul.mubr.bf16.gmra.mrb[8].mxu1 %v8014_v4 }
 0x197   : > { %7129 = vmatpush3.bf16.msra.mxu1 %v8731_v60  ;;  %7169 = vmatmul.mubr.bf16.vlgmr.msra.gmra.mrb[16].mxu0 %v8016_v6 }
 0x198   : > { %7130 = vmatprep.subr.bf16.mxu1 %v8662_v25  ;;  %7185 = vmatpush3.bf16.msra.mxu0 %v8647_v18 }
 0x199   : > { %7186 = vmatprep.subr.bf16.mxu0 %v8660_v24  ;;  %7116 = vmatprep.mubr.bf16.mxu1 %v8017_v7 }
 0x19a   : > { %7172 = vmatprep.mubr.bf16.mxu0 %v8019_v8 }
 0x19b   : > { %7131 = vmatpush3.bf16.msra.mxu1 %v8662_v25 }
 0x19c   : > { %7132 = vmatprep.subr.bf16.mxu1 %v8738_v63  ;;  %7187 = vmatpush3.bf16.msra.mxu0 %v8660_v24 }
 0x19d   : > { %7188 = vmatprep.subr.bf16.mxu0 %v8714_v54 }
 0x19e   : > { %7117 = vmatmul.mubr.bf16.gmra.mrb[12].mxu1 %v8018_v9 }
 0x19f   : > { %7133 = vmatpush3.bf16.msra.mxu1 %v8738_v63  ;;  %7173 = vmatmul.mubr.bf16.gmra.mrb[20].mxu0 %v8020_v10 }
 0x1a0   : > { %7134 = vmatprep.subr.bf16.mxu1 %v8717_v56  ;;  %7189 = vmatpush3.bf16.msra.mxu0 %v8714_v54 }
 0x1a1   : > { %7190 = vmatprep.subr.bf16.mxu0 %v8645_v17  ;;  %7136 = vmatprep.mubr.bf16.mxu1 %v8021_v13 }
 0x1a2   : > { %7176 = vmatprep.mubr.bf16.mxu0 %v8023_v15 }
 0x1a3   : > { %7135 = vmatpush3.bf16.msra.mxu1 %v8717_v56 }
 0x1a4   : > { %7191 = vmatpush3.bf16.msra.mxu0 %v8645_v17  ;;  %7216 = vmatprep.subr.bf16.mxu1 %v8800_v21 }
 0x1a5   : > { %7192 = vmatprep.subr.bf16.mxu0 %v8731_v60 }
 0x1a6   : > { %7137 = vmatmul.mubr.bf16.vlgmr.msra.gmra.mrb[0].mxu1 %v8022_v19 }
 0x1a7   : > { %7177 = vmatmul.mubr.bf16.gmra.mrb[24].mxu0 %v8024_v20  ;;  %7217 = vmatpush3.bf16.msra.mxu1 %v8800_v21  ;;  %v8029_v21 = vld [vmem:[%s10435_s3 + $0xe0] sm:$0xff]  }
 0x1a8   : > { %7193 = vmatpush3.bf16.msra.mxu0 %v8731_v60  ;;  %7218 = vmatprep.subr.bf16.mxu1 %v8806_v27 }
 0x1a9   : > { %7194 = vmatprep.subr.bf16.mxu0 %v8662_v25  ;;  %7140 = vmatprep.mubr.bf16.mxu1 %v8025_v22 }
 0x1aa   : > { %7180 = vmatprep.mubr.bf16.mxu0 %v8027_v23  ;;  %v8060_v23 = vld [vmem:[%s10435_s3 + $0x198] sm:$0xff]  }
 0x1ab   : > { %7219 = vmatpush3.bf16.msra.mxu1 %v8806_v27  ;;  %v8030_v27 = vld [vmem:[%s10435_s3 + $0xe8] sm:$0xff]  }
 0x1ac   : > { %7195 = vmatpush3.bf16.msra.mxu0 %v8662_v25  ;;  %7220 = vmatprep.subr.bf16.mxu1 %v8813_v32 }
 0x1ad   : > { %7196 = vmatprep.subr.bf16.mxu0 %v8738_v63 }
 0x1ae   : > { %7141 = vmatmul.mubr.bf16.gmra.mrb[4].mxu1 %v8026_v26 }
 0x1af   : > { %7181 = vmatmul.mubr.bf16.gmra.mrb[28].mxu0 %v8028_v28  ;;  %7221 = vmatpush3.bf16.msra.mxu1 %v8813_v32  ;;  %v8035_v32 = vld [vmem:[%s10435_s3 + $0x50] sm:$0xff]   ;;  %v8061_v28 = vld [vmem:[%s10435_s3 + $0x1a0] sm:$0xff]  }
 0x1b0   : > { %7197 = vmatpush3.bf16.msra.mxu0 %v8738_v63  ;;  %7222 = vmatprep.subr.bf16.mxu1 %v8816_v33 }
 0x1b1   : > { %7198 = vmatprep.subr.bf16.mxu0 %v8717_v56  ;;  %7144 = vmatprep.mubr.bf16.mxu1 %v8029_v21 }
 0x1b2   : > { %7200 = vmatprep.mubr.bf16.mxu0 %v8031_v29 }
 0x1b3   : > { %7223 = vmatpush3.bf16.msra.mxu1 %v8816_v33  ;;  %v8034_v33 = vld [vmem:[%s10435_s3 + $0xf8] sm:$0xff]  }
 0x1b4   : > { %7199 = vmatpush3.bf16.msra.mxu0 %v8717_v56  ;;  %7224 = vmatprep.subr.bf16.mxu1 %v8823_v44 }
 0x1b6   : > { %7145 = vmatmul.mubr.bf16.gmra.mrb[8].mxu1 %v8030_v27 }
 0x1b7   : > { %7201 = vmatmul.mubr.bf16.vlgmr.msra.gmra.mrb[16].mxu0 %v8032_v30  ;;  %7225 = vmatpush3.bf16.msra.mxu1 %v8823_v44  ;;  %v8038_v44 = vld [vmem:[%s10435_s3 + $0x88] sm:$0xff]  }
 0x1b8   : > { %7226 = vmatprep.subr.bf16.mxu1 %v8829_v36  ;;  %7148 = vmatprep.mubr.bf16.mxu1 %v8033_v31 }
 0x1b9   : > { %7204 = vmatprep.mubr.bf16.mxu0 %v8035_v32  ;;  %v8062_v32 = vld [vmem:[%s10435_s3 + $0x1a8] sm:$0xff]  }
 0x1bb   : > { %7227 = vmatpush3.bf16.msra.mxu1 %v8829_v36  ;;  %v8056_v36 = vld [vmem:[%s10435_s3 + $0x70] sm:$0xff]  }
 0x1bc   : > { %7228 = vmatprep.subr.bf16.mxu1 %v8848_v39 }
 0x1be   : > { %7149 = vmatmul.mubr.bf16.gmra.mrb[12].mxu1 %v8034_v33 }
 0x1bf   : > { %7205 = vmatmul.mubr.bf16.gmra.mrb[20].mxu0 %v8036_v34  ;;  %7229 = vmatpush3.bf16.msra.mxu1 %v8848_v39  ;;  %v8041_v39 = vld [vmem:[%s10435_s3 + $0xa0] sm:$0xff]   ;;  %v8063_v34 = vld [vmem:[%s10435_s3 + $0x1b0] sm:$0xff]  }
 0x1c0   : > { %7230 = vmatprep.subr.bf16.mxu1 %v8863_v52  ;;  %7232 = vmatprep.mubr.bf16.mxu1 %v8037_v42 }
 0x1c1   : > { %7208 = vmatprep.mubr.bf16.mxu0 %v8052_v43 }
 0x1c3   : > { %7231 = vmatpush3.bf16.msra.mxu1 %v8863_v52  ;;  %v8055_v52 = vld [vmem:[%s10435_s3 + $0x180] sm:$0xff]  }
 0x1c4   : > { %7248 = vmatprep.subr.bf16.mxu1 %v8647_v18 }
 0x1c6   : > { %7233 = vmatmul.mubr.bf16.vlgmr.msra.gmra.mrb[16].mxu1 %v8038_v44 }
 0x1c7   : > { %7249 = vmatpush3.bf16.msra.mxu1 %v8647_v18  ;;  %7236 = vmatprep.mubr.bf16.mxu1 %v8039_v45  ;;  %v8058_v18 = vld [vmem:[%s10435_s3 + $0x78] sm:$0xff]  }
 0x1c8   : > { %7250 = vmatprep.subr.bf16.mxu1 %v8660_v24  ;;  %7209 = vmatmul.mubr.bf16.gmra.mrb[24].mxu0 %v8054_v35 }
 0x1c9   : > { %7212 = vmatprep.mubr.bf16.mxu0 %v8056_v36  ;;  %v8064_v36 = vld [vmem:[%s10435_s3 + $0x1b8] sm:$0xff]  }
 0x1cb   : > { %7251 = vmatpush3.bf16.msra.mxu1 %v8660_v24  ;;  %v8042_v24 = vld [vmem:[%s10435_s3 + $0xa8] sm:$0xff]  }
 0x1cc   : > { %7252 = vmatprep.subr.bf16.mxu1 %v8714_v54 }
 0x1ce   : > { %7237 = vmatmul.mubr.bf16.gmra.mrb[20].mxu1 %v8040_v47 }
 0x1cf   : > { %7253 = vmatpush3.bf16.msra.mxu1 %v8714_v54  ;;  %7240 = vmatprep.mubr.bf16.mxu1 %v8041_v39  ;;  %v8044_v54 = vld [vmem:[%s10435_s3 + $0xb8] sm:$0xff]   ;;  %v8065_v39 = vld [vmem:[%s10435_s3 + $0x200] sm:$0xff]  }
 0x1d0   : > { %7254 = vmatprep.subr.bf16.mxu1 %v8645_v17  ;;  %7213 = vmatmul.mubr.bf16.gmra.mrb[28].mxu0 %v8058_v18 }
 0x1d3   : > { %7255 = vmatpush3.bf16.msra.mxu1 %v8645_v17  ;;  %v8045_v17 = vld [vmem:[%s10435_s3] sm:$0xff]  }
 0x1d4   : > { %7256 = vmatprep.subr.bf16.mxu1 %v8731_v60 }
 0x1d6   : > { %7241 = vmatmul.mubr.bf16.gmra.mrb[24].mxu1 %v8042_v24  ;;  %v8066_v24 = vld [vmem:[%s10435_s3 + $0x208] sm:$0xff]  }
 0x1d7   : > { %7257 = vmatpush3.bf16.msra.mxu1 %v8731_v60  ;;  %7244 = vmatprep.mubr.bf16.mxu1 %v8043_v49  ;;  %v8046_v60 = vld [vmem:[%s10435_s3 + $0x8] sm:$0xff]   ;;  %v8067_v49 = vld [vmem:[%s10435_s3 + $0x210] sm:$0xff]  }
 0x1d8   : > { %7258 = vmatprep.subr.bf16.mxu1 %v8662_v25 }
 0x1db   : > { %7259 = vmatpush3.bf16.msra.mxu1 %v8662_v25  ;;  %v8047_v25 = vld [vmem:[%s10435_s3 + $0x10] sm:$0xff]  }
 0x1dc   : > { %7260 = vmatprep.subr.bf16.mxu1 %v8738_v63 }
 0x1de   : > { %7245 = vmatmul.mubr.bf16.gmra.mrb[28].mxu1 %v8044_v54  ;;  %v8068_v54 = vld [vmem:[%s10435_s3 + $0x218] sm:$0xff]  }
 0x1df   : > { %7261 = vmatpush3.bf16.msra.mxu1 %v8738_v63  ;;  %7264 = vmatprep.mubr.bf16.mxu1 %v8045_v17  ;;  %v8048_v63 = vld [vmem:[%s10435_s3 + $0x18] sm:$0xff]   ;;  %v8070_v17 = vld [vmem:[%s10435_s3 + $0x228] sm:$0xff]  }
 0x1e0   : > { %7262 = vmatprep.subr.bf16.mxu1 %v8717_v56 }
 0x1e3   : > { %7263 = vmatpush3.bf16.msra.mxu1 %v8717_v56  ;;  %v8049_v56 = vld [vmem:[%s10435_s3 + $0x20] sm:$0xff]  }
 0x1e4   : > { %7752 = vmatprep.subr.msk.bf16.mxu1 %vm1229_vm2, %v8831_v46  ;;  %v8050_v46 = vld [vmem:[%s10435_s3 + $0x28] sm:$0xff]  }
 0x1e6   : > { %7265 = vmatmul.mubr.bf16.vlgmr.msra.gmra.mrb[16].mxu1 %v8046_v60  ;;  %v8071_v60 = vld [vmem:[%s10435_s3 + $0x230] sm:$0xff]  }
 0x1e7   : > { %7281 = vmatpush3.bf16.msra.mxu1 %v8839_v48  ;;  %7268 = vmatprep.mubr.bf16.mxu1 %v8047_v25  ;;  %v8051_v48 = vld [vmem:[%s10435_s3 + $0x30] sm:$0xff]   ;;  %v8072_v25 = vld [vmem:[%s10435_s3 + $0x238] sm:$0xff]  }
 0x1e8   : > { %7753 = vmatprep.subr.msk.bf16.mxu1 %vm1229_vm2, %v8841_v38  ;;  %v9134_v38 = vpop.f32.mrb[0].mxu0 }
 0x1eb   : > { %7283 = vmatpush3.bf16.msra.mxu1 %v8854_v50  ;;  %v8053_v50 = vld [vmem:[%s10435_s3 + $0x38] sm:$0xff]  }
 0x1ec   : > { %7754 = vmatprep.subr.msk.bf16.mxu1 %vm1229_vm2, %v8856_v51  ;;  %v9139_v51 = vpop.f32.mrb[1].mxu0 }
 0x1ee   : > { %7269 = vmatmul.mubr.bf16.gmra.mrb[20].mxu1 %v8048_v63 }
 0x1ef   : > { %7285 = vmatpush3.bf16.msra.mxu1 %v8868_v53  ;;  %7272 = vmatprep.mubr.bf16.mxu1 %v8049_v56  ;;  %v2063_v53 = vpop.permute.xlu1 %2062 }
 0x1f0   : > { %7755 = vmatprep.subr.msk.bf16.mxu1 %vm1229_vm2, %v8870_v37  ;;  %v9147_v37 = vpop.f32.mrb[2].mxu0  ;;  %v2080_v55 = vsel %vm2078_vm3, %v2063_v53, 0 }
 0x1f1   : > { %v9149_v40 = vpop.f32.mrb[3].mxu0 }
 0x1f3   : > { %7287 = vmatpush3.bf16.msra.mxu1 %v8882_v41  ;;  %v9151_v41 = vpop.f32.mrb[4].mxu0  ;;  %v2067_v6 = vpop.permute.xlu1 %2066 }
 0x1f4   : > { %7756 = vmatprep.subr.msk.bf16.mxu1 %vm1229_vm2, %v8887_v57  ;;  %v9155_v57 = vpop.f32.mrb[5].mxu0  ;;  %v2086_v13 = vsel %vm2078_vm3, %v2067_v6, 0 }
 0x1f5   : > { %v2105_v22 = vmul.bf16 %v2086_v13, %v8796_v16 }
 0x1f6   : > { %7273 = vmatmul.mubr.bf16.gmra.mrb[24].mxu1 %v8050_v46 }
 0x1f7   : > { %7289 = vmatpush3.bf16.msra.mxu1 %v8896_v58  ;;  %7276 = vmatprep.mubr.bf16.mxu1 %v8051_v48  ;;  %v2065_v58 = vpop.permute.xlu0 %2064  ;;  %v2071_v21 = vpop.permute.xlu1 %2070 }
 0x1f8   : > { %7757 = vmatprep.subr.msk.bf16.mxu1 %vm1229_vm2, %v8898_v11  ;;  %v9159_v11 = vpop.f32.mrb[6].mxu0  ;;  %v2092_v27 = vsel %vm2078_vm3, %v2071_v21, 0 }
 0x1f9   : > { %v9161_v59 = vpop.f32.mrb[7].mxu0  ;;  %v2107_v31 = vmul.bf16 %v2092_v27, %v8796_v16 }
 0x1fb   : > { %7291 = vmatpush3.bf16.msra.mxu1 %v8910_v61  ;;  %v2103_v61 = vmul.bf16 %v2080_v55, %v8796_v16  ;;  %v2069_v15 = vpop.permute.xlu0 %2068  ;;  %v2075_v42 = vpop.permute.xlu1 %2074 }
 0x1fc   : > { %7758 = vmatprep.subr.msk.bf16.mxu1 %vm1229_vm2, %v8915_v0  ;;  %v9167_v0 = vpop.f32.mrb[8].mxu0  ;;  %v2089_v26 = vsel %vm2078_vm3, %v2069_v15, 0  ;;  %v2098_v44 = vsel %vm2078_vm3, %v2075_v42, 0 }
 0x1fd   : > { %v9174_v4 = vpop.f32.mrb[9].mxu0  ;;  %v2106_v29 = vmul.bf16 %v2089_v26, %v8796_v16  ;;  %v2109_v35 = vmul.bf16 %v2098_v44, %v8796_v16 }
 0x1fe   : > { %7277 = vmatmul.mubr.bf16.gmra.mrb[28].mxu1 %v8053_v50  ;;  %v9176_v7 = vpop.f32.mrb[10].mxu0 }
 0x1ff   : > { %7293 = vmatpush3.bf16.msra.mxu1 %v8924_v2  ;;  %7296 = vmatprep.mubr.bf16.mxu1 %v8055_v52  ;;  %v2083_v2 = vsel %vm2078_vm3, %v2065_v58, 0  ;;  %v9178_v8 = vpop.f32.mrb[11].mxu0  ;;  %v2073_v30 = vpop.permute.xlu0 %2072 }
 0x200   : > { %7759 = vmatprep.subr.msk.bf16.mxu1 %vm1229_vm2, %v8926_v3  ;;  %v8059_v3 = vld [vmem:[%s10435_s3 + $0x190] sm:$0xff]   ;;  %v2104_v9 = vmul.bf16 %v2083_v2, %v8796_v16  ;;  %v9181_v10 = vpop.f32.mrb[12].mxu0  ;;  %v2095_v33 = vsel %vm2078_vm3, %v2073_v30, 0  ;;  %vm10225_vm2 = vmneg %vm2464_vm4 }
 0x201   : > { %v2108_v43 = vmul.bf16 %v2095_v33, %v8796_v16 }
 0x203   : > { %7295 = vmatpush3.bf16.msra.mxu1 %v8938_v5  ;;  %v9184_v5 = vpop.f32.mrb[13].mxu0  ;;  %v2077_v45 = vpop.permute.xlu0 %2076 }
 0x204   : > { %7312 = vmatprep.subr.bf16.mxu1 %v2103_v61  ;;  %v9186_v19 = vpop.f32.mrb[14].mxu0  ;;  %v2101_v47 = vsel %vm2078_vm3, %v2077_v45, 0 }
 0x205   : > { %v9188_v20 = vpop.f32.mrb[15].mxu0  ;;  %v2110_v18 = vmul.bf16 %v2101_v47, %v8796_v16  ;;  %v8069_v16 = vld [vmem:[%s10435_s3 + $0x220] sm:$0xff]  }
 0x206   : > { %7297 = vmatmul.mubr.bf16.vlgmr.msra.gmra.mrb[16].mxu1 %v8057_v62 }
 0x207   : > { %7313 = vmatpush3.bf16.msra.mxu1 %v2103_v61  ;;  %7300 = vmatprep.mubr.bf16.mxu1 %v8059_v3 }
 0x208   : > { %7314 = vmatprep.subr.bf16.mxu1 %v2104_v9 }
 0x20b   : > { %7315 = vmatpush3.bf16.msra.mxu1 %v2104_v9 }
 0x20c   : > { %7316 = vmatprep.subr.bf16.mxu1 %v2105_v22 }
 0x20e   : > { %7301 = vmatmul.mubr.bf16.gmra.mrb[20].mxu1 %v8060_v23 }
 0x20f   : > { %7317 = vmatpush3.bf16.msra.mxu1 %v2105_v22  ;;  %7304 = vmatprep.mubr.bf16.mxu1 %v8061_v28 }
 0x210   : > { %7318 = vmatprep.subr.bf16.mxu1 %v2106_v29 }
 0x213   : > { %7319 = vmatpush3.bf16.msra.mxu1 %v2106_v29 }
 0x214   : > { %7320 = vmatprep.subr.bf16.mxu1 %v2107_v31 }
 0x216   : > { %7305 = vmatmul.mubr.bf16.gmra.mrb[24].mxu1 %v8062_v32 }
 0x217   : > { %7321 = vmatpush3.bf16.msra.mxu1 %v2107_v31  ;;  %7308 = vmatprep.mubr.bf16.mxu1 %v8063_v34 }
 0x218   : > { %7322 = vmatprep.subr.bf16.mxu1 %v2108_v43 }
 0x21b   : > { %7323 = vmatpush3.bf16.msra.mxu1 %v2108_v43 }
 0x21c   : > { %7324 = vmatprep.subr.bf16.mxu1 %v2109_v35 }
 0x21e   : > { %7309 = vmatmul.mubr.bf16.gmra.mrb[28].mxu1 %v8064_v36 }
 0x21f   : > { %7325 = vmatpush3.bf16.msra.mxu1 %v2109_v35  ;;  %7328 = vmatprep.mubr.bf16.mxu1 %v8065_v39  ;;  %v8073_v39 = vld [vmem:[%s10437_s5] sm:$0xff]  }
 0x220   : > { %7326 = vmatprep.subr.bf16.mxu1 %v2110_v18  ;;  %7344 = vmatprep.subr.bf16.mxu0 %v8073_v39 }
 0x221   : > { %7345 = vmatpush3.bf16.msra.mxu0 %v8073_v39  ;;  %v2534_v39 = vld [vmem:[%s10436_s4 + $0x18] sm:$0xff] }
 0x223   : > { %7327 = vmatpush3.bf16.msra.mxu1 %v2110_v18  ;;  %v8074_v18 = vld [vmem:[%s10437_s5 + $0x8] sm:$0xff]  }
 0x224   : > { %7346 = vmatprep.subr.bf16.mxu0 %v8074_v18 }
 0x225   : > { %7347 = vmatpush3.bf16.msra.mxu0 %v8074_v18  ;;  %v2539_v18 = vld [vmem:[%s10436_s4 + $0x40] sm:$0xff] }
 0x226   : > { %7329 = vmatmul.mubr.bf16.vlgmr.msra.gmra.mrb[16].mxu1 %v8066_v24 }
 0x227   : > { %7332 = vmatprep.mubr.bf16.mxu1 %v8067_v49  ;;  %v8075_v49 = vld [vmem:[%s10437_s5 + $0x10] sm:$0xff]  }
 0x228   : > { %7348 = vmatprep.subr.bf16.mxu0 %v8075_v49 }
 0x229   : > { %7349 = vmatpush3.bf16.msra.mxu0 %v8075_v49  ;;  %v2541_v49 = vld [vmem:[%s10436_s4 + $0x50] sm:$0xff] }
 0x22e   : > { %7333 = vmatmul.mubr.bf16.gmra.mrb[20].mxu1 %v8068_v54 }
 0x22f   : > { %7336 = vmatprep.mubr.bf16.mxu1 %v8069_v16 }
 0x236   : > { %7337 = vmatmul.mubr.bf16.gmra.mrb[24].mxu1 %v8070_v17 }
 0x237   : > { %7340 = vmatprep.mubr.bf16.mxu1 %v8071_v60 }
 0x23e   : > { %7341 = vmatmul.mubr.bf16.gmra.mrb[28].mxu1 %v8072_v25 }
 0x279   : > { %v7138_v63 = vpop.f32.mrb[0].mxu1 }
 0x27a   : > { %v1116_v56 = vpop.f32.mrb[1].mxu1 }
 0x27b   : > { %v7139_v46 = vpop.f32.mrb[2].mxu1 }
 0x27c   : > { %v7849_v48 = vpack.i.bf16 %v7139_v46, %v7138_v63  ;;  %v1119_v50 = vpop.f32.mrb[3].mxu1 }
 0x27d   : > { %v7854_v52 = vpack.i.bf16 %v1119_v50, %v1116_v56 }
 0x281   : > { %v7142_v53 = vpop.f32.mrb[4].mxu1 }
 0x282   : > { %v1132_v55 = vpop.f32.mrb[5].mxu1 }
 0x283   : > { %v7143_v58 = vpop.f32.mrb[6].mxu1 }
 0x284   : > { %v7869_v61 = vpack.i.bf16 %v7143_v58, %v7142_v53  ;;  %v1135_v62 = vpop.f32.mrb[7].mxu1  ;;  %v8076_v53 = vld [vmem:[%s10437_s5 + $0x18] sm:$0xff]  }
 0x285   : > { %v7874_v2 = vpack.i.bf16 %v1135_v62, %v1132_v55  ;;  %7350 = vmatprep.subr.bf16.mxu0 %v8076_v53 }
 0x286   : > { %7351 = vmatpush3.bf16.msra.mxu0 %v8076_v53 }
 0x289   : > { %v7146_v3 = vpop.f32.mrb[8].mxu1 }
 0x28a   : > { %v1148_v6 = vpop.f32.mrb[9].mxu1  ;;  %v7202_v9 = vpop.f32.mrb[16].mxu0 }
 0x28b   : > { %v7147_v13 = vpop.f32.mrb[10].mxu1  ;;  %v1481_v15 = vpop.f32.mrb[17].mxu0 }
 0x28c   : > { %v7879_v22 = vpack.i.bf16 %v7147_v13, %v7146_v3  ;;  %v1151_v23 = vpop.f32.mrb[11].mxu1  ;;  %v7203_v26 = vpop.f32.mrb[18].mxu0 }
 0x28d   : > { %v7884_v28 = vpack.i.bf16 %v1151_v23, %v1148_v6  ;;  %v7839_v21 = vpack.i.bf16 %v7203_v26, %v7202_v9  ;;  %v1484_v29 = vpop.f32.mrb[19].mxu0 }
 0x28e   : > { %v7844_v27 = vpack.i.bf16 %v1484_v29, %v1481_v15 }
 0x28f   : > { %7840 = vrot.lane.b32.xlu0 %v7839_v21, %s8300_s16 }
 0x290   : > { %7845 = vrot.lane.b32.xlu1 %v7844_v27, %s8300_s16 }
 0x291   : > { %v9242_v30 = vpop.f32.mrb[12].mxu1 }
 0x292   : > { %v9244_v31 = vpop.f32.mrb[13].mxu1  ;;  %v7206_v32 = vpop.f32.mrb[20].mxu0 }
 0x293   : > { %v9246_v33 = vpop.f32.mrb[14].mxu1  ;;  %7850 = vrot.lane.b32.xlu0 %v7849_v48, %s8301_s18  ;;  %v1497_v34 = vpop.f32.mrb[21].mxu0 }
 0x294   : > { %v7924_v42 = vpack.i.bf16 %v9246_v33, %v9242_v30  ;;  %v1167_v43 = vpop.f32.mrb[15].mxu1  ;;  %7855 = vrot.lane.b32.xlu1 %v7854_v52, %s8301_s18  ;;  %v7207_v44 = vpop.f32.mrb[22].mxu0 }
 0x295   : > { %v7919_v45 = vpack.i.bf16 %v1167_v43, %v9244_v31  ;;  %v7859_v35 = vpack.i.bf16 %v7207_v44, %v7206_v32  ;;  %v1500_v36 = vpop.f32.mrb[23].mxu0  ;;  %v2532_v44 = vld [vmem:[%s10436_s4 + $0x8] sm:$0xff] }
 0x296   : > { %v7864_v47 = vpack.i.bf16 %v1500_v36, %v1497_v34  ;;  %v2533_v36 = vld [vmem:[%s10436_s4 + $0x10] sm:$0xff] }
 0x297   : > { %7860 = vrot.lane.b32.xlu0 %v7859_v35, %s8300_s16  ;;  %v2535_v35 = vld [vmem:[%s10436_s4 + $0x20] sm:$0xff] }
 0x298   : > { %7865 = vrot.lane.b32.xlu1 %v7864_v47, %s8300_s16  ;;  %v2537_v47 = vld [vmem:[%s10436_s4 + $0x30] sm:$0xff] }
 0x29b   : > { %7870 = vrot.lane.b32.xlu0 %v7869_v61, %s8301_s18  ;;  %v7210_v24 = vpop.f32.mrb[24].mxu0 }
 0x29c   : > { %7875 = vrot.lane.b32.xlu1 %v7874_v2, %s8301_s18  ;;  %v1513_v54 = vpop.f32.mrb[25].mxu0 }
 0x29d   : > { %v7211_v16 = vpop.f32.mrb[26].mxu0 }
 0x29e   : > { %v7904_v17 = vpack.i.bf16 %v7211_v16, %v7210_v24  ;;  %v1516_v60 = vpop.f32.mrb[27].mxu0  ;;  %v2536_v24 = vld [vmem:[%s10436_s4 + $0x28] sm:$0xff]  ;;  %v2543_v16 = vld [vmem:[%s10436_s4 + $0x60] sm:$0xff] }
 0x29f   : > { %7880 = vrot.lane.b32.xlu0 %v7879_v22, %s8301_s18  ;;  %v7899_v25 = vpack.i.bf16 %v1516_v60, %v1513_v54  ;;  %v2538_v54 = vld [vmem:[%s10436_s4 + $0x38] sm:$0xff]  ;;  %v2545_v60 = vld [vmem:[%s10436_s4 + $0x70] sm:$0xff] }
 0x2a0   : > { %7885 = vrot.lane.b32.xlu1 %v7884_v28, %s8301_s18 }
 0x2a3   : > { %v7214_v63 = vpop.f32.mrb[28].mxu0 }
 0x2a4   : > { %v1529_v56 = vpop.f32.mrb[29].mxu0 }
 0x2a5   : > { %v7215_v46 = vpop.f32.mrb[30].mxu0 }
 0x2a6   : > { %v7944_v48 = vpack.i.bf16 %v7215_v46, %v7214_v63  ;;  %v1532_v50 = vpop.f32.mrb[31].mxu0  ;;  %v2544_v63 = vld [vmem:[%s10436_s4 + $0x68] sm:$0xff] }
 0x2a7   : > { %v7939_v52 = vpack.i.bf16 %v1532_v50, %v1529_v56  ;;  %v2546_v56 = vld [vmem:[%s10436_s4 + $0x78] sm:$0xff] }
 0x2f9   : > { %v7330_v55 = vpop.f32.mrb[16].mxu1 }
 0x2fa   : > { %v2193_v58 = vpop.f32.mrb[17].mxu1 }
 0x2fb   : > { %v7331_v61 = vpop.f32.mrb[18].mxu1 }
 0x2fc   : > { %v7889_v62 = vpack.i.bf16 %v7331_v61, %v7330_v55  ;;  %v2196_v2 = vpop.f32.mrb[19].mxu1 }
 0x2fd   : > { %v7894_v3 = vpack.i.bf16 %v2196_v2, %v2193_v58 }
 0x2fe   : > { %7890 = vrot.lane.b32.xlu0 %v7889_v62, %s8302_s25 }
 0x2ff   : > { %7895 = vrot.lane.b32.xlu1 %v7894_v3, %s8302_s25 }
 0x301   : > { %v7334_v6 = vpop.f32.mrb[20].mxu1  ;;  %v7841_v46 = vpop.permute.xlu0 %7840 }
 0x302   : > { %v2209_v9 = vpop.f32.mrb[21].mxu1  ;;  %7905 = vrot.lane.b32.xlu0 %v7904_v17, %s8300_s16  ;;  %v2540_v17 = vld [vmem:[%s10436_s4 + $0x48] sm:$0xff] }
 0x303   : > { %v7335_v13 = vpop.f32.mrb[22].mxu1  ;;  %7900 = vrot.lane.b32.xlu1 %v7899_v25, %s8300_s16  ;;  %v2542_v25 = vld [vmem:[%s10436_s4 + $0x58] sm:$0xff] }
 0x304   : > { %v7909_v15 = vpack.i.bf16 %v7335_v13, %v7334_v6  ;;  %v2212_v22 = vpop.f32.mrb[23].mxu1  ;;  %v7842_v6 = vunpack.i.l.bf16 %v7841_v46 }
 0x305   : > { %v7914_v23 = vpack.i.bf16 %v2212_v22, %v2209_v9  ;;  %v7851_v50 = vpop.permute.xlu0 %7850 }
 0x306   : > { %7910 = vrot.lane.b32.xlu0 %v7909_v15, %s8302_s25  ;;  %v7852_v62 = vunpack.i.l.bf16 %v7851_v50  ;;  %v7853_v2 = vunpack.i.h.bf16 %v7851_v50  ;;  %v7843_v15 = vunpack.i.h.bf16 %v7841_v46 }
 0x307   : > { %7915 = vrot.lane.b32.xlu1 %v7914_v23, %s8302_s25 }
 0x308   : > { %v2467_v23 = vsel %vm2464_vm4, %v9134_v38, %v7852_v62 }
 0x309   : > { %v7338_v26 = vpop.f32.mrb[24].mxu1  ;;  %v7861_v53 = vpop.permute.xlu0 %7860 }
 0x30a   : > { %v2225_v28 = vpop.f32.mrb[25].mxu1  ;;  %7925 = vrot.lane.b32.xlu0 %v7924_v42, %s8301_s18 }
 0x30b   : > { %v7339_v21 = vpop.f32.mrb[26].mxu1  ;;  %7920 = vrot.lane.b32.xlu1 %v7919_v45, %s8301_s18  ;;  %v2531_v45 = vld [vmem:[%s10436_s4] sm:$0xff] }
 0x30c   : > { %v7929_v29 = vpack.i.bf16 %v7339_v21, %v7338_v26  ;;  %v2228_v27 = vpop.f32.mrb[27].mxu1 }
 0x30d   : > { %v7934_v30 = vpack.i.bf16 %v2228_v27, %v2225_v28  ;;  %v7871_v58 = vpop.permute.xlu0 %7870  ;;  %v2468_v28 = vsel %vm2464_vm4, %v9147_v37, %v7853_v2 }
 0x30e   : > { %7930 = vrot.lane.b32.xlu0 %v7929_v29, %s8302_s25  ;;  %v2485_v38 = vsel %vm2481_vm5, %v2468_v28, %v7843_v15  ;;  %v7873_v37 = vunpack.i.h.bf16 %v7871_v58 }
 0x30f   : > { %7935 = vrot.lane.b32.xlu1 %v7934_v30, %s8302_s25  ;;  %v2484_v30 = vsel %vm2481_vm5, %v2467_v23, %v7842_v6 }
 0x311   : > { %v7342_v31 = vpop.f32.mrb[28].mxu1  ;;  %v9335_v13 = vpop.permute.xlu0 %7880 }
 0x312   : > { %v2241_v32 = vpop.f32.mrb[29].mxu1  ;;  %7945 = vrot.lane.b32.xlu0 %v7944_v48, %s8300_s16  ;;  %v7846_v48 = vpop.permute.xlu1 %7845  ;;  %v7882_v62 = vunpack.i.l.bf16 %v9335_v13 }
 0x313   : > { %v7343_v33 = vpop.f32.mrb[30].mxu1  ;;  %7940 = vrot.lane.b32.xlu1 %v7939_v52, %s8300_s16  ;;  %v7847_v22 = vunpack.i.l.bf16 %v7846_v48  ;;  %v7848_v29 = vunpack.i.h.bf16 %v7846_v48 }
 0x314   : > { %v7954_v34 = vpack.i.bf16 %v7343_v33, %v7342_v31  ;;  %v2244_v43 = vpop.f32.mrb[31].mxu1 }
 0x315   : > { %v7949_v42 = vpack.i.bf16 %v2244_v43, %v2241_v32 }
 0x316   : > { %7955 = vrot.lane.b32.xlu0 %v7954_v34, %s8302_s25  ;;  %v7856_v52 = vpop.permute.xlu1 %7855 }
 0x317   : > { %7950 = vrot.lane.b32.xlu1 %v7949_v42, %s8302_s25  ;;  %v7857_v3 = vunpack.i.l.bf16 %v7856_v52  ;;  %v7858_v9 = vunpack.i.h.bf16 %v7856_v52  ;;  %v7872_v42 = vunpack.i.l.bf16 %v7871_v58 }
 0x319   : > { %v2465_v21 = vsel %vm2464_vm4, %v9139_v51, %v7857_v3  ;;  %v2466_v27 = vsel %vm2464_vm4, %v9149_v40, %v7858_v9 }
 0x31a   : > { %2554 = vperm.xlu0 %7960, %v2532_v44   ;;  %v9333_v55 = vpop.permute.xlu1 %7865  ;;  %v2482_v34 = vsel %vm2481_vm5, %v2465_v21, %v7847_v22 }
 0x31b   : > { %2549 = vperm.xlu1 %7959, %v2531_v45   ;;  %v7867_v46 = vunpack.i.l.bf16 %v9333_v55 }
 0x31e   : > { %2569 = vperm.xlu0 %7960, %v2535_v35   ;;  %v7876_v61 = vpop.permute.xlu1 %7875 }
 0x31f   : > { %2559 = vperm.xlu1 %7959, %v2533_v36   ;;  %v7878_v45 = vunpack.i.h.bf16 %v7876_v61  ;;  %v2483_v36 = vsel %vm2481_vm5, %v2466_v27, %v7848_v29 }
 0x321   : > { %v2470_v48 = vsel %vm2464_vm4, %v9161_v59, %v7878_v45 }
 0x322   : > { %2579 = vperm.xlu0 %7960, %v2537_v47   ;;  %v9339_v26 = vpop.permute.xlu1 %7885  ;;  %v7877_v47 = vunpack.i.l.bf16 %v7876_v61 }
 0x323   : > { %2564 = vperm.xlu1 %7959, %v2534_v39   ;;  %v7888_v15 = vunpack.i.h.bf16 %v9339_v26 }
 0x324   : > { %v2469_v50 = vsel %vm2464_vm4, %v9155_v57, %v7877_v47 }
 0x325   : > { %v2486_v6 = vsel %vm2481_vm5, %v2469_v50, %v7867_v46 }
 0x326   : > { %2589 = vperm.xlu0 %7960, %v2539_v18  }
 0x327   : > { %2574 = vperm.xlu1 %7959, %v2536_v24  }
 0x32a   : > { %2599 = vperm.xlu0 %7960, %v2541_v49  }
 0x32b   : > { %2584 = vperm.xlu1 %7959, %v2538_v54   ;;  %v7863_v54 = vunpack.i.h.bf16 %v7861_v53 }
 0x32e   : > { %2609 = vperm.xlu0 %7960, %v2543_v16   ;;  %v7862_v16 = vunpack.i.l.bf16 %v7861_v53 }
 0x32f   : > { %2594 = vperm.xlu1 %7959, %v2540_v17  }
 0x332   : > { %2619 = vperm.xlu0 %7960, %v2545_v60  }
 0x333   : > { %2604 = vperm.xlu1 %7959, %v2542_v25   ;;  %v2472_v25 = vsel %vm2464_vm4, %v9159_v11, %v7873_v37 }
 0x334   : > { %v2489_v53 = vsel %vm2481_vm5, %v2472_v25, %v7863_v54 }
 0x337   : > { %2614 = vperm.xlu1 %7959, %v2544_v63   ;;  %v2471_v63 = vsel %vm2464_vm4, %v9151_v41, %v7872_v42 }
 0x338   : > { %v2488_v11 = vsel %vm2481_vm5, %v2471_v63, %v7862_v16 }
 0x33b   : > { %2624 = vperm.xlu1 %7959, %v2546_v56   ;;  %v7868_v56 = vunpack.i.h.bf16 %v9333_v55  ;;  %v7883_v55 = vunpack.i.h.bf16 %v9335_v13  ;;  %v7887_v13 = vunpack.i.l.bf16 %v9339_v26 }
 0x33d   : > { %v2487_v9 = vsel %vm2481_vm5, %v2470_v48, %v7868_v56  ;;  %v2473_v26 = vsel %vm2464_vm4, %v9174_v4, %v7887_v13 }
 0x370   : > { %v7891_v31 = vpop.permute.xlu0 %7890 }
 0x371   : > { %v7893_v32 = vunpack.i.h.bf16 %v7891_v31  ;;  %v7892_v33 = vunpack.i.l.bf16 %v7891_v31  ;;  %v7896_v43 = vpop.permute.xlu1 %7895 }
 0x372   : > { %v7898_v44 = vunpack.i.h.bf16 %v7896_v43  ;;  %v7897_v51 = vunpack.i.l.bf16 %v7896_v43  ;;  %v2474_v43 = vsel %vm2464_vm4, %v9178_v8, %v7888_v15 }
 0x373   : > { %v2502_v35 = vsel %vm2498_vm6, %v2485_v38, %v7893_v32  ;;  %v2501_v40 = vsel %vm2498_vm6, %v2484_v30, %v7892_v33  ;;  %v2476_v33 = vsel %vm2464_vm4, %v9176_v7, %v7883_v55 }
 0x374   : > { %v2516_v39 = vpack.c.bf16 %v2502_v35, %v2501_v40  ;;  %v2500_v18 = vsel %vm2498_vm6, %v2483_v36, %v7898_v44  ;;  %v2499_v24 = vsel %vm2498_vm6, %v2482_v34, %v7897_v51  ;;  %v7906_v49 = vpop.permute.xlu0 %7905  ;;  %v2475_v34 = vsel %vm2464_vm4, %v9167_v0, %v7882_v62 }
 0x375   : > { %v7901_v17 = vpop.permute.xlu1 %7900  ;;  %v2515_v60 = vpack.c.bf16 %v2500_v18, %v2499_v24  ;;  %v7908_v29 = vunpack.i.h.bf16 %v7906_v49  ;;  %v7907_v31 = vunpack.i.l.bf16 %v7906_v49 }
 0x376   : > { %v7903_v38 = vunpack.i.h.bf16 %v7901_v17  ;;  %v7902_v32 = vunpack.i.l.bf16 %v7901_v17 }
 0x377   : > { %7352 = vmatprep.mubr.msk.bf16.mxu0 %vm2651_vm7, %v2515_v60  ;;  %v2493_v42 = vsel %vm2481_vm5, %v2476_v33, %v7908_v29  ;;  %v2492_v35 = vsel %vm2481_vm5, %v2475_v34, %v7907_v31 }
 0x378   : > { %7353 = vmatmul.mubr.msk.bf16.vlgmr.msra.gmra.mrb[32].mxu0 %vm2651_vm7, %v2516_v39  ;;  %v7911_v52 = vpop.permute.xlu0 %7910  ;;  %v2491_v7 = vsel %vm2481_vm5, %v2474_v43, %v7903_v38  ;;  %v2490_v36 = vsel %vm2481_vm5, %v2473_v26, %v7902_v32 }
 0x379   : > { %v7913_v41 = vunpack.i.h.bf16 %v7911_v52  ;;  %v7912_v58 = vunpack.i.l.bf16 %v7911_v52  ;;  %v7916_v61 = vpop.permute.xlu1 %7915 }
 0x37a   : > { %v7918_v2 = vunpack.i.h.bf16 %v7916_v61  ;;  %v7917_v3 = vunpack.i.l.bf16 %v7916_v61 }
 0x37b   : > { %v2506_v59 = vsel %vm2498_vm6, %v2489_v53, %v7913_v41  ;;  %v2505_v57 = vsel %vm2498_vm6, %v2488_v11, %v7912_v58 }
 0x37c   : > { %v2504_v22 = vsel %vm2498_vm6, %v2487_v9, %v7918_v2  ;;  %v2503_v23 = vsel %vm2498_vm6, %v2486_v6, %v7917_v3  ;;  %v7926_v28 = vpop.permute.xlu0 %7925  ;;  %v2518_v21 = vpack.c.bf16 %v2506_v59, %v2505_v57 }
 0x37d   : > { %v7921_v27 = vpop.permute.xlu1 %7920  ;;  %v2517_v30 = vpack.c.bf16 %v2504_v22, %v2503_v23  ;;  %v7928_v8 = vunpack.i.h.bf16 %v7926_v28  ;;  %v7927_v18 = vunpack.i.l.bf16 %v7926_v28 }
 0x37e   : > { %v7923_v16 = vunpack.i.h.bf16 %v7921_v27  ;;  %v7922_v17 = vunpack.i.l.bf16 %v7921_v27  ;;  %v8077_v27 = vld [vmem:[#allocation3 + $0x80] sm:$0xff]  }
 0x37f   : > { %7356 = vmatprep.mubr.msk.bf16.mxu0 %vm2651_vm7, %v2517_v30  ;;  %v2480_v50 = vsel %vm2464_vm4, %v9186_v19, %v7928_v8  ;;  %v2479_v52 = vsel %vm2464_vm4, %v9181_v10, %v7927_v18 }
 0x380   : > { %v7931_v37 = vpop.permute.xlu0 %7930  ;;  %7357 = vmatmul.mubr.msk.bf16.gmra.mrb[36].mxu0 %vm2651_vm7, %v2518_v21  ;;  %v2478_v53 = vsel %vm2464_vm4, %v9188_v20, %v7923_v16  ;;  %v2477_v41 = vsel %vm2464_vm4, %v9184_v5, %v7922_v17 }
 0x381   : > { %v7933_v44 = vunpack.i.h.bf16 %v7931_v37  ;;  %v7932_v51 = vunpack.i.l.bf16 %v7931_v37  ;;  %v7936_v45 = vpop.permute.xlu1 %7935 }
 0x382   : > { %v7938_v40 = vunpack.i.h.bf16 %v7936_v45  ;;  %v7937_v0 = vunpack.i.l.bf16 %v7936_v45 }
 0x383   : > { %v2509_v47 = vsel %vm2498_vm6, %v2492_v35, %v7932_v51  ;;  %v2510_v39 = vsel %vm2498_vm6, %v2493_v42, %v7933_v44 }
 0x384   : > { %v2507_v4 = vsel %vm2498_vm6, %v2490_v36, %v7937_v0  ;;  %v2508_v24 = vsel %vm2498_vm6, %v2491_v7, %v7938_v40  ;;  %v7946_v49 = vpop.permute.xlu0 %7945  ;;  %v2520_v54 = vpack.c.bf16 %v2510_v39, %v2509_v47 }
 0x385   : > { %v7941_v60 = vpop.permute.xlu1 %7940  ;;  %v2519_v25 = vpack.c.bf16 %v2508_v24, %v2507_v4  ;;  %v7948_v63 = vunpack.i.h.bf16 %v7946_v49  ;;  %v7947_v56 = vunpack.i.l.bf16 %v7946_v49 }
 0x386   : > { %v7943_v46 = vunpack.i.h.bf16 %v7941_v60  ;;  %v7942_v48 = vunpack.i.l.bf16 %v7941_v60 }
 0x387   : > { %7360 = vmatprep.mubr.msk.bf16.mxu0 %vm2651_vm7, %v2519_v25  ;;  %v2497_v62 = vsel %vm2481_vm5, %v2480_v50, %v7948_v63  ;;  %v2496_v2 = vsel %vm2481_vm5, %v2479_v52, %v7947_v56 }
 0x388   : > { %7361 = vmatmul.mubr.msk.bf16.gmra.mrb[40].mxu0 %vm2651_vm7, %v2520_v54  ;;  %v7956_v11 = vpop.permute.xlu0 %7955  ;;  %v2495_v10 = vsel %vm2481_vm5, %v2478_v53, %v7943_v46  ;;  %v2494_v59 = vsel %vm2481_vm5, %v2477_v41, %v7942_v48 }
 0x389   : > { %v7958_v58 = vunpack.i.h.bf16 %v7956_v11  ;;  %v7957_v61 = vunpack.i.l.bf16 %v7956_v11  ;;  %v7951_v55 = vpop.permute.xlu1 %7950 }
 0x38a   : > { %v7953_v19 = vunpack.i.h.bf16 %v7951_v55  ;;  %v7952_v3 = vunpack.i.l.bf16 %v7951_v55 }
 0x38b   : > { %v2513_v57 = vsel %vm2498_vm6, %v2496_v2, %v7957_v61  ;;  %v2514_v20 = vsel %vm2498_vm6, %v2497_v62, %v7958_v58 }
 0x38c   : > { %v2511_v6 = vsel %vm2498_vm6, %v2494_v59, %v7952_v3  ;;  %v2512_v5 = vsel %vm2498_vm6, %v2495_v10, %v7953_v19  ;;  %v2522_v9 = vpack.c.bf16 %v2514_v20, %v2513_v57 }
 0x38d   : > { %v2521_v15 = vpack.c.bf16 %v2512_v5, %v2511_v6 }
 0x38f   : > { %7364 = vmatprep.mubr.msk.bf16.mxu0 %vm2651_vm7, %v2521_v15 }
 0x390   : > { %7365 = vmatmul.mubr.msk.bf16.gmra.mrb[44].mxu0 %vm2651_vm7, %v2522_v9 }
 0x391   : > { %7384 = vmatprep.mubr.bf16.mxu0 %v8077_v27 }
 0x399   : > { %v2555_v28 = vpop.permute.xlu0 %2554 }
 0x39a   : > { %v2550_v22 = vpop.permute.xlu1 %2549 }
 0x39d   : > { %v2570_v13 = vpop.permute.xlu0 %2569 }
 0x39e   : > { %v2560_v23 = vpop.permute.xlu1 %2559 }
 0x3a1   : > { %v2580_v30 = vpop.permute.xlu0 %2579 }
 0x3a2   : > { %v2565_v21 = vpop.permute.xlu1 %2564 }
 0x3a5   : > { %v2590_v45 = vpop.permute.xlu0 %2589 }
 0x3a6   : > { %v2575_v29 = vpop.permute.xlu1 %2574 }
 0x3a9   : > { %v2600_v54 = vpop.permute.xlu0 %2599 }
 0x3aa   : > { %v2585_v33 = vpop.permute.xlu1 %2584 }
 0x3ad   : > { %v2610_v53 = vpop.permute.xlu0 %2609 }
 0x3ae   : > { %v2595_v0 = vpop.permute.xlu1 %2594 }
 0x3b1   : > { %v2620_v20 = vpop.permute.xlu0 %2619 }
 0x3b2   : > { %v2605_v25 = vpop.permute.xlu1 %2604 }
 0x3b6   : > { %v2615_v62 = vpop.permute.xlu1 %2614 }
 0x44b   : > { %v7354_v31 = vpop.f32.mrb[32].mxu0 }
 0x44c   : > { %v2719_v38 = vadd.f32 %v7354_v31, %v2560_v23  ;;  %v2710_v32 = vpop.f32.mrb[33].mxu0 }
 0x44d   : > { %v2711_v34 = vadd.f32 %v2710_v32, %v2550_v22  ;;  %v7355_v43 = vpop.f32.mrb[34].mxu0  ;;  %v2625_v22 = vpop.permute.xlu1 %2624 }
 0x44e   : > { %v2722_v37 = vadd.f32 %v7355_v43, %v2565_v21  ;;  %v2713_v26 = vpop.f32.mrb[35].mxu0  ;;  %v2775_v44 = vmax.f32 %v2719_v38, 0.0  ;;  %v8079_v43 = vld [vmem:[#allocation3 + $0x90] sm:$0xff]  }
 0x44f   : > { %v2714_v42 = vadd.f32 %v2713_v26, %v2555_v28  ;;  %v2773_v35 = vmax.f32 %v2711_v34, 0.0  ;;  %v8078_v34 = vld [vmem:[#allocation3 + $0x88] sm:$0xff]   ;;  %v8081_v26 = vld [vmem:[#allocation3 + $0xa0] sm:$0xff]  }
 0x450   : > { %v2776_v51 = vmax.f32 %v2722_v37, 0.0  ;;  %v8080_v37 = vld [vmem:[#allocation3 + $0x98] sm:$0xff]  }
 0x451   : > { %v2774_v7 = vmax.f32 %v2714_v42, 0.0  ;;  %v8085_v42 = vld [vmem:[#allocation3 + $0xe0] sm:$0xff]  }
 0x452   : > { %v9417_v40 = vpack.c.bf16 %v2776_v51, %v2775_v44  ;;  %7456 = vmatprep.mubr.bf16.mxu1 %v8085_v42  ;;  %v2966_v44 = vand.u32 7, %v8792_v12  ;;  %v8107_v42 = vld [vmem:[#allocation3 + $0xf0] sm:$0xff]  }
 0x453   : > { %v9419_v36 = vpack.c.bf16 %v2774_v7, %v2773_v35  ;;  %v7358_v8 = vpop.f32.mrb[36].mxu0 }
 0x454   : > { %v2735_v47 = vadd.f32 %v7358_v8, %v2580_v30  ;;  %2923 = vrot.lane.b32.xlu1 %v9417_v40, %s8296_s12  ;;  %v2726_v39 = vpop.f32.mrb[37].mxu0  ;;  %vm2974_vm8 = vcmp.ne.s32.totalorder %v2966_v44, 7  ;;  %v8108_v44 = vld [vmem:[#allocation3 + $0xf8] sm:$0xff]  }
 0x455   : > { %v2727_v18 = vadd.f32 %v2726_v39, %v2570_v13  ;;  %v7359_v4 = vpop.f32.mrb[38].mxu0  ;;  %2921 = vrot.lane.b32.xlu0 %v9419_v36, %s8296_s12  ;;  %7368 = vmatprep.subr.bf16.mxu0 %v9419_v36  ;;  %v6632_v51 = vsel %vm2974_vm8, 1.0, %v8299_v14 }
 0x456   : > { %v2738_v24 = vadd.f32 %v7359_v4, %v2585_v33  ;;  %v2729_v49 = vpop.f32.mrb[39].mxu0  ;;  %7369 = vmatpush3.bf16.msra.mxu0 %v9419_v36  ;;  %v2779_v17 = vmax.f32 %v2735_v47, 0.0 }
 0x457   : > { %v2730_v16 = vadd.f32 %v2729_v49, %v2575_v29  ;;  %7370 = vmatprep.subr.bf16.mxu0 %v9417_v40  ;;  %v2777_v63 = vmax.f32 %v2727_v18, 0.0 }
 0x458   : > { %v2780_v60 = vmax.f32 %v2738_v24, 0.0 }
 0x459   : > { %v2778_v56 = vmax.f32 %v2730_v16, 0.0 }
 0x45a   : > { %v9428_v46 = vpack.c.bf16 %v2780_v60, %v2779_v17  ;;  %7371 = vmatpush3.bf16.msra.mxu0 %v9417_v40 }
 0x45b   : > { %v9431_v48 = vpack.c.bf16 %v2778_v56, %v2777_v63  ;;  %v7362_v50 = vpop.f32.mrb[40].mxu0 }
 0x45c   : > { %v2751_v52 = vadd.f32 %v7362_v50, %v2600_v54  ;;  %2927 = vrot.lane.b32.xlu1 %v9428_v46, %s8296_s12  ;;  %v2742_v11 = vpop.f32.mrb[41].mxu0 }
 0x45d   : > { %v2743_v41 = vadd.f32 %v2742_v11, %v2590_v45  ;;  %v7363_v58 = vpop.f32.mrb[42].mxu0  ;;  %2925 = vrot.lane.b32.xlu0 %v9431_v48, %s8296_s12  ;;  %7372 = vmatprep.subr.bf16.mxu0 %v9431_v48  ;;  %v9483_v45 = vpack.c.bf16 %v6632_v51, %v6632_v51  ;;  %v8092_v51 = vld [vmem:[#allocation3 + $0x48] sm:$0xff]  }
 0x45e   : > { %v2754_v61 = vadd.f32 %v7363_v58, %v2605_v25  ;;  %v2745_v55 = vpop.f32.mrb[43].mxu0  ;;  %7373 = vmatpush3.bf16.msra.mxu0 %v9431_v48  ;;  %v2783_v19 = vmax.f32 %v2751_v52, 0.0 }
 0x45f   : > { %v2746_v2 = vadd.f32 %v2745_v55, %v2595_v0  ;;  %7374 = vmatprep.subr.bf16.mxu0 %v9428_v46  ;;  %v2781_v10 = vmax.f32 %v2743_v41, 0.0 }
 0x460   : > { %v2784_v3 = vmax.f32 %v2754_v61, 0.0 }
 0x461   : > { %v2782_v59 = vmax.f32 %v2746_v2, 0.0 }
 0x462   : > { %v9440_v57 = vpack.c.bf16 %v2784_v3, %v2783_v19  ;;  %7375 = vmatpush3.bf16.msra.mxu0 %v9428_v46  ;;  %v8082_v19 = vld [vmem:[#allocation3 + $0xa8] sm:$0xff]  }
 0x463   : > { %v9443_v6 = vpack.c.bf16 %v2782_v59, %v2781_v10  ;;  %v7366_v5 = vpop.f32.mrb[44].mxu0  ;;  %v8083_v10 = vld [vmem:[#allocation3 + $0xb0] sm:$0xff]  }
 0x464   : > { %v2767_v9 = vadd.f32 %v7366_v5, %v2620_v20  ;;  %2931 = vrot.lane.b32.xlu1 %v9440_v57, %s8296_s12  ;;  %v2758_v15 = vpop.f32.mrb[45].mxu0 }
 0x465   : > { %v2759_v23 = vadd.f32 %v2758_v15, %v2610_v53  ;;  %v7367_v28 = vpop.f32.mrb[46].mxu0  ;;  %2929 = vrot.lane.b32.xlu0 %v9443_v6, %s8296_s12  ;;  %7376 = vmatprep.subr.bf16.mxu0 %v9443_v6 }
 0x466   : > { %v2770_v21 = vadd.f32 %v7367_v28, %v2625_v22  ;;  %v2761_v13 = vpop.f32.mrb[47].mxu0  ;;  %7377 = vmatpush3.bf16.msra.mxu0 %v9443_v6  ;;  %v2787_v27 = vmax.f32 %v2767_v9, 0.0  ;;  %v8084_v9 = vld [vmem:[#allocation3 + $0xb8] sm:$0xff]   ;;  %v8087_v22 = vld [vmem:[#allocation3 + $0x60] sm:$0xff]  }
 0x467   : > { %v2762_v29 = vadd.f32 %v2761_v13, %v2615_v62  ;;  %7378 = vmatprep.subr.bf16.mxu0 %v9440_v57  ;;  %v2785_v31 = vmax.f32 %v2759_v23, 0.0 }
 0x468   : > { %v2788_v30 = vmax.f32 %v2770_v21, 0.0 }
 0x469   : > { %v2786_v38 = vmax.f32 %v2762_v29, 0.0 }
 0x46a   : > { %v9452_v32 = vpack.c.bf16 %v2788_v30, %v2787_v27  ;;  %7379 = vmatpush3.bf16.msra.mxu0 %v9440_v57 }
 0x46b   : > { %v9455_v33 = vpack.c.bf16 %v2786_v38, %v2785_v31  ;;  %v8086_v38 = vld [vmem:[#allocation3 + $0xe8] sm:$0xff]  }
 0x46c   : > { %2935 = vrot.lane.b32.xlu1 %v9452_v32, %s8296_s12 }
 0x46d   : > { %2933 = vrot.lane.b32.xlu0 %v9455_v33, %s8296_s12  ;;  %7380 = vmatprep.subr.bf16.mxu0 %v9455_v33 }
 0x46e   : > { %7381 = vmatpush3.bf16.msra.mxu0 %v9455_v33 }
 0x46f   : > { %7382 = vmatprep.subr.bf16.mxu0 %v9452_v32 }
 0x470   : > { %3184 = vrot.lane.b32.xlu1 %v9417_v40, %s8303_s29 }
 0x471   : > { %3182 = vrot.lane.b32.xlu0 %v9419_v36, %s8303_s29 }
 0x472   : > { %7383 = vmatpush3.bf16.msra.mxu0 %v9452_v32 }
 0x474   : > { %3188 = vrot.lane.b32.xlu1 %v9428_v46, %s8303_s29 }
 0x475   : > { %3186 = vrot.lane.b32.xlu0 %v9431_v48, %s8303_s29  ;;  %7385 = vmatmul.mubr.bf16.vlgmr.msra.gmra.mrb[48].mxu0 %v8078_v34  ;;  %v8088_v34 = vld [vmem:[#allocation3 + $0x68] sm:$0xff]  }
 0x476   : > { %7388 = vmatprep.mubr.bf16.mxu0 %v8079_v43  ;;  %v8089_v43 = vld [vmem:[#allocation3 + $0x70] sm:$0xff]  }
 0x478   : > { %3192 = vrot.lane.b32.xlu1 %v9440_v57, %s8303_s29 }
 0x479   : > { %3190 = vrot.lane.b32.xlu0 %v9443_v6, %s8303_s29 }
 0x47c   : > { %3196 = vrot.lane.b32.xlu1 %v9452_v32, %s8303_s29 }
 0x47d   : > { %3194 = vrot.lane.b32.xlu0 %v9455_v33, %s8303_s29  ;;  %7389 = vmatmul.mubr.bf16.gmra.mrb[52].mxu0 %v8080_v37  ;;  %v8090_v37 = vld [vmem:[#allocation3 + $0x78] sm:$0xff]   ;;  %s8309_s29 = smov 17  }
 0x47e   : > { %7408 = vmatprep.mubr.bf16.mxu0 %v8081_v26  ;;  %v8091_v26 = vld [vmem:[#allocation3 + $0x40] sm:$0xff]  }
 0x480   : > { %3713 = vrot.lane.b32.xlu1 %v9417_v40, %s8304_s15 }
 0x481   : > { %3711 = vrot.lane.b32.xlu0 %v9419_v36, %s8304_s15 }
 0x484   : > { %3717 = vrot.lane.b32.xlu1 %v9428_v46, %s8304_s15 }
 0x485   : > { %3715 = vrot.lane.b32.xlu0 %v9431_v48, %s8304_s15 }
 0x488   : > { %3721 = vrot.lane.b32.xlu1 %v9440_v57, %s8304_s15 }
 0x489   : > { %3719 = vrot.lane.b32.xlu0 %v9443_v6, %s8304_s15 }
 0x48c   : > { %3725 = vrot.lane.b32.xlu1 %v9452_v32, %s8304_s15 }
 0x48d   : > { %3723 = vrot.lane.b32.xlu0 %v9455_v33, %s8304_s15  ;;  %s8310_s15 = smov 1  }
 0x4c6   : > { %v2924_v35 = vpop.permute.xlu1 %2923 }
 0x4c7   : > { %v2922_v7 = vpop.permute.xlu0 %2921  ;;  %v2942_v0 = vsel %vm2937_vm9, %v2924_v35, 0  ;;  %v8093_v35 = vld [vmem:[#allocation3 + $0x50] sm:$0xff]  }
 0x4c8   : > { %v2939_v8 = vsel %vm2937_vm9, %v2922_v7, 0  ;;  %v9491_v39 = vmul.bf16 %v9483_v45, %v2942_v0  ;;  %v8094_v7 = vld [vmem:[#allocation3 + $0x58] sm:$0xff]   ;;  %v8095_v0 = vld [vmem:[#allocation3] sm:$0xff]  }
 0x4c9   : > { %v9488_v47 = vmul.bf16 %v9483_v45, %v2939_v8 }
 0x4cb   : > { %7392 = vmatprep.subr.bf16.mxu0 %v9488_v47 }
 0x4cc   : > { %7393 = vmatpush3.bf16.msra.mxu0 %v9488_v47 }
 0x4cd   : > { %7394 = vmatprep.subr.bf16.mxu0 %v9491_v39 }
 0x4ce   : > { %v2928_v18 = vpop.permute.xlu1 %2927 }
 0x4cf   : > { %v2926_v4 = vpop.permute.xlu0 %2925  ;;  %v2948_v24 = vsel %vm2937_vm9, %v2928_v18, 0 }
 0x4d0   : > { %v2945_v49 = vsel %vm2937_vm9, %v2926_v4, 0  ;;  %7395 = vmatpush3.bf16.msra.mxu0 %v9491_v39  ;;  %v9503_v16 = vmul.bf16 %v9483_v45, %v2948_v24  ;;  %v8109_v4 = vld [vmem:[#allocation3 + $0x20] sm:$0xff]  }
 0x4d1   : > { %v9500_v54 = vmul.bf16 %v9483_v45, %v2945_v49  ;;  %v8110_v49 = vld [vmem:[#allocation3 + $0x28] sm:$0xff]  }
 0x4d3   : > { %7396 = vmatprep.subr.bf16.mxu0 %v9500_v54 }
 0x4d4   : > { %7397 = vmatpush3.bf16.msra.mxu0 %v9500_v54 }
 0x4d5   : > { %7398 = vmatprep.subr.bf16.mxu0 %v9503_v16 }
 0x4d6   : > { %v2932_v17 = vpop.permute.xlu1 %2931 }
 0x4d7   : > { %v2930_v60 = vpop.permute.xlu0 %2929  ;;  %v2954_v25 = vsel %vm2937_vm9, %v2932_v17, 0 }
 0x4d8   : > { %v2951_v63 = vsel %vm2937_vm9, %v2930_v60, 0  ;;  %7399 = vmatpush3.bf16.msra.mxu0 %v9503_v16  ;;  %v9515_v50 = vmul.bf16 %v9483_v45, %v2954_v25  ;;  %v8100_v60 = vld [vmem:[#allocation3 + $0xc8] sm:$0xff]  }
 0x4d9   : > { %v9512_v56 = vmul.bf16 %v9483_v45, %v2951_v63  ;;  %v8101_v63 = vld [vmem:[#allocation3 + $0xd0] sm:$0xff]  }
 0x4db   : > { %7400 = vmatprep.subr.bf16.mxu0 %v9512_v56 }
 0x4dc   : > { %7401 = vmatpush3.bf16.msra.mxu0 %v9512_v56 }
 0x4dd   : > { %7402 = vmatprep.subr.bf16.mxu0 %v9515_v50 }
 0x4de   : > { %v2936_v52 = vpop.permute.xlu1 %2935 }
 0x4df   : > { %v2934_v11 = vpop.permute.xlu0 %2933  ;;  %v2960_v53 = vsel %vm2937_vm9, %v2936_v52, 0 }
 0x4e0   : > { %v2957_v41 = vsel %vm2937_vm9, %v2934_v11, 0  ;;  %7403 = vmatpush3.bf16.msra.mxu0 %v9515_v50  ;;  %v9527_v61 = vmul.bf16 %v9483_v45, %v2960_v53 }
 0x4e1   : > { %v9524_v58 = vmul.bf16 %v9483_v45, %v2957_v41  ;;  %v8102_v41 = vld [vmem:[#allocation3 + $0xd8] sm:$0xff]  }
 0x4e2   : > { %v9539_v2 = vpop.permute.xlu1 %3184 }
 0x4e3   : > { %v9529_v55 = vpop.permute.xlu0 %3182  ;;  %7404 = vmatprep.subr.bf16.mxu0 %v9524_v58  ;;  %v9548_v3 = vsel %vm3198_vm10, %v9539_v2, 0 }
 0x4e4   : > { %7405 = vmatpush3.bf16.msra.mxu0 %v9524_v58  ;;  %7760 = vmatprep.subr.msk.bf16.mxu1 %vm3198_vm10, %v9529_v55  ;;  %v9537_v62 = vsel %vm3198_vm10, %v9529_v55, 0 }
 0x4e5   : > { %7406 = vmatprep.subr.bf16.mxu0 %v9527_v61  ;;  %7441 = vmatpush3.bf16.msra.mxu1 %v9537_v62 }
 0x4e6   : > { %7761 = vmatprep.subr.msk.bf16.mxu1 %vm3198_vm10, %v9539_v2  ;;  %v9561_v5 = vpop.permute.xlu1 %3188 }
 0x4e7   : > { %v9550_v59 = vpop.permute.xlu0 %3186  ;;  %v9570_v15 = vsel %vm3198_vm10, %v9561_v5, 0 }
 0x4e8   : > { %7407 = vmatpush3.bf16.msra.mxu0 %v9527_v61  ;;  %v9559_v20 = vsel %vm3198_vm10, %v9550_v59, 0 }
 0x4e9   : > { %7416 = vmatprep.subr.bf16.mxu0 %v9419_v36  ;;  %7443 = vmatpush3.bf16.msra.mxu1 %v9548_v3 }
 0x4ea   : > { %7762 = vmatprep.subr.msk.bf16.mxu1 %vm3198_vm10, %v9550_v59  ;;  %v9583_v21 = vpop.permute.xlu1 %3192 }
 0x4eb   : > { %7409 = vmatmul.mubr.bf16.vlgmr.msra.gmra.mrb[56].mxu0 %v8082_v19  ;;  %v9572_v23 = vpop.permute.xlu0 %3190  ;;  %v9592_v13 = vsel %vm3198_vm10, %v9583_v21, 0  ;;  %v8111_v19 = vld [vmem:[#allocation3 + $0x30] sm:$0xff]  }
 0x4ec   : > { %7417 = vmatpush3.bf16.msra.mxu0 %v9419_v36  ;;  %7412 = vmatprep.mubr.bf16.mxu0 %v8083_v10  ;;  %v9581_v28 = vsel %vm3198_vm10, %v9572_v23, 0 }
 0x4ed   : > { %7418 = vmatprep.subr.bf16.mxu0 %v9417_v40  ;;  %7445 = vmatpush3.bf16.msra.mxu1 %v9559_v20 }
 0x4ee   : > { %7763 = vmatprep.subr.msk.bf16.mxu1 %vm3198_vm10, %v9561_v5  ;;  %v9605_v30 = vpop.permute.xlu1 %3196 }
 0x4ef   : > { %v9594_v29 = vpop.permute.xlu0 %3194  ;;  %v9614_v31 = vsel %vm3198_vm10, %v9605_v30, 0 }
 0x4f0   : > { %7419 = vmatpush3.bf16.msra.mxu0 %v9417_v40  ;;  %v9603_v27 = vsel %vm3198_vm10, %v9594_v29, 0 }
 0x4f1   : > { %7420 = vmatprep.subr.bf16.mxu0 %v9431_v48  ;;  %7447 = vmatpush3.bf16.msra.mxu1 %v9570_v15 }
 0x4f2   : > { %7764 = vmatprep.subr.msk.bf16.mxu1 %vm3198_vm10, %v9572_v23 }
 0x4f3   : > { %7413 = vmatmul.mubr.bf16.gmra.mrb[60].mxu0 %v8084_v9  ;;  %v3712_v24 = vpop.permute.xlu0 %3711 }
 0x4f4   : > { %7421 = vmatpush3.bf16.msra.mxu0 %v9431_v48  ;;  %7432 = vmatprep.mubr.bf16.mxu0 %v8087_v22 }
 0x4f5   : > { %7422 = vmatprep.subr.bf16.mxu0 %v9428_v46  ;;  %7449 = vmatpush3.bf16.msra.mxu1 %v9581_v28 }
 0x4f6   : > { %7765 = vmatprep.subr.msk.bf16.mxu1 %vm3198_vm10, %v9583_v21 }
 0x4f8   : > { %7423 = vmatpush3.bf16.msra.mxu0 %v9428_v46 }
 0x4f9   : > { %7424 = vmatprep.subr.bf16.mxu0 %v9443_v6  ;;  %7451 = vmatpush3.bf16.msra.mxu1 %v9592_v13 }
 0x4fa   : > { %7766 = vmatprep.subr.msk.bf16.mxu1 %vm3198_vm10, %v9594_v29 }
 0x4fc   : > { %7425 = vmatpush3.bf16.msra.mxu0 %v9443_v6 }
 0x4fd   : > { %7426 = vmatprep.subr.bf16.mxu0 %v9440_v57  ;;  %7453 = vmatpush3.bf16.msra.mxu1 %v9603_v27 }
 0x4fe   : > { %7767 = vmatprep.subr.msk.bf16.mxu1 %vm3198_vm10, %v9605_v30 }
 0x500   : > { %7427 = vmatpush3.bf16.msra.mxu0 %v9440_v57 }
 0x501   : > { %7428 = vmatprep.subr.bf16.mxu0 %v9455_v33  ;;  %7455 = vmatpush3.bf16.msra.mxu1 %v9614_v31 }
 0x502   : > { %7464 = vmatprep.subr.bf16.mxu1 %v9419_v36 }
 0x504   : > { %7429 = vmatpush3.bf16.msra.mxu0 %v9455_v33  ;;  %7457 = vmatmul.mubr.bf16.vlgmr.msra.gmra.mrb[32].mxu1 %v8086_v38 }
 0x505   : > { %7430 = vmatprep.subr.bf16.mxu0 %v9452_v32  ;;  %7465 = vmatpush3.bf16.msra.mxu1 %v9419_v36 }
 0x506   : > { %7466 = vmatprep.subr.bf16.mxu1 %v9417_v40  ;;  %7460 = vmatprep.mubr.bf16.mxu1 %v8107_v42 }
 0x508   : > { %7431 = vmatpush3.bf16.msra.mxu0 %v9452_v32 }
 0x509   : > { %7467 = vmatpush3.bf16.msra.mxu1 %v9417_v40  ;;  %7488 = vmatprep.subr.bf16.mxu0 %v9488_v47 }
 0x50a   : > { %7468 = vmatprep.subr.bf16.mxu1 %v9431_v48 }
 0x50b   : > { %7433 = vmatmul.mubr.bf16.vlgmr.msra.gmra.mrb[56].mxu0 %v8088_v34 }
 0x50c   : > { %7489 = vmatpush3.bf16.msra.mxu0 %v9488_v47  ;;  %7436 = vmatprep.mubr.bf16.mxu0 %v8089_v43 }
 0x50d   : > { %7469 = vmatpush3.bf16.msra.mxu1 %v9431_v48  ;;  %7490 = vmatprep.subr.bf16.mxu0 %v9491_v39 }
 0x50e   : > { %7470 = vmatprep.subr.bf16.mxu1 %v9428_v46  ;;  %7461 = vmatmul.mubr.bf16.gmra.mrb[36].mxu1 %v8108_v44 }
 0x50f   : > { %7480 = vmatprep.mubr.bf16.mxu1 %v8109_v4  ;;  %v8118_v4 = vld [vmem:[#allocation5 + $0x14] ss:$8 sps:$4 sm:$0xff]  }
 0x510   : > { %7491 = vmatpush3.bf16.msra.mxu0 %v9491_v39 }
 0x511   : > { %7471 = vmatpush3.bf16.msra.mxu1 %v9428_v46  ;;  %7492 = vmatprep.subr.bf16.mxu0 %v9500_v54 }
 0x512   : > { %7472 = vmatprep.subr.bf16.mxu1 %v9443_v6 }
 0x513   : > { %7437 = vmatmul.mubr.bf16.gmra.mrb[60].mxu0 %v8090_v37 }
 0x514   : > { %7493 = vmatpush3.bf16.msra.mxu0 %v9500_v54  ;;  %7504 = vmatprep.mubr.bf16.mxu0 %v8091_v26  ;;  %v3729_v54 = vsel %vm3727_vm11, %v3712_v24, 0  ;;  %v8116_v24 = vld [vmem:[#allocation5 + $0x10] ss:$8 sps:$4 sm:$0xff]  }
 0x515   : > { %7473 = vmatpush3.bf16.msra.mxu1 %v9443_v6  ;;  %7494 = vmatprep.subr.bf16.mxu0 %v9503_v16  ;;  %v3752_v17 = vmul.bf16 %v3729_v54, %v9483_v45  ;;  %v8119_v54 = vld [vmem:[#allocation5 + $0x20] ss:$8 sps:$4 sm:$0xff]  }
 0x516   : > { %7474 = vmatprep.subr.bf16.mxu1 %v9440_v57 }
 0x518   : > { %7495 = vmatpush3.bf16.msra.mxu0 %v9503_v16  ;;  %v3714_v16 = vpop.permute.xlu1 %3713 }
 0x519   : > { %7475 = vmatpush3.bf16.msra.mxu1 %v9440_v57  ;;  %7496 = vmatprep.subr.bf16.mxu0 %v9512_v56  ;;  %v3732_v25 = vsel %vm3727_vm11, %v3714_v16, 0  ;;  %v8124_v16 = vld [vmem:[#allocation5 + $0x34] ss:$8 sps:$4 sm:$0xff]  }
 0x51a   : > { %7476 = vmatprep.subr.bf16.mxu1 %v9455_v33 }
 0x51c   : > { %7497 = vmatpush3.bf16.msra.mxu0 %v9512_v56  ;;  %v3716_v56 = vpop.permute.xlu0 %3715  ;;  %v3718_v11 = vpop.permute.xlu1 %3717 }
 0x51d   : > { %7477 = vmatpush3.bf16.msra.mxu1 %v9455_v33  ;;  %7498 = vmatprep.subr.bf16.mxu0 %v9515_v50  ;;  %v3735_v52 = vsel %vm3727_vm11, %v3716_v56, 0  ;;  %v8128_v56 = vld [vmem:[#allocation5 + $0x50] ss:$8 sps:$4 sm:$0xff]  }
 0x51e   : > { %7478 = vmatprep.subr.bf16.mxu1 %v9452_v32  ;;  %v3754_v53 = vmul.bf16 %v3735_v52, %v9483_v45  ;;  %v8131_v52 = vld [vmem:[#allocation5 + $0x60] ss:$8 sps:$4 sm:$0xff]  }
 0x520   : > { %7499 = vmatpush3.bf16.msra.mxu0 %v9515_v50  ;;  %v3753_v50 = vmul.bf16 %v3732_v25, %v9483_v45  ;;  %v3722_v10 = vpop.permute.xlu1 %3721  ;;  %v8125_v25 = vld [vmem:[#allocation5 + $0x40] ss:$8 sps:$4 sm:$0xff]  }
 0x521   : > { %7479 = vmatpush3.bf16.msra.mxu1 %v9452_v32  ;;  %7500 = vmatprep.subr.bf16.mxu0 %v9524_v58 }
 0x524   : > { %7501 = vmatpush3.bf16.msra.mxu0 %v9524_v58  ;;  %7481 = vmatmul.mubr.bf16.vlgmr.msra.gmra.mrb[32].mxu1 %v8110_v49  ;;  %v3738_v58 = vsel %vm3727_vm11, %v3718_v11, 0  ;;  %v3726_v22 = vpop.permute.xlu1 %3725  ;;  %v8121_v49 = vld [vmem:[#allocation5 + $0x24] ss:$8 sps:$4 sm:$0xff]   ;;  %v8136_v11 = vld [vmem:[#allocation5 + $0x74] ss:$8 sps:$4 sm:$0xff]  }
 0x525   : > { %7502 = vmatprep.subr.bf16.mxu0 %v9527_v61  ;;  %7484 = vmatprep.mubr.bf16.mxu1 %v8111_v19  ;;  %v8148_v19 = vld [vmem:[#allocation5 + $0xb4] ss:$8 sps:$4 sm:$0xff]  }
 0x528   : > { %7503 = vmatpush3.bf16.msra.mxu0 %v9527_v61  ;;  %v8103_v61 = vld [vmem:[#allocation3 + $0x100] sm:$0xff]  }
 0x529   : > { %7512 = vmatprep.subr.bf16.mxu0 %v9419_v36 }
 0x52b   : > { %7505 = vmatmul.mubr.bf16.vlgmr.msra.gmra.mrb[64].mxu0 %v8092_v51 }
 0x52c   : > { %7513 = vmatpush3.bf16.msra.mxu0 %v9419_v36  ;;  %7508 = vmatprep.mubr.bf16.mxu0 %v8093_v35  ;;  %v8097_v36 = vld [vmem:[#allocation3 + $0x10] sm:$0xff]  }
 0x52d   : > { %7514 = vmatprep.subr.bf16.mxu0 %v9417_v40 }
 0x530   : > { %7515 = vmatpush3.bf16.msra.mxu0 %v9417_v40  ;;  %v8096_v40 = vld [vmem:[#allocation3 + $0x8] sm:$0xff]  }
 0x531   : > { %7516 = vmatprep.subr.bf16.mxu0 %v9431_v48 }
 0x533   : > { %7509 = vmatmul.mubr.bf16.gmra.mrb[68].mxu0 %v8094_v7  ;;  %v3978_v7 = vld [vmem:[%s10439_s7 + $0x8] sm:$0xff] }
 0x534   : > { %7517 = vmatpush3.bf16.msra.mxu0 %v9431_v48  ;;  %7528 = vmatprep.mubr.bf16.mxu0 %v8095_v0  ;;  %v3980_v0 = vld [vmem:[%s10439_s7 + $0x18] sm:$0xff] }
 0x535   : > { %7518 = vmatprep.subr.bf16.mxu0 %v9428_v46 }
 0x538   : > { %7519 = vmatpush3.bf16.msra.mxu0 %v9428_v46 }
 0x539   : > { %7520 = vmatprep.subr.bf16.mxu0 %v9443_v6 }
 0x53c   : > { %7521 = vmatpush3.bf16.msra.mxu0 %v9443_v6 }
 0x53d   : > { %7522 = vmatprep.subr.bf16.mxu0 %v9440_v57 }
 0x540   : > { %7523 = vmatpush3.bf16.msra.mxu0 %v9440_v57 }
 0x541   : > { %7524 = vmatprep.subr.bf16.mxu0 %v9455_v33 }
 0x544   : > { %7525 = vmatpush3.bf16.msra.mxu0 %v9455_v33  ;;  %v8099_v33 = vld [vmem:[#allocation3 + $0xc0] sm:$0xff]  }
 0x545   : > { %7526 = vmatprep.subr.bf16.mxu0 %v9452_v32 }
 0x548   : > { %7527 = vmatpush3.bf16.msra.mxu0 %v9452_v32  ;;  %v9669_v48 = vpop.f32.mrb[48].mxu0  ;;  %v8098_v32 = vld [vmem:[#allocation3 + $0x18] sm:$0xff]  }
 0x549   : > { %7768 = vmatprep.subr.msk.bf16.mxu0 %vm3198_vm10, %v9529_v55  ;;  %v9673_v46 = vpop.f32.mrb[49].mxu0  ;;  %v3720_v55 = vpop.permute.xlu0 %3719 }
 0x54a   : > { %v9675_v6 = vpop.f32.mrb[50].mxu0 }
 0x54b   : > { %7529 = vmatmul.mubr.bf16.vlgmr.msra.gmra.mrb[64].mxu0 %v8096_v40  ;;  %v9677_v57 = vpop.f32.mrb[51].mxu0  ;;  %v3982_v40 = vld [vmem:[%s10439_s7 + $0x28] sm:$0xff] }
 0x54c   : > { %7537 = vmatpush3.bf16.msra.mxu0 %v9537_v62  ;;  %7532 = vmatprep.mubr.bf16.mxu0 %v8097_v36  ;;  %v3755_v62 = vmul.bf16 %v3738_v58, %v9483_v45  ;;  %v3984_v36 = vld [vmem:[%s10439_s7 + $0x38] sm:$0xff]  ;;  %v8137_v58 = vld [vmem:[#allocation5 + $0x80] ss:$8 sps:$4 sm:$0xff]  }
 0x54d   : > { %7769 = vmatprep.subr.msk.bf16.mxu0 %vm3198_vm10, %v9539_v2  ;;  %v3741_v2 = vsel %vm3727_vm11, %v3720_v55, 0  ;;  %v8140_v55 = vld [vmem:[#allocation5 + $0x90] ss:$8 sps:$4 sm:$0xff]  }
 0x550   : > { %7539 = vmatpush3.bf16.msra.mxu0 %v9548_v3  ;;  %v9683_v8 = vpop.f32.mrb[52].mxu0  ;;  %v8112_v3 = vld [vmem:[#allocation3 + $0x38] sm:$0xff]  }
 0x551   : > { %7770 = vmatprep.subr.msk.bf16.mxu0 %vm3198_vm10, %v9550_v59  ;;  %v9687_v47 = vpop.f32.mrb[53].mxu0  ;;  %v3756_v59 = vmul.bf16 %v3741_v2, %v9483_v45  ;;  %7485 = vmatmul.mubr.bf16.gmra.mrb[36].mxu1 %v8112_v3  ;;  %v8143_v2 = vld [vmem:[#allocation5 + $0xa0] ss:$8 sps:$4 sm:$0xff]   ;;  %v8146_v3 = vld [vmem:[#allocation5 + $0xb0] ss:$8 sps:$4 sm:$0xff]  }
 0x552   : > { %v9689_v39 = vpop.f32.mrb[54].mxu0 }
 0x553   : > { %7533 = vmatmul.mubr.bf16.gmra.mrb[68].mxu0 %v8098_v32  ;;  %v9691_v18 = vpop.f32.mrb[55].mxu0  ;;  %v8113_v32 = vld [vmem:[#allocation5] ss:$8 sps:$4 sm:$0xff]  }
 0x554   : > { %7541 = vmatpush3.bf16.msra.mxu0 %v9559_v20  ;;  %7552 = vmatprep.mubr.bf16.mxu0 %v8099_v33  ;;  %v3744_v20 = vsel %vm3727_vm11, %v3722_v10, 0  ;;  %v8115_v33 = vld [vmem:[#allocation5 + $0x4] ss:$8 sps:$4 sm:$0xff]  }
 0x555   : > { %7771 = vmatprep.subr.msk.bf16.mxu0 %vm3198_vm10, %v9561_v5  ;;  %v3724_v5 = vpop.permute.xlu0 %3723  ;;  %v3757_v9 = vmul.bf16 %v3744_v20, %v9483_v45  ;;  %4185 = vmatprep.subr.bf16.mxu1 %v8115_v33  ;;  %v8151_v10 = vld [vmem:[#allocation5 + $0xc4] ss:$8 sps:$4 sm:$0xff]   ;;  %v8154_v20 = vld [vmem:[#allocation5 + $0xd4] ss:$8 sps:$4 sm:$0xff]  }
 0x556   : > { %4186 = vmatpush1.bf16.msra.mxu1 %v8113_v32 }
 0x557   : > { %4187 = vmatprep.subr.bf16.mxu1 %v8118_v4 }
 0x558   : > { %7543 = vmatpush3.bf16.msra.mxu0 %v9570_v15  ;;  %v3747_v15 = vsel %vm3727_vm11, %v3724_v5, 0  ;;  %v8152_v5 = vld [vmem:[#allocation5 + $0xd0] ss:$8 sps:$4 sm:$0xff]  }
 0x559   : > { %7772 = vmatprep.subr.msk.bf16.mxu0 %vm3198_vm10, %v9572_v23  ;;  %v3758_v23 = vmul.bf16 %v3747_v15, %v9483_v45 }
 0x55a   : > { %4188 = vmatpush1.bf16.msra.mxu1 %v8116_v24 }
 0x55b   : > { %4189 = vmatprep.subr.bf16.mxu1 %v8121_v49 }
 0x55c   : > { %7545 = vmatpush3.bf16.msra.mxu0 %v9581_v28  ;;  %v3750_v28 = vsel %vm3727_vm11, %v3726_v22, 0 }
 0x55d   : > { %7773 = vmatprep.subr.msk.bf16.mxu0 %vm3198_vm10, %v9583_v21  ;;  %v3759_v21 = vmul.bf16 %v3750_v28, %v9483_v45 }
 0x55e   : > { %4190 = vmatpush1.bf16.msra.mxu1 %v8119_v54 }
 0x55f   : > { %4191 = vmatprep.subr.bf16.mxu1 %v8124_v16 }
 0x560   : > { %7547 = vmatpush3.bf16.msra.mxu0 %v9592_v13  ;;  %v8104_v13 = vld [vmem:[#allocation3 + $0x108] sm:$0xff]  }
 0x561   : > { %7774 = vmatprep.subr.msk.bf16.mxu0 %vm3198_vm10, %v9594_v29  ;;  %v8105_v29 = vld [vmem:[#allocation3 + $0x110] sm:$0xff]  }
 0x564   : > { %7549 = vmatpush3.bf16.msra.mxu0 %v9603_v27  ;;  %v8106_v27 = vld [vmem:[#allocation3 + $0x118] sm:$0xff]  }
 0x565   : > { %7775 = vmatprep.subr.msk.bf16.mxu0 %vm3198_vm10, %v9605_v30 }
 0x568   : > { %7551 = vmatpush3.bf16.msra.mxu0 %v9614_v31 }
 0x569   : > { %7560 = vmatprep.subr.bf16.mxu0 %v3752_v17 }
 0x56b   : > { %7553 = vmatmul.mubr.bf16.vlgmr.msra.gmra.mrb[64].mxu0 %v8100_v60  ;;  %v8127_v60 = vld [vmem:[#allocation5 + $0x44] ss:$8 sps:$4 sm:$0xff]  }
 0x56c   : > { %7561 = vmatpush3.bf16.msra.mxu0 %v3752_v17  ;;  %7556 = vmatprep.mubr.bf16.mxu0 %v8101_v63  ;;  %v8122_v17 = vld [vmem:[#allocation5 + $0x30] ss:$8 sps:$4 sm:$0xff]   ;;  %v8130_v63 = vld [vmem:[#allocation5 + $0x54] ss:$8 sps:$4 sm:$0xff]  }
 0x56d   : > { %7562 = vmatprep.subr.bf16.mxu0 %v3753_v50  ;;  %4192 = vmatpush1.bf16.msra.mxu1 %v8122_v17 }
 0x56e   : > { %4193 = vmatprep.subr.bf16.mxu1 %v8127_v60 }
 0x570   : > { %7563 = vmatpush3.bf16.msra.mxu0 %v3753_v50  ;;  %v8133_v50 = vld [vmem:[#allocation5 + $0x64] ss:$8 sps:$4 sm:$0xff]  }
 0x571   : > { %7564 = vmatprep.subr.bf16.mxu0 %v3754_v53  ;;  %4194 = vmatpush1.bf16.msra.mxu1 %v8125_v25 }
 0x572   : > { %4195 = vmatprep.subr.bf16.mxu1 %v8130_v63 }
 0x573   : > { %7557 = vmatmul.mubr.bf16.gmra.mrb[68].mxu0 %v8102_v41  ;;  %v8139_v41 = vld [vmem:[#allocation5 + $0x84] ss:$8 sps:$4 sm:$0xff]  }
 0x574   : > { %7565 = vmatpush3.bf16.msra.mxu0 %v3754_v53  ;;  %7576 = vmatprep.mubr.bf16.mxu0 %v8103_v61  ;;  %v8134_v53 = vld [vmem:[#allocation5 + $0x70] ss:$8 sps:$4 sm:$0xff]   ;;  %v8142_v61 = vld [vmem:[#allocation5 + $0x94] ss:$8 sps:$4 sm:$0xff]  }
 0x575   : > { %7566 = vmatprep.subr.bf16.mxu0 %v3755_v62  ;;  %4196 = vmatpush1.bf16.msra.mxu1 %v8128_v56 }
 0x576   : > { %4197 = vmatprep.subr.bf16.mxu1 %v8133_v50 }
 0x578   : > { %7567 = vmatpush3.bf16.msra.mxu0 %v3755_v62  ;;  %v8145_v62 = vld [vmem:[#allocation5 + $0xa4] ss:$8 sps:$4 sm:$0xff]  }
 0x579   : > { %7568 = vmatprep.subr.bf16.mxu0 %v3756_v59  ;;  %4198 = vmatpush1.bf16.msra.mxu1 %v8131_v52 }
 0x57a   : > { %4199 = vmatprep.subr.bf16.mxu1 %v8136_v11 }
 0x57c   : > { %7569 = vmatpush3.bf16.msra.mxu0 %v3756_v59  ;;  %v8149_v59 = vld [vmem:[#allocation5 + $0xc0] ss:$8 sps:$4 sm:$0xff]  }
 0x57d   : > { %7570 = vmatprep.subr.bf16.mxu0 %v3757_v9  ;;  %4200 = vmatpush1.bf16.msra.mxu1 %v8134_v53 }
 0x57e   : > { %4201 = vmatprep.subr.bf16.mxu1 %v8139_v41 }
 0x580   : > { %7571 = vmatpush3.bf16.msra.mxu0 %v3757_v9  ;;  %v8157_v9 = vld [vmem:[#allocation5 + $0xe4] ss:$8 sps:$4 sm:$0xff]  }
 0x581   : > { %7572 = vmatprep.subr.bf16.mxu0 %v3758_v23  ;;  %4202 = vmatpush1.bf16.msra.mxu1 %v8137_v58  ;;  %v3981_v58 = vld [vmem:[%s10439_s7 + $0x20] sm:$0xff] }
 0x582   : > { %4203 = vmatprep.subr.bf16.mxu1 %v8142_v61  ;;  %v3983_v61 = vld [vmem:[%s10439_s7 + $0x30] sm:$0xff] }
 0x584   : > { %7573 = vmatpush3.bf16.msra.mxu0 %v3758_v23  ;;  %v8155_v23 = vld [vmem:[#allocation5 + $0xe0] ss:$8 sps:$4 sm:$0xff]  }
 0x585   : > { %7574 = vmatprep.subr.bf16.mxu0 %v3759_v21  ;;  %4204 = vmatpush1.bf16.msra.mxu1 %v8140_v55 }
 0x586   : > { %4205 = vmatprep.subr.bf16.mxu1 %v8145_v62 }
 0x588   : > { %7575 = vmatpush3.bf16.msra.mxu0 %v3759_v21 }
 0x589   : > { %4206 = vmatpush1.bf16.msra.mxu1 %v8143_v2 }
 0x58a   : > { %4207 = vmatprep.subr.bf16.mxu1 %v8148_v19 }
 0x58b   : > { %7577 = vmatmul.mubr.bf16.vlgmr.msra.gmra.mrb[64].mxu0 %v8104_v13 }
 0x58c   : > { %7580 = vmatprep.mubr.bf16.mxu0 %v8105_v29 }
 0x58d   : > { %4208 = vmatpush1.bf16.msra.mxu1 %v8146_v3 }
 0x58e   : > { %4209 = vmatprep.subr.bf16.mxu1 %v8151_v10 }
 0x591   : > { %4210 = vmatpush1.bf16.msra.mxu1 %v8149_v59 }
 0x592   : > { %4211 = vmatprep.subr.bf16.mxu1 %v8154_v20 }
 0x593   : > { %7581 = vmatmul.mubr.bf16.gmra.mrb[68].mxu0 %v8106_v27 }
 0x594   : > { %4618 = vmatprep.mubr.bf16.mxu0 %v8294_v1 }
 0x595   : > { %4212 = vmatpush1.bf16.msra.mxu1 %v8152_v5 }
 0x596   : > { %4213 = vmatprep.subr.bf16.mxu1 %v8157_v9 }
 0x599   : > { %4214 = vmatpush1.bf16.msra.mxu1 %v8155_v23 }
 0x5de   : > { %v7434_v30 = vpop.f32.mrb[56].mxu0 }
 0x5df   : > { %v3133_v31 = vpop.f32.mrb[57].mxu0 }
 0x5e0   : > { %v7435_v38 = vpop.f32.mrb[58].mxu0 }
 0x5e1   : > { %v7976_v34 = vpack.i.bf16 %v7435_v38, %v7434_v30  ;;  %v3136_v43 = vpop.f32.mrb[59].mxu0 }
 0x5e2   : > { %v7966_v37 = vpack.i.bf16 %v3136_v43, %v3133_v31  ;;  %v8158_v43 = vld [vmem:[#allocation5 + $0xf0] ss:$8 sps:$4 sm:$0xff]  }
 0x5e4   : > { %7967 = vrot.lane.b32.xlu1 %v7966_v37, %s8305_s17  ;;  %v8160_v37 = vld [vmem:[#allocation5 + $0xf4] ss:$8 sps:$4 sm:$0xff]  }
 0x5e5   : > { %4215 = vmatprep.subr.bf16.mxu1 %v8160_v37 }
 0x5e6   : > { %v7438_v45 = vpop.f32.mrb[60].mxu0  ;;  %4216 = vmatpush1.bf16.msra.mxu1 %v8158_v43 }
 0x5e7   : > { %v3149_v26 = vpop.f32.mrb[61].mxu0 }
 0x5e8   : > { %7977 = vrot.lane.b32.xlu1 %v7976_v34, %s8305_s17  ;;  %v7439_v42 = vpop.f32.mrb[62].mxu0 }
 0x5e9   : > { %v7996_v44 = vpack.i.bf16 %v7439_v42, %v7438_v45  ;;  %v3152_v51 = vpop.f32.mrb[63].mxu0 }
 0x5ea   : > { %v7986_v35 = vpack.i.bf16 %v3152_v51, %v3149_v26 }
 0x5ec   : > { %7987 = vrot.lane.b32.xlu1 %v7986_v35, %s8305_s17 }
 0x5f0   : > { %7997 = vrot.lane.b32.xlu1 %v7996_v44, %s8305_s17 }
 0x5f4   : > { %3992 = vperm.xlu1 %7959, %v3978_v7  }
 0x5f7   : > { %v9742_v15 = vpop.f32.mrb[32].mxu1 }
 0x5f8   : > { %4002 = vperm.xlu1 %7959, %v3980_v0   ;;  %v9744_v22 = vpop.f32.mrb[33].mxu1 }
 0x5f9   : > { %v9746_v28 = vpop.f32.mrb[34].mxu1 }
 0x5fa   : > { %v9748_v21 = vpop.f32.mrb[35].mxu1 }
 0x5fc   : > { %4012 = vperm.xlu1 %7959, %v3982_v40  }
 0x600   : > { %4022 = vperm.xlu1 %7959, %v3984_v36  }
 0x624   : > { %v9750_v13 = vpop.f32.mrb[36].mxu1 }
 0x625   : > { %v9752_v29 = vpop.f32.mrb[37].mxu1 }
 0x626   : > { %v9754_v27 = vpop.f32.mrb[38].mxu1 }
 0x627   : > { %v9756_v30 = vpop.f32.mrb[39].mxu1 }
 0x656   : > { %v7968_v31 = vpop.permute.xlu1 %7967 }
 0x657   : > { %v7970_v38 = vunpack.i.h.bf16 %v7968_v31  ;;  %v7969_v34 = vunpack.i.l.bf16 %v7968_v31 }
 0x659   : > { %v3922_v45 = vsel %vm2651_vm7, %v9677_v57, %v7970_v38  ;;  %v3921_v26 = vsel %vm2651_vm7, %v9673_v46, %v7969_v34 }
 0x65a   : > { %v3937_v42 = vpack.c.bf16 %v3922_v45, %v3921_v26  ;;  %v7978_v44 = vpop.permute.xlu1 %7977 }
 0x65b   : > { %v7980_v51 = vunpack.i.h.bf16 %v7978_v44  ;;  %v7979_v35 = vunpack.i.l.bf16 %v7978_v44 }
 0x65d   : > { %v9764_v7 = vsel %vm2651_vm7, %v9669_v48, %v7979_v35  ;;  %v3924_v0 = vsel %vm2651_vm7, %v9675_v6, %v7980_v51 }
 0x65e   : > { %v7988_v40 = vpop.permute.xlu1 %7987  ;;  %v7578_v36 = vpop.f32.mrb[64].mxu0  ;;  %v3939_v57 = vpack.c.bf16 %v3924_v0, %v9764_v7 }
 0x65f   : > { %v7990_v32 = vunpack.i.h.bf16 %v7988_v40  ;;  %v7989_v33 = vunpack.i.l.bf16 %v7988_v40  ;;  %v3818_v46 = vpop.f32.mrb[65].mxu0 }
 0x660   : > { %v7579_v4 = vpop.f32.mrb[66].mxu0 }
 0x661   : > { %v7971_v24 = vpack.i.bf16 %v7579_v4, %v7578_v36  ;;  %v3821_v49 = vpop.f32.mrb[67].mxu0  ;;  %v3925_v54 = vsel %vm2651_vm7, %v9687_v47, %v7989_v33  ;;  %v3926_v48 = vsel %vm2651_vm7, %v9691_v18, %v7990_v32 }
 0x662   : > { %v7961_v16 = vpack.i.bf16 %v3821_v49, %v3818_v46  ;;  %v7998_v17 = vpop.permute.xlu1 %7997  ;;  %v3941_v60 = vpack.c.bf16 %v3926_v48, %v3925_v54 }
 0x663   : > { %v8000_v6 = vunpack.i.h.bf16 %v7998_v17  ;;  %v7999_v25 = vunpack.i.l.bf16 %v7998_v17 }
 0x664   : > { %7962 = vrot.lane.b32.xlu0 %v7961_v16, %s8305_s17 }
 0x665   : > { %v3927_v63 = vsel %vm2651_vm7, %v9683_v8, %v7999_v25  ;;  %v3928_v56 = vsel %vm2651_vm7, %v9689_v39, %v8000_v6  ;;  %v3977_v8 = vld [vmem:[%s10439_s7] sm:$0xff]  ;;  %v3979_v39 = vld [vmem:[%s10439_s7 + $0x10] sm:$0xff] }
 0x666   : > { %v7582_v50 = vpop.f32.mrb[68].mxu0  ;;  %v3943_v52 = vpack.c.bf16 %v3928_v56, %v3927_v63 }
 0x667   : > { %v3834_v11 = vpop.f32.mrb[69].mxu0 }
 0x668   : > { %7972 = vrot.lane.b32.xlu0 %v7971_v24, %s8305_s17  ;;  %v7583_v47 = vpop.f32.mrb[70].mxu0 }
 0x669   : > { %v7991_v18 = vpack.i.bf16 %v7583_v47, %v7582_v50  ;;  %v3837_v53 = vpop.f32.mrb[71].mxu0 }
 0x66a   : > { %v7981_v41 = vpack.i.bf16 %v3837_v53, %v3834_v11 }
 0x66c   : > { %7982 = vrot.lane.b32.xlu0 %v7981_v41, %s8305_s17 }
 0x670   : > { %7992 = vrot.lane.b32.xlu0 %v7991_v18, %s8305_s17  ;;  %s8306_s17 = smov 112  }
 0x673   : > { %v3993_v7 = vpop.permute.xlu1 %3992 }
 0x674   : > { %3987 = vperm.xlu0 %7960, %v3977_v8  }
 0x677   : > { %v4003_v17 = vpop.permute.xlu1 %4002 }
 0x678   : > { %3997 = vperm.xlu0 %7960, %v3979_v39  }
 0x67c   : > { %4007 = vperm.xlu0 %7960, %v3981_v58  }
 0x680   : > { %4017 = vperm.xlu0 %7960, %v3983_v61   ;;  %v4013_v61 = vpop.permute.xlu1 %4012 }
 0x6d6   : > { %v7963_v55 = vpop.permute.xlu0 %7962 }
 0x6d7   : > { %v7965_v62 = vunpack.i.h.bf16 %v7963_v55  ;;  %v7964_v2 = vunpack.i.l.bf16 %v7963_v55 }
 0x6d9   : > { %v3929_v19 = vsel %vm2651_vm7, %v9744_v22, %v7964_v2  ;;  %v3930_v3 = vsel %vm2651_vm7, %v9748_v21, %v7965_v62 }
 0x6da   : > { %v7973_v10 = vpop.permute.xlu0 %7972  ;;  %v3938_v59 = vpack.c.bf16 %v3930_v3, %v3929_v19 }
 0x6db   : > { %v7975_v20 = vunpack.i.h.bf16 %v7973_v10  ;;  %v7974_v5 = vunpack.i.l.bf16 %v7973_v10 }
 0x6dc   : > { %4217 = vmatprep.mubr.bf16.mxu1 %v3938_v59 }
 0x6dd   : > { %4218 = vmatmul.mubr.bf16.vlgmr.msra.gmra.mrb[40].mxu1 %v3937_v42  ;;  %v3931_v9 = vsel %vm2651_vm7, %v9742_v15, %v7974_v5  ;;  %v3932_v23 = vsel %vm2651_vm7, %v9746_v28, %v7975_v20 }
 0x6de   : > { %v7983_v31 = vpop.permute.xlu0 %7982  ;;  %v3940_v38 = vpack.c.bf16 %v3932_v23, %v3931_v9 }
 0x6df   : > { %v7985_v34 = vunpack.i.h.bf16 %v7983_v31  ;;  %v7984_v43 = vunpack.i.l.bf16 %v7983_v31 }
 0x6e0   : > { %4227 = vmatprep.mubr.bf16.mxu1 %v3940_v38 }
 0x6e1   : > { %v3933_v22 = vsel %vm2651_vm7, %v9752_v29, %v7984_v43  ;;  %v3934_v21 = vsel %vm2651_vm7, %v9756_v30, %v7985_v34 }
 0x6e2   : > { %v7993_v37 = vpop.permute.xlu0 %7992  ;;  %v3942_v45 = vpack.c.bf16 %v3934_v21, %v3933_v22  ;;  %v4023_v22 = vpop.permute.xlu1 %4022 }
 0x6e3   : > { %v7995_v26 = vunpack.i.h.bf16 %v7993_v37  ;;  %v7994_v42 = vunpack.i.l.bf16 %v7993_v37 }
 0x6e5   : > { %4228 = vmatmul.mubr.bf16.gmra.mrb[44].mxu1 %v3939_v57  ;;  %v3935_v15 = vsel %vm2651_vm7, %v9750_v13, %v7994_v42  ;;  %v3936_v28 = vsel %vm2651_vm7, %v9754_v27, %v7995_v26 }
 0x6e6   : > { %4237 = vmatprep.mubr.bf16.mxu1 %v3942_v45  ;;  %v3944_v44 = vpack.c.bf16 %v3936_v28, %v3935_v15 }
 0x6ed   : > { %4238 = vmatmul.mubr.bf16.gmra.mrb[48].mxu1 %v3941_v60 }
 0x6ee   : > { %4247 = vmatprep.mubr.bf16.mxu1 %v3944_v44 }
 0x6f3   : > { %v3988_v29 = vpop.permute.xlu0 %3987 }
 0x6f5   : > { %4248 = vmatmul.mubr.bf16.gmra.mrb[52].mxu1 %v3943_v52 }
 0x6f6   : > { %4432 = vmatprep.mubr.bf16.mxu1 %v8294_v1 }
 0x6f7   : > { %v3998_v24 = vpop.permute.xlu0 %3997 }
 0x6fb   : > { %v4008_v53 = vpop.permute.xlu0 %4007 }
 0x6ff   : > { %v4018_v23 = vpop.permute.xlu0 %4017 }
 0x7b0   : > { %v4219_v30 = vpop.f32.mrb[40].mxu1 }
 0x7b1   : > { %v4220_v51 = vadd.f32 %v4219_v30, %v3988_v29  ;;  %v4221_v35 = vpop.f32.mrb[41].mxu1 }
 0x7b2   : > { %v4222_v0 = vadd.f32 %v4221_v35, %v3988_v29  ;;  %v4223_v40 = vpop.f32.mrb[42].mxu1  ;;  %v5066_v35 = vld [vmem:[%s10442_s10 + $0x8] sm:$0xff] }
 0x7b3   : > { %v4224_v36 = vadd.f32 %v4223_v40, %v3993_v7  ;;  %v4225_v57 = vpop.f32.mrb[43].mxu1  ;;  %v4258_v32 = vmax.f32 %v4220_v51, 0.0  ;;  %v5067_v40 = vld [vmem:[%s10442_s10 + $0x10] sm:$0xff] }
 0x7b4   : > { %v4226_v13 = vadd.f32 %v4225_v57, %v3993_v7  ;;  %v4259_v27 = vmax.f32 %v4222_v0, 0.0  ;;  %v5065_v7 = vld [vmem:[%s10442_s10] sm:$0xff]  ;;  %v5068_v0 = vld [vmem:[%s10442_s10 + $0x18] sm:$0xff]  ;;  %v4348_v57 = vand.u32 15, %v8792_v12 }
 0x7b5   : > { %v4260_v33 = vmax.f32 %v4224_v36, 0.0  ;;  %v9887_v36 = vadd.s32 128, %v8792_v12 }
 0x7b6   : > { %v4261_v46 = vmax.f32 %v4226_v13, 0.0  ;;  %vm4368_vm12 = vcmp.ne.s32.totalorder %v4348_v57, 15  ;;  %vm5254_vm6 = vcmp.ne.s32.totalorder %v4348_v57, 0 }
 0x7b7   : > { %v9810_v4 = vpack.c.bf16 %v4260_v33, %v4258_v32  ;;  %v4355_v13 = vand.u32 15, %v9887_v36  ;;  %v6697_v32 = vsel %vm4368_vm12, 1.0, %v8299_v14 }
 0x7b8   : > { %v9812_v49 = vpack.c.bf16 %v4261_v46, %v4259_v27  ;;  %v4229_v54 = vpop.f32.mrb[44].mxu1  ;;  %v9897_v27 = vpack.c.bf16 %v6697_v32, %v6697_v32 }
 0x7b9   : > { %v4230_v48 = vadd.f32 %v4229_v54, %v3998_v24  ;;  %v4231_v16 = vpop.f32.mrb[45].mxu1  ;;  %4305 = vrot.lane.b32.xlu1 %v9810_v4, %s8296_s12  ;;  %vm4369_vm13 = vcmp.ne.s32.totalorder %v4355_v13, 15  ;;  %vm5255_vm3 = vcmp.ne.s32.totalorder %v4355_v13, 0 }
 0x7ba   : > { %v4232_v60 = vadd.f32 %v4231_v16, %v3998_v24  ;;  %v4233_v6 = vpop.f32.mrb[46].mxu1  ;;  %4307 = vrot.lane.b32.xlu0 %v9812_v49, %s8296_s12  ;;  %v6698_v33 = vsel %vm4369_vm13, 1.0, %v8299_v14 }
 0x7bb   : > { %v4234_v25 = vadd.f32 %v4233_v6, %v4003_v17  ;;  %v4235_v63 = vpop.f32.mrb[47].mxu1  ;;  %v4262_v50 = vmax.f32 %v4230_v48, 0.0  ;;  %v9899_v46 = vpack.c.bf16 %v6698_v33, %v6698_v33 }
 0x7bc   : > { %v4236_v56 = vadd.f32 %v4235_v63, %v4003_v17  ;;  %v4263_v11 = vmax.f32 %v4232_v60, 0.0 }
 0x7bd   : > { %v4264_v52 = vmax.f32 %v4234_v25, 0.0 }
 0x7be   : > { %v4265_v47 = vmax.f32 %v4236_v56, 0.0 }
 0x7bf   : > { %v9818_v18 = vpack.c.bf16 %v4264_v52, %v4262_v50 }
 0x7c0   : > { %v9820_v41 = vpack.c.bf16 %v4265_v47, %v4263_v11  ;;  %v4239_v8 = vpop.f32.mrb[48].mxu1 }
 0x7c1   : > { %v4240_v39 = vadd.f32 %v4239_v8, %v4008_v53  ;;  %4309 = vrot.lane.b32.xlu1 %v9818_v18, %s8296_s12  ;;  %v4241_v58 = vpop.f32.mrb[49].mxu1 }
 0x7c2   : > { %v4242_v55 = vadd.f32 %v4241_v58, %v4008_v53  ;;  %4311 = vrot.lane.b32.xlu0 %v9820_v41, %s8296_s12  ;;  %v4243_v62 = vpop.f32.mrb[50].mxu1 }
 0x7c3   : > { %v4244_v2 = vadd.f32 %v4243_v62, %v4013_v61  ;;  %v4245_v19 = vpop.f32.mrb[51].mxu1  ;;  %v4266_v10 = vmax.f32 %v4240_v39, 0.0 }
 0x7c4   : > { %v4246_v3 = vadd.f32 %v4245_v19, %v4013_v61  ;;  %v4267_v20 = vmax.f32 %v4242_v55, 0.0 }
 0x7c5   : > { %v4268_v59 = vmax.f32 %v4244_v2, 0.0 }
 0x7c6   : > { %v4269_v5 = vmax.f32 %v4246_v3, 0.0 }
 0x7c7   : > { %v9826_v9 = vpack.c.bf16 %v4268_v59, %v4266_v10 }
 0x7c8   : > { %v9828_v31 = vpack.c.bf16 %v4269_v5, %v4267_v20  ;;  %v4249_v38 = vpop.f32.mrb[52].mxu1  ;;  %v8161_v20 = vld [vmem:[#allocation7 + $0x50] sm:$0xff]  }
 0x7c9   : > { %v4250_v34 = vadd.f32 %v4249_v38, %v4018_v23  ;;  %v4251_v43 = vpop.f32.mrb[53].mxu1  ;;  %4313 = vrot.lane.b32.xlu1 %v9826_v9, %s8296_s12 }
 0x7ca   : > { %v4252_v21 = vadd.f32 %v4251_v43, %v4018_v23  ;;  %v4253_v37 = vpop.f32.mrb[54].mxu1  ;;  %4315 = vrot.lane.b32.xlu0 %v9828_v31, %s8296_s12 }
 0x7cb   : > { %v4254_v45 = vadd.f32 %v4253_v37, %v4023_v22  ;;  %v4255_v26 = vpop.f32.mrb[55].mxu1  ;;  %v4270_v15 = vmax.f32 %v4250_v34, 0.0 }
 0x7cc   : > { %v4256_v42 = vadd.f32 %v4255_v26, %v4023_v22  ;;  %v4271_v44 = vmax.f32 %v4252_v21, 0.0  ;;  %v8162_v21 = vld [vmem:[#allocation7 + $0x58] sm:$0xff]  }
 0x7cd   : > { %v4272_v28 = vmax.f32 %v4254_v45, 0.0 }
 0x7ce   : > { %v4273_v29 = vmax.f32 %v4256_v42, 0.0 }
 0x7cf   : > { %v9834_v30 = vpack.c.bf16 %v4272_v28, %v4270_v15  ;;  %v8163_v15 = vld [vmem:[#allocation7 + $0x70] sm:$0xff]  }
 0x7d0   : > { %v9836_v51 = vpack.c.bf16 %v4273_v29, %v4271_v44  ;;  %v8164_v28 = vld [vmem:[#allocation7 + $0x30] sm:$0xff]   ;;  %v8165_v44 = vld [vmem:[#allocation7 + $0x78] sm:$0xff]  }
 0x7d1   : > { %4317 = vrot.lane.b32.xlu1 %v9834_v30, %s8296_s12  ;;  %v8166_v29 = vld [vmem:[#allocation7 + $0x38] sm:$0xff]  }
 0x7d2   : > { %4319 = vrot.lane.b32.xlu0 %v9836_v51, %s8296_s12 }
 0x7d5   : > { %4534 = vrot.lane.b32.xlu1 %v9812_v49, %s8306_s17 }
 0x7d6   : > { %4532 = vrot.lane.b32.xlu0 %v9810_v4, %s8306_s17 }
 0x7d9   : > { %4538 = vrot.lane.b32.xlu1 %v9820_v41, %s8306_s17 }
 0x7da   : > { %4536 = vrot.lane.b32.xlu0 %v9818_v18, %s8306_s17 }
 0x7dd   : > { %4542 = vrot.lane.b32.xlu1 %v9828_v31, %s8306_s17 }
 0x7de   : > { %4540 = vrot.lane.b32.xlu0 %v9826_v9, %s8306_s17 }
 0x7e1   : > { %4546 = vrot.lane.b32.xlu1 %v9836_v51, %s8306_s17 }
 0x7e2   : > { %4544 = vrot.lane.b32.xlu0 %v9834_v30, %s8306_s17 }
 0x7e5   : > { %4942 = vrot.lane.b32.xlu1 %v9810_v4, %s8307_s27 }
 0x7e6   : > { %4944 = vrot.lane.b32.xlu0 %v9812_v49, %s8307_s27 }
 0x7e9   : > { %4946 = vrot.lane.b32.xlu1 %v9818_v18, %s8307_s27 }
 0x7ea   : > { %4948 = vrot.lane.b32.xlu0 %v9820_v41, %s8307_s27 }
 0x7ed   : > { %4950 = vrot.lane.b32.xlu1 %v9826_v9, %s8307_s27 }
 0x7ee   : > { %4952 = vrot.lane.b32.xlu0 %v9828_v31, %s8307_s27 }
 0x7f1   : > { %4954 = vrot.lane.b32.xlu1 %v9834_v30, %s8307_s27 }
 0x7f2   : > { %4956 = vrot.lane.b32.xlu0 %v9836_v51, %s8307_s27 }
 0x7f5   : > { %5076 = vperm.xlu1 %7959, %v5066_v35   ;;  %v8167_v35 = vld [vmem:[#allocation7 + $0x10] sm:$0xff]  }
 0x7f6   : > { %5071 = vperm.xlu0 %7960, %v5065_v7   ;;  %v8168_v7 = vld [vmem:[#allocation7 + $0x20] sm:$0xff]  }
 0x7f9   : > { %5086 = vperm.xlu1 %7959, %v5068_v0   ;;  %v8169_v0 = vld [vmem:[#allocation7 + $0x18] sm:$0xff]  }
 0x7fa   : > { %5081 = vperm.xlu0 %7960, %v5067_v40  }
 0x82b   : > { %v4306_v24 = vpop.permute.xlu1 %4305 }
 0x82c   : > { %v4308_v54 = vpop.permute.xlu0 %4307 }
 0x82d   : > { %v4322_v48 = vsel %vm4321_vm14, %v4306_v24, %v4308_v54  ;;  %v4332_v16 = vsel %vm4321_vm14, %v4308_v54, 0 }
 0x82e   : > { %v9904_v17 = vmul.bf16 %v9897_v27, %v4322_v48  ;;  %v9907_v60 = vmul.bf16 %v9899_v46, %v4332_v16  ;;  %v8175_v48 = vld [vmem:[#allocation7 + $0x60] sm:$0xff]  }
 0x830   : > { %4400 = vmatprep.subr.bf16.mxu1 %v9907_v60 }
 0x831   : > { %4401 = vmatpush1.bf16.msra.mxu1 %v9904_v17 }
 0x833   : > { %v4310_v6 = vpop.permute.xlu1 %4309 }
 0x834   : > { %v4312_v25 = vpop.permute.xlu0 %4311 }
 0x835   : > { %v4323_v63 = vsel %vm4321_vm14, %v4310_v6, %v4312_v25  ;;  %v4335_v56 = vsel %vm4321_vm14, %v4312_v25, 0 }
 0x836   : > { %v9914_v50 = vmul.bf16 %v9897_v27, %v4323_v63  ;;  %v9917_v52 = vmul.bf16 %v9899_v46, %v4335_v56 }
 0x838   : > { %4402 = vmatprep.subr.bf16.mxu1 %v9917_v52 }
 0x839   : > { %4403 = vmatpush1.bf16.msra.mxu1 %v9914_v50 }
 0x83b   : > { %v4314_v11 = vpop.permute.xlu1 %4313 }
 0x83c   : > { %v4316_v47 = vpop.permute.xlu0 %4315 }
 0x83d   : > { %v4324_v53 = vsel %vm4321_vm14, %v4314_v11, %v4316_v47  ;;  %v4338_v8 = vsel %vm4321_vm14, %v4316_v47, 0  ;;  %v8176_v47 = vld [vmem:[#allocation7 + $0x68] sm:$0xff]  }
 0x83e   : > { %v9924_v39 = vmul.bf16 %v9897_v27, %v4324_v53  ;;  %v9927_v58 = vmul.bf16 %v9899_v46, %v4338_v8 }
 0x840   : > { %4404 = vmatprep.subr.bf16.mxu1 %v9927_v58 }
 0x841   : > { %4405 = vmatpush1.bf16.msra.mxu1 %v9924_v39 }
 0x843   : > { %v4318_v61 = vpop.permute.xlu1 %4317 }
 0x844   : > { %v4320_v55 = vpop.permute.xlu0 %4319 }
 0x845   : > { %v4325_v62 = vsel %vm4321_vm14, %v4318_v61, %v4320_v55  ;;  %v4341_v2 = vsel %vm4321_vm14, %v4320_v55, 0 }
 0x846   : > { %v9934_v19 = vmul.bf16 %v9897_v27, %v4325_v62  ;;  %v9937_v3 = vmul.bf16 %v9899_v46, %v4341_v2  ;;  %v8177_v62 = vld [vmem:[#allocation7 + $0x80] sm:$0xff]   ;;  %v8178_v2 = vld [vmem:[#allocation7 + $0x88] sm:$0xff]  }
 0x847   : > { %v9939_v10 = vpop.permute.xlu1 %4534 }
 0x848   : > { %v4533_v59 = vpop.permute.xlu0 %4532  ;;  %4406 = vmatprep.subr.bf16.mxu1 %v9937_v3  ;;  %6709 = vmatprep.subr.msk.bf16.mxu0 %vm4548_vm15, %v9939_v10 }
 0x849   : > { %v9946_v5 = vsel %vm4548_vm15, %v4533_v59, %v9939_v10  ;;  %4407 = vmatpush1.bf16.msra.mxu1 %v9934_v19 }
 0x84a   : > { %4469 = vmatprep.subr.bf16.mxu1 %v9812_v49  ;;  %4587 = vmatpush1.bf16.msra.mxu0 %v9946_v5 }
 0x84b   : > { %v9951_v23 = vpop.permute.xlu1 %4538 }
 0x84c   : > { %v4537_v38 = vpop.permute.xlu0 %4536  ;;  %6701 = vmatmul.mubr.msk.bf16.vlgmr.msra.gmra.mrb[56].mxu1 %vm2651_vm7, %v8161_v20  ;;  %6710 = vmatprep.subr.msk.bf16.mxu0 %vm4548_vm15, %v9951_v23 }
 0x84d   : > { %v9958_v34 = vsel %vm4548_vm15, %v4537_v38, %v9951_v23  ;;  %4470 = vmatpush1.bf16.msra.mxu1 %v9810_v4  ;;  %4442 = vmatprep.mubr.bf16.mxu1 %v8294_v1 }
 0x84e   : > { %4471 = vmatprep.subr.bf16.mxu1 %v9820_v41  ;;  %4589 = vmatpush1.bf16.msra.mxu0 %v9958_v34 }
 0x84f   : > { %v9964_v43 = vpop.permute.xlu1 %4542 }
 0x850   : > { %v4541_v22 = vpop.permute.xlu0 %4540  ;;  %6711 = vmatprep.subr.msk.bf16.mxu0 %vm4548_vm15, %v9964_v43 }
 0x851   : > { %v9970_v37 = vsel %vm4548_vm15, %v4541_v22, %v9964_v43  ;;  %4472 = vmatpush1.bf16.msra.mxu1 %v9818_v18 }
 0x852   : > { %4473 = vmatprep.subr.bf16.mxu1 %v9828_v31  ;;  %4591 = vmatpush1.bf16.msra.mxu0 %v9970_v37 }
 0x853   : > { %v9975_v45 = vpop.permute.xlu1 %4546 }
 0x854   : > { %v4545_v26 = vpop.permute.xlu0 %4544  ;;  %6702 = vmatmul.mubr.msk.bf16.gmra.mrb[60].mxu1 %vm2651_vm7, %v8162_v21  ;;  %6712 = vmatprep.subr.msk.bf16.mxu0 %vm4548_vm15, %v9975_v45 }
 0x855   : > { %v9982_v42 = vsel %vm4548_vm15, %v4545_v26, %v9975_v45  ;;  %4474 = vmatpush1.bf16.msra.mxu1 %v9826_v9  ;;  %4501 = vmatprep.mubr.bf16.mxu1 %v8294_v1 }
 0x856   : > { %4475 = vmatprep.subr.bf16.mxu1 %v9836_v51  ;;  %4593 = vmatpush1.bf16.msra.mxu0 %v9982_v42 }
 0x857   : > { %4655 = vmatprep.subr.bf16.mxu0 %v9812_v49 }
 0x859   : > { %4476 = vmatpush1.bf16.msra.mxu1 %v9834_v30  ;;  %6713 = vmatmul.mubr.msk.bf16.vlgmr.msra.gmra.mrb[72].mxu0 %vm2651_vm7, %v8163_v15 }
 0x85a   : > { %4656 = vmatpush1.bf16.msra.mxu0 %v9810_v4  ;;  %4733 = vmatprep.subr.bf16.mxu1 %v9907_v60 }
 0x85b   : > { %4657 = vmatprep.subr.bf16.mxu0 %v9820_v41  ;;  %4628 = vmatprep.mubr.bf16.mxu0 %v8294_v1 }
 0x85c   : > { %6705 = vmatmul.mubr.msk.bf16.vlgmr.msra.gmra.mrb[56].mxu1 %vm2651_vm7, %v8164_v28 }
 0x85d   : > { %4734 = vmatpush1.bf16.msra.mxu1 %v9904_v17  ;;  %4511 = vmatprep.mubr.bf16.mxu1 %v8294_v1 }
 0x85e   : > { %4658 = vmatpush1.bf16.msra.mxu0 %v9818_v18  ;;  %4735 = vmatprep.subr.bf16.mxu1 %v9917_v52 }
 0x85f   : > { %4659 = vmatprep.subr.bf16.mxu0 %v9828_v31 }
 0x861   : > { %6714 = vmatmul.mubr.msk.bf16.gmra.mrb[76].mxu0 %vm2651_vm7, %v8165_v44  ;;  %4736 = vmatpush1.bf16.msra.mxu1 %v9914_v50 }
 0x862   : > { %4660 = vmatpush1.bf16.msra.mxu0 %v9826_v9  ;;  %4737 = vmatprep.subr.bf16.mxu1 %v9927_v58 }
 0x863   : > { %4661 = vmatprep.subr.bf16.mxu0 %v9836_v51  ;;  %4687 = vmatprep.mubr.bf16.mxu0 %v8294_v1 }
 0x864   : > { %6706 = vmatmul.mubr.msk.bf16.gmra.mrb[60].mxu1 %vm2651_vm7, %v8166_v29 }
 0x865   : > { %4738 = vmatpush1.bf16.msra.mxu1 %v9924_v39  ;;  %4765 = vmatprep.mubr.bf16.mxu1 %v8294_v1 }
 0x866   : > { %4662 = vmatpush1.bf16.msra.mxu0 %v9834_v30  ;;  %4739 = vmatprep.subr.bf16.mxu1 %v9937_v3 }
 0x867   : > { %5105 = vmatprep.subr.bf16.mxu0 %v9812_v49 }
 0x869   : > { %6717 = vmatmul.mubr.msk.bf16.vlgmr.msra.gmra.mrb[72].mxu0 %vm2651_vm7, %v8167_v35  ;;  %4740 = vmatpush1.bf16.msra.mxu1 %v9934_v19 }
 0x86a   : > { %4802 = vmatprep.subr.bf16.mxu1 %v9812_v49  ;;  %5106 = vmatpush1.bf16.msra.mxu0 %v9810_v4  ;;  %v8170_v49 = vld [vmem:[#allocation7 + $0x28] sm:$0xff]  }
 0x86b   : > { %5107 = vmatprep.subr.bf16.mxu0 %v9820_v41  ;;  %4697 = vmatprep.mubr.bf16.mxu0 %v8294_v1 }
 0x86c   : > { %6721 = vmatmul.mubr.msk.bf16.vlgmr.msra.gmra.mrb[64].mxu1 %vm2651_vm7, %v8168_v7 }
 0x86d   : > { %4803 = vmatpush1.bf16.msra.mxu1 %v9810_v4  ;;  %4775 = vmatprep.mubr.bf16.mxu1 %v8294_v1  ;;  %v8171_v4 = vld [vmem:[#allocation7 + $0x40] sm:$0xff]  }
 0x86e   : > { %4804 = vmatprep.subr.bf16.mxu1 %v9820_v41  ;;  %5108 = vmatpush1.bf16.msra.mxu0 %v9818_v18  ;;  %v4945_v41 = vpop.permute.xlu0 %4944 }
 0x86f   : > { %5109 = vmatprep.subr.bf16.mxu0 %v9828_v31  ;;  %v4969_v40 = vsel %vm4958_vm0, %v4945_v41, 0 }
 0x870   : > { %v4981_v24 = vmul.bf16 %v4969_v40, %v9899_v46 }
 0x871   : > { %6718 = vmatmul.mubr.msk.bf16.gmra.mrb[76].mxu0 %vm2651_vm7, %v8169_v0  ;;  %4805 = vmatpush1.bf16.msra.mxu1 %v9818_v18  ;;  %v8172_v18 = vld [vmem:[#allocation7] sm:$0xff]  }
 0x872   : > { %4806 = vmatprep.subr.bf16.mxu1 %v9828_v31  ;;  %5110 = vmatpush1.bf16.msra.mxu0 %v9826_v9  ;;  %v4943_v31 = vpop.permute.xlu1 %4942 }
 0x873   : > { %5111 = vmatprep.subr.bf16.mxu0 %v9836_v51  ;;  %5137 = vmatprep.mubr.bf16.mxu0 %v8294_v1  ;;  %v4959_v33 = vsel %vm4958_vm0, %v4943_v31, %v4945_v41 }
 0x874   : > { %6722 = vmatmul.mubr.msk.bf16.gmra.mrb[68].mxu1 %vm2651_vm7, %v8170_v49  ;;  %v4980_v17 = vmul.bf16 %v4959_v33, %v9897_v27 }
 0x875   : > { %4807 = vmatpush1.bf16.msra.mxu1 %v9826_v9  ;;  %4834 = vmatprep.mubr.bf16.mxu1 %v8294_v1  ;;  %v8173_v9 = vld [vmem:[#allocation7 + $0x48] sm:$0xff]  }
 0x876   : > { %4808 = vmatprep.subr.bf16.mxu1 %v9836_v51  ;;  %5112 = vmatpush1.bf16.msra.mxu0 %v9834_v30  ;;  %v4949_v51 = vpop.permute.xlu0 %4948  ;;  %v4947_v32 = vpop.permute.xlu1 %4946 }
 0x877   : > { %v4972_v16 = vsel %vm4958_vm0, %v4949_v51, 0  ;;  %v4960_v6 = vsel %vm4958_vm0, %v4947_v32, %v4949_v51 }
 0x878   : > { %v4983_v25 = vmul.bf16 %v4972_v16, %v9899_v46  ;;  %v4982_v50 = vmul.bf16 %v4960_v6, %v9897_v27 }
 0x879   : > { %4809 = vmatpush1.bf16.msra.mxu1 %v9834_v30  ;;  %6741 = vmatmul.mubr.msk.bf16.vlgmr.msra.gmra.mrb[80].mxu0 %vm2651_vm7, %v8171_v4  ;;  %v8174_v30 = vld [vmem:[#allocation7 + $0x8] sm:$0xff]  }
 0x87a   : > { %6729 = vmatprep.subr.msk.bf16.mxu1 %vm4548_vm15, %v9939_v10  ;;  %5147 = vmatprep.mubr.bf16.mxu0 %v8294_v1  ;;  %v4953_v54 = vpop.permute.xlu0 %4952  ;;  %v4951_v60 = vpop.permute.xlu1 %4950 }
 0x87b   : > { %v4975_v63 = vsel %vm4958_vm0, %v4953_v54, 0  ;;  %v4961_v52 = vsel %vm4958_vm0, %v4951_v60, %v4953_v54 }
 0x87c   : > { %6725 = vmatmul.mubr.msk.bf16.vlgmr.msra.gmra.mrb[64].mxu1 %vm2651_vm7, %v8172_v18  ;;  %v4985_v11 = vmul.bf16 %v4975_v63, %v9899_v46  ;;  %v4984_v39 = vmul.bf16 %v4961_v52, %v9897_v27 }
 0x87d   : > { %4877 = vmatpush1.bf16.msra.mxu1 %v9946_v5  ;;  %4844 = vmatprep.mubr.bf16.mxu1 %v8294_v1 }
 0x87e   : > { %6730 = vmatprep.subr.msk.bf16.mxu1 %vm4548_vm15, %v9951_v23  ;;  %v4957_v56 = vpop.permute.xlu0 %4956  ;;  %v4955_v53 = vpop.permute.xlu1 %4954 }
 0x87f   : > { %v4978_v8 = vsel %vm4958_vm0, %v4957_v56, 0  ;;  %v4962_v58 = vsel %vm4958_vm0, %v4955_v53, %v4957_v56 }
 0x880   : > { %v4987_v61 = vmul.bf16 %v4978_v8, %v9899_v46  ;;  %v4986_v55 = vmul.bf16 %v4962_v58, %v9897_v27 }
 0x881   : > { %4879 = vmatpush1.bf16.msra.mxu1 %v9958_v34  ;;  %6742 = vmatmul.mubr.msk.bf16.gmra.mrb[84].mxu0 %vm2651_vm7, %v8173_v9 }
 0x882   : > { %6731 = vmatprep.subr.msk.bf16.mxu1 %vm4548_vm15, %v9964_v43  ;;  %5327 = vmatprep.mubr.bf16.mxu0 %v8294_v1  ;;  %v10081_v19 = vpop.permute.xlu0 %5071  ;;  %v10084_v20 = vpop.permute.xlu1 %5076 }
 0x884   : > { %6726 = vmatmul.mubr.msk.bf16.gmra.mrb[68].mxu1 %vm2651_vm7, %v8174_v30 }
 0x885   : > { %4881 = vmatpush1.bf16.msra.mxu1 %v9970_v37  ;;  %4908 = vmatprep.mubr.bf16.mxu1 %v8294_v1 }
 0x886   : > { %6732 = vmatprep.subr.msk.bf16.mxu1 %vm4548_vm15, %v9975_v45  ;;  %v10096_v35 = vpop.permute.xlu1 %5086 }
 0x889   : > { %4883 = vmatpush1.bf16.msra.mxu1 %v9982_v42  ;;  %v10091_v42 = vpop.permute.xlu0 %5081 }
 0x88a   : > { %5004 = vmatprep.subr.bf16.mxu1 %v4981_v24 }
 0x88c   : > { %6733 = vmatmul.mubr.msk.bf16.vlgmr.msra.gmra.mrb[64].mxu1 %vm2651_vm7, %v8175_v48 }
 0x88d   : > { %5005 = vmatpush1.bf16.msra.mxu1 %v4980_v17  ;;  %4918 = vmatprep.mubr.bf16.mxu1 %v8294_v1 }
 0x88e   : > { %5006 = vmatprep.subr.bf16.mxu1 %v4983_v25 }
 0x891   : > { %5007 = vmatpush1.bf16.msra.mxu1 %v4982_v50 }
 0x892   : > { %5008 = vmatprep.subr.bf16.mxu1 %v4985_v11 }
 0x894   : > { %6734 = vmatmul.mubr.msk.bf16.gmra.mrb[68].mxu1 %vm2651_vm7, %v8176_v47 }
 0x895   : > { %5009 = vmatpush1.bf16.msra.mxu1 %v4984_v39  ;;  %5036 = vmatprep.mubr.bf16.mxu1 %v8294_v1 }
 0x896   : > { %5010 = vmatprep.subr.bf16.mxu1 %v4987_v61 }
 0x899   : > { %5011 = vmatpush1.bf16.msra.mxu1 %v4986_v55 }
 0x89c   : > { %6737 = vmatmul.mubr.msk.bf16.vlgmr.msra.gmra.mrb[64].mxu1 %vm2651_vm7, %v8177_v62 }
 0x89d   : > { %5046 = vmatprep.mubr.bf16.mxu1 %v8294_v1 }
 0x8a4   : > { %6738 = vmatmul.mubr.msk.bf16.gmra.mrb[68].mxu1 %vm2651_vm7, %v8178_v2  ;;  %vm5242_vm7 = vcmask 138240  }
 0x8a5   : > { %5630 = vmatprep.mubr.bf16.mxu1 %v8294_v1 }
 0x92f   : > { %v4503_v3 = vpop.f32.mrb[56].mxu1 }
 0x930   : > { %v5170_v10 = vadd.f32 %v10081_v19, %v4503_v3  ;;  %v4505_v59 = vpop.f32.mrb[57].mxu1 }
 0x931   : > { %v5171_v5 = vadd.f32 %v10081_v19, %v4505_v59  ;;  %v4507_v23 = vpop.f32.mrb[58].mxu1 }
 0x932   : > { %v5172_v38 = vadd.f32 %v10084_v20, %v4507_v23  ;;  %v4509_v34 = vpop.f32.mrb[59].mxu1  ;;  %v5178_v22 = vmax.f32 %v5170_v10, 0.0 }
 0x933   : > { %v5173_v43 = vadd.f32 %v10084_v20, %v4509_v34  ;;  %v5179_v37 = vmax.f32 %v5171_v5, 0.0 }
 0x934   : > { %v5180_v21 = vmax.f32 %v5172_v38, 0.0 }
 0x935   : > { %v5181_v45 = vmax.f32 %v5173_v43, 0.0 }
 0x936   : > { %v10089_v26 = vpack.c.bf16 %v5180_v21, %v5178_v22 }
 0x937   : > { %v10093_v15 = vpack.c.bf16 %v5181_v45, %v5179_v37  ;;  %v4513_v28 = vpop.f32.mrb[60].mxu1 }
 0x938   : > { %v5174_v44 = vadd.f32 %v10091_v42, %v4513_v28  ;;  %v4515_v29 = vpop.f32.mrb[61].mxu1 }
 0x939   : > { %v5175_v7 = vadd.f32 %v10091_v42, %v4515_v29  ;;  %v4517_v0 = vpop.f32.mrb[62].mxu1 }
 0x93a   : > { %v5176_v49 = vadd.f32 %v10096_v35, %v4517_v0  ;;  %v4519_v4 = vpop.f32.mrb[63].mxu1  ;;  %v5182_v41 = vmax.f32 %v5174_v44, 0.0 }
 0x93b   : > { %v5177_v18 = vadd.f32 %v10096_v35, %v4519_v4  ;;  %v5183_v30 = vmax.f32 %v5175_v7, 0.0 }
 0x93c   : > { %v5184_v9 = vmax.f32 %v5176_v49, 0.0  ;;  %v4689_v31 = vpop.f32.mrb[72].mxu0 }
 0x93d   : > { %v5185_v51 = vmax.f32 %v5177_v18, 0.0  ;;  %v5190_v40 = vadd.f32 %v10081_v19, %v4689_v31  ;;  %v4691_v32 = vpop.f32.mrb[73].mxu0 }
 0x93e   : > { %v10102_v33 = vpack.c.bf16 %v5184_v9, %v5182_v41  ;;  %v5191_v24 = vadd.f32 %v10081_v19, %v4691_v32  ;;  %v4693_v54 = vpop.f32.mrb[74].mxu0 }
 0x93f   : > { %v10105_v48 = vpack.c.bf16 %v5185_v51, %v5183_v30  ;;  %v5192_v16 = vadd.f32 %v10084_v20, %v4693_v54  ;;  %v4695_v17 = vpop.f32.mrb[75].mxu0  ;;  %v5198_v6 = vmax.f32 %v5190_v40, 0.0 }
 0x940   : > { %v5193_v60 = vadd.f32 %v10084_v20, %v4695_v17  ;;  %v5199_v63 = vmax.f32 %v5191_v24, 0.0 }
 0x941   : > { %v5200_v25 = vmax.f32 %v5192_v16, 0.0 }
 0x942   : > { %v5201_v56 = vmax.f32 %v5193_v60, 0.0 }
 0x943   : > { %v10109_v50 = vpack.c.bf16 %v5200_v25, %v5198_v6 }
 0x944   : > { %v10111_v52 = vpack.c.bf16 %v5201_v56, %v5199_v63  ;;  %v4699_v11 = vpop.f32.mrb[76].mxu0 }
 0x945   : > { %v5194_v47 = vadd.f32 %v10091_v42, %v4699_v11  ;;  %v4701_v53 = vpop.f32.mrb[77].mxu0  ;;  %5271 = vrot.lane.b32.xlu0 %v10109_v50, %s8301_s18 }
 0x946   : > { %v5195_v8 = vadd.f32 %v10091_v42, %v4701_v53  ;;  %v4703_v39 = vpop.f32.mrb[78].mxu0  ;;  %5273 = vrot.lane.b32.xlu1 %v10111_v52, %s8301_s18 }
 0x947   : > { %v5196_v58 = vadd.f32 %v10096_v35, %v4703_v39  ;;  %v4705_v61 = vpop.f32.mrb[79].mxu0  ;;  %v5202_v62 = vmax.f32 %v5194_v47, 0.0 }
 0x948   : > { %v5197_v55 = vadd.f32 %v10096_v35, %v4705_v61  ;;  %v5203_v3 = vmax.f32 %v5195_v8, 0.0 }
 0x949   : > { %v5204_v2 = vmax.f32 %v5196_v58, 0.0  ;;  %5446 = vrot.lane.b32.xlu0 %v10109_v50, %s8308_s28 }
 0x94a   : > { %v5205_v10 = vmax.f32 %v5197_v55, 0.0  ;;  %5448 = vrot.lane.b32.xlu1 %v10111_v52, %s8308_s28 }
 0x94b   : > { %v10123_v59 = vpack.c.bf16 %v5204_v2, %v5202_v62 }
 0x94c   : > { %v10125_v5 = vpack.c.bf16 %v5205_v10, %v5203_v3  ;;  %v5139_v23 = vpop.f32.mrb[80].mxu0 }
 0x94d   : > { %v5140_v38 = vadd.f32 %v5139_v23, %v10081_v19  ;;  %v5141_v34 = vpop.f32.mrb[81].mxu0  ;;  %5275 = vrot.lane.b32.xlu0 %v10123_v59, %s8301_s18 }
 0x94e   : > { %v5142_v43 = vadd.f32 %v5141_v34, %v10081_v19  ;;  %v5143_v22 = vpop.f32.mrb[82].mxu0  ;;  %5277 = vrot.lane.b32.xlu1 %v10125_v5, %s8301_s18 }
 0x94f   : > { %v5144_v21 = vadd.f32 %v5143_v22, %v10084_v20  ;;  %v5145_v37 = vpop.f32.mrb[83].mxu0  ;;  %v5158_v28 = vmax.f32 %v5140_v38, 0.0 }
 0x950   : > { %v5146_v45 = vadd.f32 %v5145_v37, %v10084_v20  ;;  %v5159_v29 = vmax.f32 %v5142_v43, 0.0 }
 0x951   : > { %v5160_v44 = vmax.f32 %v5144_v21, 0.0  ;;  %5450 = vrot.lane.b32.xlu0 %v10123_v59, %s8308_s28 }
 0x952   : > { %v5161_v7 = vmax.f32 %v5146_v45, 0.0  ;;  %5452 = vrot.lane.b32.xlu1 %v10125_v5, %s8308_s28 }
 0x953   : > { %v10137_v0 = vpack.c.bf16 %v5160_v44, %v5158_v28 }
 0x954   : > { %v10139_v49 = vpack.c.bf16 %v5161_v7, %v5159_v29  ;;  %v5149_v4 = vpop.f32.mrb[84].mxu0 }
 0x955   : > { %v5150_v18 = vadd.f32 %v5149_v4, %v10091_v42  ;;  %v5151_v41 = vpop.f32.mrb[85].mxu0 }
 0x956   : > { %v5152_v9 = vadd.f32 %v5151_v41, %v10091_v42  ;;  %v5153_v31 = vpop.f32.mrb[86].mxu0  ;;  %5598 = vmatprep.subr.bf16.mxu1 %v10139_v49 }
 0x957   : > { %v5154_v30 = vadd.f32 %v5153_v31, %v10096_v35  ;;  %v5155_v51 = vpop.f32.mrb[87].mxu0  ;;  %5599 = vmatpush1.bf16.msra.mxu1 %v10137_v0  ;;  %v5162_v32 = vmax.f32 %v5150_v18, 0.0 }
 0x958   : > { %v5156_v40 = vadd.f32 %v5155_v51, %v10096_v35  ;;  %v5163_v54 = vmax.f32 %v5152_v9, 0.0  ;;  %v6745_v51 = vld [vmem:[%s10443_s11 + $0x2] sm:$0x3] }
 0x959   : > { %v5164_v24 = vmax.f32 %v5154_v30, 0.0 }
 0x95a   : > { %v5165_v16 = vmax.f32 %v5156_v40, 0.0 }
 0x95b   : > { %v10147_v17 = vpack.c.bf16 %v5164_v24, %v5162_v32  ;;  %v6744_v32 = vsel %vm5255_vm3, 1.0, %v8299_v14 }
 0x95c   : > { %v10149_v60 = vpack.c.bf16 %v5165_v16, %v5163_v54  ;;  %v6743_v54 = vsel %vm5254_vm6, 1.0, %v8299_v14  ;;  %v10263_v16 = vpack.c.bf16 %v6744_v32, %v6744_v32 }
 0x95e   : > { %5600 = vmatprep.subr.bf16.mxu1 %v10149_v60 }
 0x95f   : > { %5601 = vmatpush1.bf16.msra.mxu1 %v10147_v17 }
 0x96f   : > { %v5038_v6 = vpop.f32.mrb[64].mxu1 }
 0x970   : > { %v5210_v25 = vadd.f32 %v10081_v19, %v5038_v6  ;;  %v5040_v63 = vpop.f32.mrb[65].mxu1 }
 0x971   : > { %v5211_v56 = vadd.f32 %v10081_v19, %v5040_v63  ;;  %v5042_v11 = vpop.f32.mrb[66].mxu1 }
 0x972   : > { %v5212_v47 = vadd.f32 %v10084_v20, %v5042_v11  ;;  %v5044_v53 = vpop.f32.mrb[67].mxu1  ;;  %v5218_v39 = vmax.f32 %v5210_v25, 0.0 }
 0x973   : > { %v5213_v8 = vadd.f32 %v10084_v20, %v5044_v53  ;;  %v5219_v61 = vmax.f32 %v5211_v56, 0.0 }
 0x974   : > { %v5220_v58 = vmax.f32 %v5212_v47, 0.0 }
 0x975   : > { %v5221_v55 = vmax.f32 %v5213_v8, 0.0 }
 0x976   : > { %v10157_v62 = vpack.c.bf16 %v5220_v58, %v5218_v39 }
 0x977   : > { %v10159_v2 = vpack.c.bf16 %v5221_v55, %v5219_v61  ;;  %v5048_v3 = vpop.f32.mrb[68].mxu1  ;;  %v5266_v55 = vld [vmem:[%s10443_s11] sm:$0x3] }
 0x978   : > { %v5214_v10 = vadd.f32 %v10091_v42, %v5048_v3  ;;  %v5050_v23 = vpop.f32.mrb[69].mxu1  ;;  %5234 = vrot.lane.b32.xlu0 %v10157_v62, %s8309_s29 }
 0x979   : > { %v5215_v19 = vadd.f32 %v10091_v42, %v5050_v23  ;;  %v5052_v38 = vpop.f32.mrb[70].mxu1  ;;  %5236 = vrot.lane.b32.xlu1 %v10159_v2, %s8309_s29 }
 0x97a   : > { %v5216_v20 = vadd.f32 %v10096_v35, %v5052_v38  ;;  %v5054_v34 = vpop.f32.mrb[71].mxu1  ;;  %v5222_v22 = vmax.f32 %v5214_v10, 0.0 }
 0x97b   : > { %v5217_v43 = vadd.f32 %v10096_v35, %v5054_v34  ;;  %v5223_v37 = vmax.f32 %v5215_v19, 0.0  ;;  %v6762_v35 = vld [vmem:[%s10443_s11 + $0xa] sm:$0x3] }
 0x97c   : > { %v5224_v21 = vmax.f32 %v5216_v20, 0.0  ;;  %5380 = vrot.lane.b32.xlu0 %v10157_v62, %s8301_s18  ;;  %6763 = vmatmul.mubr.msk.bf16.vlgmr.msra.gmra.mrb[72].mxu1 %vm2481_vm5, %v6762_v35 }
 0x97d   : > { %v5225_v45 = vmax.f32 %v5217_v43, 0.0  ;;  %5382 = vrot.lane.b32.xlu1 %v10159_v2, %s8301_s18  ;;  %5752 = vmatprep.mubr.bf16.mxu1 %v8294_v1 }
 0x97e   : > { %v10171_v28 = vpack.c.bf16 %v5224_v21, %v5222_v22  ;;  %v6752_v22 = vld [vmem:[%s10443_s11 + $0x4] sm:$0x3] }
 0x97f   : > { %v10173_v42 = vpack.c.bf16 %v5225_v45, %v5223_v37 }
 0x980   : > { %5238 = vrot.lane.b32.xlu0 %v10171_v28, %s8309_s29 }
 0x981   : > { %5240 = vrot.lane.b32.xlu1 %v10173_v42, %s8309_s29 }
 0x984   : > { %5521 = vrot.lane.b32.xlu0 %v10089_v26, %s8310_s15 }
 0x985   : > { %5523 = vrot.lane.b32.xlu1 %v10093_v15, %s8310_s15 }
 0x988   : > { %5384 = vrot.lane.b32.xlu0 %v10171_v28, %s8301_s18 }
 0x989   : > { %5386 = vrot.lane.b32.xlu1 %v10173_v42, %s8301_s18  ;;  %s8311_s18 = smov 113  }
 0x98c   : > { %5525 = vrot.lane.b32.xlu0 %v10102_v33, %s8310_s15 }
 0x98d   : > { %5527 = vrot.lane.b32.xlu1 %v10105_v48, %s8310_s15 }
 0x990   : > { %5695 = vrot.lane.b32.xlu0 %v10139_v49, %s8296_s12 }
 0x991   : > { %5693 = vrot.lane.b32.xlu1 %v10137_v0, %s8296_s12 }
 0x994   : > { %5699 = vrot.lane.b32.xlu0 %v10149_v60, %s8296_s12 }
 0x995   : > { %5697 = vrot.lane.b32.xlu1 %v10147_v17, %s8296_s12 }
 0x998   : > { %5763 = vrot.lane.b32.xlu0 %v10157_v62, %s8310_s15 }
 0x999   : > { %5765 = vrot.lane.b32.xlu1 %v10159_v2, %s8310_s15 }
 0x99c   : > { %5767 = vrot.lane.b32.xlu0 %v10171_v28, %s8310_s15 }
 0x99d   : > { %5929 = vrot.lane.b32.xlu1 %v10109_v50, %s8296_s12 }
 0x9a0   : > { %5931 = vrot.lane.b32.xlu0 %v10111_v52, %s8296_s12 }
 0x9a1   : > { %5933 = vrot.lane.b32.xlu1 %v10123_v59, %s8296_s12 }
 0x9a4   : > { %5935 = vrot.lane.b32.xlu0 %v10125_v5, %s8296_s12 }
 0x9a5   : > { %5999 = vrot.lane.b32.xlu1 %v10089_v26, %s8311_s18 }
 0x9a8   : > { %6001 = vrot.lane.b32.xlu0 %v10093_v15, %s8311_s18 }
 0x9a9   : > { %5769 = vrot.lane.b32.xlu1 %v10173_v42, %s8310_s15  ;;  %s6791_s15 = sshll.u32 %s10462_s30, 3 }
 0x9ac   : > { %6005 = vrot.lane.b32.xlu0 %v10105_v48, %s8311_s18 }
 0x9ad   : > { %6003 = vrot.lane.b32.xlu1 %v10102_v33, %s8311_s18  ;;  %s480_s18 = scalar_lea.vmem %s10445_s13, %s6791_s15 }
 0x9b0   : > { %6071 = vrot.lane.b32.xlu0 %v10137_v0, %s8306_s17 }
 0x9b1   : > { %6073 = vrot.lane.b32.xlu1 %v10139_v49, %s8306_s17 }
 0x9b4   : > { %6075 = vrot.lane.b32.xlu0 %v10147_v17, %s8306_s17 }
 0x9b5   : > { %6077 = vrot.lane.b32.xlu1 %v10149_v60, %s8306_s17 }
 0x9b7   : > { %v5272_v44 = vpop.permute.xlu0 %5271 }
 0x9b8   : > { %6205 = vrot.lane.b32.xlu0 %v10139_v49, %s8307_s27  ;;  %v5274_v29 = vpop.permute.xlu1 %5273 }
 0x9b9   : > { %6137 = vrot.lane.b32.xlu1 %v10089_v26, %s8306_s17  ;;  %v5280_v4 = vsel %vm2464_vm4, %v5272_v44, %v5274_v29 }
 0x9ba   : > { %5295 = vmatprep.subr.bf16.mxu0 %v5280_v4 }
 0x9bb   : > { %v5447_v18 = vpop.permute.xlu0 %5446  ;;  %6747 = vmatpush1.bf16.msk.msra.mxu0 %vm10225_vm2, %v5272_v44 }
 0x9bc   : > { %6139 = vrot.lane.b32.xlu0 %v10093_v15, %s8306_s17  ;;  %v5449_v49 = vpop.permute.xlu1 %5448  ;;  %v5460_v38 = vsel %vm837_vm1, 0, %v5447_v18 }
 0x9bd   : > { %v10237_v41 = vsel %vm837_vm1, %v5447_v18, %v5449_v49  ;;  %6203 = vrot.lane.b32.xlu1 %v10137_v0, %s8307_s27  ;;  %v6788_v0 = vld [vmem:[#allocation2] ss:$0 sm:$0xff]  ;;  %v5465_v21 = vmul.bf16 %v5460_v38, %v9897_v27 }
 0x9be   : > { %v5466_v20 = vmul.bf16 %v10237_v41, %v9899_v46 }
 0x9bf   : > { %v5276_v9 = vpop.permute.xlu0 %5275 }
 0x9c0   : > { %6209 = vrot.lane.b32.xlu0 %v10149_v60, %s8307_s27  ;;  %v5278_v31 = vpop.permute.xlu1 %5277 }
 0x9c1   : > { %6141 = vrot.lane.b32.xlu1 %v10102_v33, %s8306_s17  ;;  %v5281_v30 = vsel %vm2464_vm4, %v5276_v9, %v5278_v31 }
 0x9c2   : > { %5297 = vmatprep.subr.bf16.mxu0 %v5281_v30 }
 0x9c3   : > { %6749 = vmatpush1.bf16.msk.msra.mxu0 %vm10225_vm2, %v5276_v9  ;;  %v5451_v40 = vpop.permute.xlu0 %5450 }
 0x9c4   : > { %6143 = vrot.lane.b32.xlu0 %v10105_v48, %s8306_s17  ;;  %v5453_v24 = vpop.permute.xlu1 %5452  ;;  %v5463_v45 = vsel %vm837_vm1, 0, %v5451_v40 }
 0x9c5   : > { %6207 = vrot.lane.b32.xlu1 %v10147_v17, %s8307_s27  ;;  %v10265_v17 = vpack.c.bf16 %v6743_v54, %v6743_v54  ;;  %v5456_v43 = vsel %vm837_vm1, %v5451_v40, %v5453_v24  ;;  %v5467_v41 = vmul.bf16 %v5463_v45, %v9897_v27  ;;  %v6758_v54 = vld [vmem:[%s10443_s11 + $0x6] sm:$0x3]  ;;  %vm6007_vm1 = vcmask 924672  }
 0x9c6   : > { %6750 = vmatmul.mubr.msk.bf16.vlgmr.msra.gmra.mrb[88].mxu0 %vm2481_vm5, %v6745_v51  ;;  %v5468_v35 = vmul.bf16 %v5456_v43, %v9899_v46  ;;  %v6774_v43 = vld [vmem:[%s10443_s11 + $0x16] sm:$0x3] }
 0x9c7   : > { %5371 = vmatprep.mubr.bf16.mxu0 %v8294_v1 }
 0x9c8   : > { %6280 = vperm.xlu0 %7960, %v6788_v0  }
 0x9ea   : > { %v5235_v60 = vpop.permute.xlu0 %5234 }
 0x9eb   : > { %v5249_v6 = vsel %vm5242_vm7, 0, %v5235_v60  ;;  %v5237_v25 = vpop.permute.xlu1 %5236 }
 0x9ec   : > { %v5243_v36 = vsel %vm5242_vm7, %v5235_v60, %v5237_v25  ;;  %v5262_v57 = vmul.bf16 %v10265_v17, %v5249_v6 }
 0x9ed   : > { %v5263_v12 = vmul.bf16 %v10263_v16, %v5243_v36 }
 0x9ee   : > { %v5381_v13 = vpop.permute.xlu0 %5380 }
 0x9ef   : > { %5339 = vmatprep.subr.bf16.mxu0 %v5263_v12  ;;  %v5383_v63 = vpop.permute.xlu1 %5382 }
 0x9f0   : > { %5340 = vmatpush1.bf16.msra.mxu0 %v5262_v57  ;;  %v5388_v61 = vsel %vm2464_vm4, %v5381_v13, %v5383_v63 }
 0x9f2   : > { %v5239_v14 = vpop.permute.xlu0 %5238 }
 0x9f3   : > { %v5252_v56 = vsel %vm5242_vm7, 0, %v5239_v14  ;;  %v5241_v11 = vpop.permute.xlu1 %5240 }
 0x9f4   : > { %v5244_v47 = vsel %vm5242_vm7, %v5239_v14, %v5241_v11  ;;  %v5264_v8 = vmul.bf16 %v10265_v17, %v5252_v56 }
 0x9f5   : > { %v5265_v53 = vmul.bf16 %v10263_v16, %v5244_v47 }
 0x9f6   : > { %v5522_v39 = vpop.permute.xlu0 %5521 }
 0x9f7   : > { %5341 = vmatprep.subr.bf16.mxu0 %v5265_v53  ;;  %v5524_v58 = vpop.permute.xlu1 %5523 }
 0x9f8   : > { %5342 = vmatpush1.bf16.msra.mxu0 %v5264_v8 }
 0x9f9   : > { %5403 = vmatprep.subr.bf16.mxu0 %v5388_v61 }
 0x9fa   : > { %v5385_v3 = vpop.permute.xlu0 %5384 }
 0x9fb   : > { %6751 = vmatmul.mubr.msk.bf16.vlgmr.msra.gmra.mrb[92].mxu0 %vm2481_vm5, %v5266_v55  ;;  %v5387_v10 = vpop.permute.xlu1 %5386 }
 0x9fc   : > { %6754 = vmatpush1.bf16.msk.msra.mxu0 %vm10225_vm2, %v5381_v13  ;;  %v5389_v23 = vsel %vm2464_vm4, %v5385_v3, %v5387_v10  ;;  %5435 = vmatprep.mubr.bf16.mxu0 %v8294_v1  ;;  %vm5529_vm4 = vcmask 7168   ;;  %v6766_v13 = vld [vmem:[%s10443_s11 + $0xe] sm:$0x3] }
 0x9fd   : > { %5405 = vmatprep.subr.bf16.mxu0 %v5389_v23  ;;  %v5530_v7 = vsel %vm5529_vm4, %v5522_v39, %v5524_v58  ;;  %v5536_v31 = vsel %vm5529_vm4, 0, %v5522_v39  ;;  %v6764_v23 = vld [vmem:[%s10443_s11 + $0xc] sm:$0x3] }
 0x9fe   : > { %v5526_v19 = vpop.permute.xlu0 %5525  ;;  %v5542_v30 = vmul.bf16 %v5530_v7, %v10263_v16  ;;  %v5541_v6 = vmul.bf16 %v5536_v31, %v10265_v17 }
 0x9ff   : > { %v5528_v34 = vpop.permute.xlu1 %5527  ;;  %v5539_v36 = vsel %vm5529_vm4, 0, %v5526_v19 }
 0xa00   : > { %6756 = vmatpush1.bf16.msk.msra.mxu0 %vm10225_vm2, %v5385_v3  ;;  %v5531_v40 = vsel %vm5529_vm4, %v5526_v19, %v5528_v34  ;;  %v5543_v63 = vmul.bf16 %v5539_v36, %v10265_v17 }
 0xa01   : > { %5474 = vmatprep.subr.bf16.mxu0 %v5466_v20  ;;  %v5544_v12 = vmul.bf16 %v5531_v40, %v10263_v16 }
 0xa02   : > { %v5696_v37 = vpop.permute.xlu0 %5695 }
 0xa03   : > { %v5706_v44 = vsel %vm4321_vm14, %v5696_v37, 0  ;;  %6757 = vmatmul.mubr.msk.bf16.vlgmr.msra.gmra.mrb[96].mxu0 %vm2481_vm5, %v6752_v22  ;;  %v5694_v29 = vpop.permute.xlu1 %5693 }
 0xa04   : > { %v5712_v4 = vmul.bf16 %v5706_v44, %v9899_v46  ;;  %v5701_v18 = vsel %vm4321_vm14, %v5694_v29, %v5696_v37  ;;  %5475 = vmatpush1.bf16.msra.mxu0 %v5465_v21  ;;  %5506 = vmatprep.mubr.bf16.mxu0 %v8294_v1 }
 0xa05   : > { %v5711_v49 = vmul.bf16 %v5701_v18, %v9897_v27  ;;  %5476 = vmatprep.subr.bf16.mxu0 %v5468_v35  ;;  %v6768_v35 = vld [vmem:[%s10443_s11 + $0x10] sm:$0x3] }
 0xa06   : > { %v5700_v9 = vpop.permute.xlu0 %5699  ;;  %5720 = vmatprep.subr.bf16.mxu1 %v5712_v4 }
 0xa07   : > { %v5709_v51 = vsel %vm4321_vm14, %v5700_v9, 0  ;;  %5721 = vmatpush1.bf16.msra.mxu1 %v5711_v49  ;;  %v5698_v0 = vpop.permute.xlu1 %5697 }
 0xa08   : > { %v5714_v32 = vmul.bf16 %v5709_v51, %v9899_v46  ;;  %v5702_v24 = vsel %vm4321_vm14, %v5698_v0, %v5700_v9  ;;  %5477 = vmatpush1.bf16.msra.mxu0 %v5467_v41  ;;  %v6778_v51 = vld [vmem:[%s10443_s11 + $0x1a] sm:$0x3] }
 0xa09   : > { %v5713_v60 = vmul.bf16 %v5702_v24, %v9897_v27  ;;  %5550 = vmatprep.subr.bf16.mxu0 %v5542_v30 }
 0xa0a   : > { %v5764_v25 = vpop.permute.xlu0 %5763  ;;  %5722 = vmatprep.subr.bf16.mxu1 %v5714_v32 }
 0xa0b   : > { %6759 = vmatmul.mubr.msk.bf16.vlgmr.msra.gmra.mrb[100].mxu0 %vm2481_vm5, %v6758_v54  ;;  %5723 = vmatpush1.bf16.msra.mxu1 %v5713_v60  ;;  %v5766_v57 = vpop.permute.xlu1 %5765 }
 0xa0c   : > { %5551 = vmatpush1.bf16.msra.mxu0 %v5541_v6  ;;  %5838 = vmatprep.subr.bf16.mxu1 %v10111_v52  ;;  %v6760_v52 = vld [vmem:[%s10443_s11 + $0x8] sm:$0x3]  ;;  %v5771_v8 = vsel %vm5529_vm4, %v5764_v25, %v5766_v57 }
 0xa0d   : > { %5552 = vmatprep.subr.bf16.mxu0 %v5544_v12  ;;  %5582 = vmatprep.mubr.bf16.mxu0 %v8294_v1  ;;  %v5782_v61 = vmul.bf16 %v5771_v8, %v10263_v16 }
 0xa0e   : > { %v5768_v14 = vpop.permute.xlu0 %5767  ;;  %6767 = vmatmul.mubr.msk.bf16.vlgmr.msra.gmra.mrb[76].mxu1 %vm2481_vm5, %v6766_v13 }
 0xa0f   : > { %5839 = vmatpush1.bf16.msra.mxu1 %v10109_v50  ;;  %v5930_v56 = vpop.permute.xlu1 %5929  ;;  %5870 = vmatprep.mubr.bf16.mxu1 %v8294_v1  ;;  %v5779_v20 = vsel %vm5529_vm4, 0, %v5768_v14 }
 0xa10   : > { %5553 = vmatpush1.bf16.msra.mxu0 %v5543_v63  ;;  %5840 = vmatprep.subr.bf16.mxu1 %v10125_v5  ;;  %v6770_v5 = vld [vmem:[%s10443_s11 + $0x12] sm:$0x3]  ;;  %v5783_v21 = vmul.bf16 %v5779_v20, %v10265_v17 }
 0xa11   : > { %5646 = vmatprep.subr.bf16.mxu0 %v10093_v15 }
 0xa12   : > { %v5932_v11 = vpop.permute.xlu0 %5931 }
 0xa13   : > { %v5937_v47 = vsel %vm4321_vm14, %v5930_v56, %v5932_v11  ;;  %v5942_v53 = vsel %vm4321_vm14, %v5932_v11, 0  ;;  %6761 = vmatmul.mubr.msk.bf16.vlgmr.msra.gmra.mrb[104].mxu0 %vm2481_vm5, %v6760_v52  ;;  %5841 = vmatpush1.bf16.msra.mxu1 %v10123_v59  ;;  %v5934_v50 = vpop.permute.xlu1 %5933  ;;  %v5776_v59 = vsel %vm5529_vm4, 0, %v5764_v25  ;;  %v6776_v25 = vld [vmem:[%s10443_s11 + $0x18] sm:$0x3] }
 0xa14   : > { %v5947_v39 = vmul.bf16 %v5937_v47, %v9897_v27  ;;  %v5948_v15 = vmul.bf16 %v5942_v53, %v9899_v46  ;;  %5647 = vmatpush1.bf16.msra.mxu0 %v10089_v26  ;;  %5678 = vmatprep.mubr.bf16.mxu0 %v8294_v1  ;;  %v5781_v19 = vmul.bf16 %v5776_v59, %v10265_v17  ;;  %v6782_v47 = vld [vmem:[%s10443_s11 + $0x1c] sm:$0x3] }
 0xa15   : > { %5648 = vmatprep.subr.bf16.mxu0 %v10105_v48 }
 0xa16   : > { %v5936_v58 = vpop.permute.xlu0 %5935  ;;  %5956 = vmatprep.subr.bf16.mxu1 %v5948_v15  ;;  %6771 = vmatmul.mubr.msk.bf16.vlgmr.msra.gmra.mrb[80].mxu1 %vm2481_vm5, %v6770_v5 }
 0xa17   : > { %v5938_v55 = vsel %vm4321_vm14, %v5934_v50, %v5936_v58  ;;  %v5945_v3 = vsel %vm4321_vm14, %v5936_v58, 0  ;;  %5957 = vmatpush1.bf16.msra.mxu1 %v5947_v39  ;;  %v6000_v10 = vpop.permute.xlu1 %5999  ;;  %5988 = vmatprep.mubr.bf16.mxu1 %v8294_v1 }
 0xa18   : > { %v5949_v26 = vmul.bf16 %v5938_v55, %v9897_v27  ;;  %v5950_v48 = vmul.bf16 %v5945_v3, %v9899_v46  ;;  %5649 = vmatpush1.bf16.msra.mxu0 %v10102_v33 }
 0xa19   : > { %5790 = vmatprep.subr.bf16.mxu0 %v5782_v61 }
 0xa1a   : > { %v6002_v38 = vpop.permute.xlu0 %6001  ;;  %5958 = vmatprep.subr.bf16.mxu1 %v5950_v48 }
 0xa1b   : > { %6765 = vmatmul.mubr.msk.bf16.vlgmr.msra.gmra.mrb[108].mxu0 %vm2481_vm5, %v6764_v23  ;;  %5959 = vmatpush1.bf16.msra.mxu1 %v5949_v26  ;;  %v5770_v34 = vpop.permute.xlu1 %5769  ;;  %v6014_v7 = vsel %vm6007_vm1, %v6002_v38, 0 }
 0xa1c   : > { %v5772_v33 = vsel %vm5529_vm4, %v5768_v14, %v5770_v34  ;;  %5791 = vmatpush1.bf16.msra.mxu0 %v5781_v19  ;;  %5822 = vmatprep.mubr.bf16.mxu0 %v8294_v1  ;;  %v6020_v49 = vmul.bf16 %v6014_v7, %v10263_v16 }
 0xa1d   : > { %v5784_v22 = vmul.bf16 %v5772_v33, %v10263_v16 }
 0xa1e   : > { %v6006_v37 = vpop.permute.xlu0 %6005  ;;  %6775 = vmatmul.mubr.msk.bf16.vlgmr.msra.gmra.mrb[84].mxu1 %vm2481_vm5, %v6774_v43 }
 0xa1f   : > { %5792 = vmatprep.subr.bf16.mxu0 %v5784_v22  ;;  %v6004_v45 = vpop.permute.xlu1 %6003  ;;  %6126 = vmatprep.mubr.bf16.mxu1 %v8294_v1  ;;  %v6017_v9 = vsel %vm6007_vm1, %v6006_v37, 0 }
 0xa20   : > { %5793 = vmatpush1.bf16.msra.mxu0 %v5783_v21  ;;  %v6022_v0 = vmul.bf16 %v6017_v9, %v10263_v16  ;;  %v6009_v40 = vsel %vm6007_vm1, %v6004_v45, %v6006_v37 }
 0xa21   : > { %5886 = vmatprep.subr.bf16.mxu0 %v10159_v2  ;;  %v6008_v2 = vsel %vm6007_vm1, %v6000_v10, %v6002_v38  ;;  %v6021_v54 = vmul.bf16 %v6009_v40, %v10265_v17 }
 0xa22   : > { %v6072_v44 = vpop.permute.xlu0 %6071 }
 0xa23   : > { %6769 = vmatmul.mubr.msk.bf16.vlgmr.msra.gmra.mrb[112].mxu0 %vm2481_vm5, %v6768_v35  ;;  %v6074_v29 = vpop.permute.xlu1 %6073 }
 0xa24   : > { %v6079_v4 = vsel %vm4548_vm15, %v6072_v44, %v6074_v29  ;;  %5887 = vmatpush1.bf16.msra.mxu0 %v10157_v62  ;;  %6779 = vmatprep.subr.msk.bf16.mxu1 %vm4548_vm15, %v6074_v29  ;;  %v6772_v62 = vld [vmem:[%s10443_s11 + $0x14] sm:$0x3] }
 0xa25   : > { %5888 = vmatprep.subr.bf16.mxu0 %v10173_v42  ;;  %6095 = vmatpush1.bf16.msra.mxu1 %v6079_v4  ;;  %v6019_v42 = vmul.bf16 %v6008_v2, %v10265_v17 }
 0xa26   : > { %v6076_v18 = vpop.permute.xlu0 %6075  ;;  %5918 = vmatprep.mubr.bf16.mxu0 %v8294_v1 }
 0xa27   : > { %v6078_v41 = vpop.permute.xlu1 %6077 }
 0xa28   : > { %v6080_v31 = vsel %vm4548_vm15, %v6076_v18, %v6078_v41  ;;  %5889 = vmatpush1.bf16.msra.mxu0 %v10171_v28  ;;  %6780 = vmatprep.subr.msk.bf16.mxu1 %vm4548_vm15, %v6078_v41 }
 0xa29   : > { %6028 = vmatprep.subr.bf16.mxu0 %v6020_v49  ;;  %6097 = vmatpush1.bf16.msra.mxu1 %v6080_v31 }
 0xa2a   : > { %v6206_v30 = vpop.permute.xlu0 %6205 }
 0xa2b   : > { %v6216_v28 = vsel %vm4958_vm0, %v6206_v30, 0  ;;  %6773 = vmatmul.mubr.msk.bf16.vlgmr.msra.gmra.mrb[116].mxu0 %vm2481_vm5, %v6772_v62  ;;  %v6138_v32 = vpop.permute.xlu1 %6137 }
 0xa2c   : > { %v6222_v24 = vmul.bf16 %v6216_v28, %v9899_v46  ;;  %6029 = vmatpush1.bf16.msra.mxu0 %v6019_v42  ;;  %6060 = vmatprep.mubr.bf16.mxu0 %v8294_v1 }
 0xa2d   : > { %6030 = vmatprep.subr.bf16.mxu0 %v6022_v0  ;;  %6781 = vmatmul.mubr.msk.bf16.vlgmr.msra.gmra.mrb[88].mxu1 %vm2481_vm5, %v6778_v51 }
 0xa2e   : > { %v6140_v60 = vpop.permute.xlu0 %6139  ;;  %6230 = vmatprep.subr.bf16.mxu1 %v6222_v24  ;;  %6262 = vmatprep.mubr.bf16.mxu1 %v8294_v1 }
 0xa2f   : > { %v6204_v16 = vpop.permute.xlu1 %6203  ;;  %v6145_v57 = vsel %vm4548_vm15, %v6138_v32, %v6140_v60 }
 0xa30   : > { %v6211_v6 = vsel %vm4958_vm0, %v6204_v16, %v6206_v30  ;;  %6031 = vmatpush1.bf16.msra.mxu0 %v6021_v54 }
 0xa31   : > { %v6221_v36 = vmul.bf16 %v6211_v6, %v9897_v27  ;;  %6783 = vmatprep.subr.msk.bf16.mxu0 %vm4548_vm15, %v6140_v60 }
 0xa32   : > { %v6210_v12 = vpop.permute.xlu0 %6209 }
 0xa33   : > { %v6219_v17 = vsel %vm4958_vm0, %v6210_v12, 0  ;;  %6777 = vmatmul.mubr.msk.bf16.vlgmr.msra.gmra.mrb[120].mxu0 %vm2481_vm5, %v6776_v25  ;;  %6231 = vmatpush1.bf16.msra.mxu1 %v6221_v36  ;;  %v6142_v13 = vpop.permute.xlu1 %6141 }
 0xa34   : > { %v6224_v63 = vmul.bf16 %v6219_v17, %v9899_v46  ;;  %6161 = vmatpush1.bf16.msra.mxu0 %v6145_v57  ;;  %6192 = vmatprep.mubr.bf16.mxu0 %v8294_v1  ;;  %v6786_v1 = vld [vmem:[%s10443_s11 + $0x1e] sm:$0x3] }
 0xa36   : > { %v6144_v14 = vpop.permute.xlu0 %6143  ;;  %6232 = vmatprep.subr.bf16.mxu1 %v6224_v63 }
 0xa37   : > { %v6146_v56 = vsel %vm4548_vm15, %v6142_v13, %v6144_v14  ;;  %6784 = vmatprep.subr.msk.bf16.mxu0 %vm4548_vm15, %v6144_v14  ;;  %v6208_v52 = vpop.permute.xlu1 %6207 }
 0xa38   : > { %v6212_v11 = vsel %vm4958_vm0, %v6208_v52, %v6210_v12  ;;  %6163 = vmatpush1.bf16.msra.mxu0 %v6146_v56 }
 0xa39   : > { %v6223_v53 = vmul.bf16 %v6212_v11, %v9897_v27 }
 0xa3b   : > { %6785 = vmatmul.mubr.msk.bf16.vlgmr.msra.gmra.mrb[124].mxu0 %vm2481_vm5, %v6782_v47  ;;  %6233 = vmatpush1.bf16.msra.mxu1 %v6223_v53 }
 0xa3e   : > { %6787 = vmatmul.mubr.msk.bf16.vlgmr.msra.gmra.mrb[92].mxu1 %vm2481_vm5, %v6786_v1 }
 0xa4f   : > { %v5632_v46 = vpop.f32.mrb[72].mxu1 }
 0xa50   : > { %v5634_v50 = vpop.f32.mrb[73].mxu1 }
 0xa51   : > { %v5636_v5 = vpop.f32.mrb[74].mxu1 }
 0xa52   : > { %v5637_v8 = vpop.f32.mrb[75].mxu1 }
 0xa99   : > { %v5329_v39 = vpop.f32.mrb[88].mxu0 }
 0xa9a   : > { %v5331_v15 = vpop.f32.mrb[89].mxu0 }
 0xa9b   : > { %v5333_v58 = vpop.f32.mrb[90].mxu0 }
 0xa9c   : > { %v5334_v59 = vpop.f32.mrb[91].mxu0 }
 0xace   : > { %v5373_v61 = vpop.f32.mrb[92].mxu0 }
 0xacf   : > { %v5374_v55 = vadd.f32 %v5373_v61, %v5329_v39  ;;  %v5375_v27 = vpop.f32.mrb[93].mxu0 }
 0xad0   : > { %v5376_v3 = vadd.f32 %v5375_v27, %v5331_v15  ;;  %v5377_v10 = vpop.f32.mrb[94].mxu0 }
 0xad1   : > { %v5378_v26 = vpop.f32.mrb[95].mxu0 }
 0xad6   : > { %v5437_v48 = vpop.f32.mrb[96].mxu0 }
 0xad7   : > { %v5444_v23 = vadd.f32 %v5437_v48, %v5374_v55  ;;  %v5439_v19 = vpop.f32.mrb[97].mxu0 }
 0xad8   : > { %v5445_v38 = vadd.f32 %v5439_v19, %v5376_v3  ;;  %v5441_v20 = vpop.f32.mrb[98].mxu0 }
 0xad9   : > { %v5442_v34 = vpop.f32.mrb[99].mxu0 }
 0xade   : > { %v5508_v43 = vpop.f32.mrb[100].mxu0 }
 0xadf   : > { %v5515_v33 = vadd.f32 %v5508_v43, %v5444_v23  ;;  %v5510_v22 = vpop.f32.mrb[101].mxu0 }
 0xae0   : > { %v5516_v21 = vadd.f32 %v5510_v22, %v5445_v38  ;;  %v5512_v37 = vpop.f32.mrb[102].mxu0 }
 0xae1   : > { %v5513_v45 = vpop.f32.mrb[103].mxu0  ;;  %v5754_v35 = vpop.f32.mrb[76].mxu1 }
 0xae2   : > { %v5756_v44 = vpop.f32.mrb[77].mxu1 }
 0xae3   : > { %v5758_v29 = vpop.f32.mrb[78].mxu1 }
 0xae4   : > { %v5759_v7 = vpop.f32.mrb[79].mxu1 }
 0xae6   : > { %v5584_v4 = vpop.f32.mrb[104].mxu0 }
 0xae7   : > { %v5591_v18 = vadd.f32 %v5584_v4, %v5515_v33  ;;  %v5586_v2 = vpop.f32.mrb[105].mxu0 }
 0xae8   : > { %v5592_v49 = vadd.f32 %v5586_v2, %v5516_v21  ;;  %v5588_v41 = vpop.f32.mrb[106].mxu0 }
 0xae9   : > { %v5639_v9 = vadd.f32 %v5632_v46, %v5591_v18  ;;  %v5589_v31 = vpop.f32.mrb[107].mxu0  ;;  %v5872_v62 = vpop.f32.mrb[80].mxu1 }
 0xaea   : > { %v5640_v42 = vadd.f32 %v5634_v50, %v5592_v49  ;;  %v5874_v30 = vpop.f32.mrb[81].mxu1 }
 0xaeb   : > { %v5876_v51 = vpop.f32.mrb[82].mxu1 }
 0xaec   : > { %v5877_v0 = vpop.f32.mrb[83].mxu1 }
 0xaee   : > { %v5680_v40 = vpop.f32.mrb[108].mxu0 }
 0xaef   : > { %v5687_v28 = vadd.f32 %v5680_v40, %v5639_v9  ;;  %v5682_v32 = vpop.f32.mrb[109].mxu0 }
 0xaf0   : > { %v5688_v24 = vadd.f32 %v5682_v32, %v5640_v42  ;;  %v5684_v54 = vpop.f32.mrb[110].mxu0 }
 0xaf1   : > { %v5761_v60 = vadd.f32 %v5754_v35, %v5687_v28  ;;  %v5685_v16 = vpop.f32.mrb[111].mxu0  ;;  %v5990_v6 = vpop.f32.mrb[84].mxu1 }
 0xaf2   : > { %v5762_v25 = vadd.f32 %v5756_v44, %v5688_v24  ;;  %v5992_v36 = vpop.f32.mrb[85].mxu1  ;;  %v6281_v44 = vpop.permute.xlu0 %6280 }
 0xaf3   : > { %v5994_v12 = vpop.f32.mrb[86].mxu1 }
 0xaf4   : > { %v5995_v57 = vpop.f32.mrb[87].mxu1 }
 0xaf6   : > { %v5824_v17 = vpop.f32.mrb[112].mxu0 }
 0xaf7   : > { %v5831_v13 = vadd.f32 %v5824_v17, %v5761_v60  ;;  %v5826_v63 = vpop.f32.mrb[113].mxu0 }
 0xaf8   : > { %v5832_v14 = vadd.f32 %v5826_v63, %v5762_v25  ;;  %v5828_v56 = vpop.f32.mrb[114].mxu0 }
 0xaf9   : > { %v5879_v52 = vadd.f32 %v5872_v62, %v5831_v13  ;;  %v5829_v11 = vpop.f32.mrb[115].mxu0 }
 0xafa   : > { %v5880_v47 = vadd.f32 %v5874_v30, %v5832_v14 }
 0xafe   : > { %v5920_v53 = vpop.f32.mrb[116].mxu0 }
 0xaff   : > { %v5927_v1 = vadd.f32 %v5920_v53, %v5879_v52  ;;  %v5922_v46 = vpop.f32.mrb[117].mxu0 }
 0xb00   : > { %v5928_v50 = vadd.f32 %v5922_v46, %v5880_v47  ;;  %v5924_v5 = vpop.f32.mrb[118].mxu0  ;;  %v6128_v8 = vpop.f32.mrb[88].mxu1 }
 0xb01   : > { %v5997_v39 = vadd.f32 %v5990_v6, %v5927_v1  ;;  %v5925_v15 = vpop.f32.mrb[119].mxu0  ;;  %v6130_v58 = vpop.f32.mrb[89].mxu1 }
 0xb02   : > { %v5998_v59 = vadd.f32 %v5992_v36, %v5928_v50  ;;  %v6132_v61 = vpop.f32.mrb[90].mxu1 }
 0xb03   : > { %v6133_v55 = vpop.f32.mrb[91].mxu1 }
 0xb06   : > { %v6062_v27 = vpop.f32.mrb[120].mxu0 }
 0xb07   : > { %v6069_v3 = vadd.f32 %v6062_v27, %v5997_v39  ;;  %v6064_v10 = vpop.f32.mrb[121].mxu0 }
 0xb08   : > { %v6070_v26 = vadd.f32 %v6064_v10, %v5998_v59  ;;  %v6066_v48 = vpop.f32.mrb[122].mxu0 }
 0xb09   : > { %v6135_v23 = vadd.f32 %v6128_v8, %v6069_v3  ;;  %v6067_v19 = vpop.f32.mrb[123].mxu0 }
 0xb0a   : > { %v6136_v38 = vadd.f32 %v6130_v58, %v6070_v26 }
 0xb0e   : > { %v6194_v20 = vpop.f32.mrb[124].mxu0 }
 0xb0f   : > { %v6201_v34 = vadd.f32 %v6194_v20, %v6135_v23  ;;  %v6196_v43 = vpop.f32.mrb[125].mxu0 }
 0xb10   : > { %v6202_v33 = vadd.f32 %v6196_v43, %v6136_v38  ;;  %v6198_v22 = vpop.f32.mrb[126].mxu0 }
 0xb11   : > { %v6264_v21 = vpop.f32.mrb[92].mxu1  ;;  %v6199_v37 = vpop.f32.mrb[127].mxu0 }
 0xb12   : > { %v6271_v45 = vadd.f32 %v6264_v21, %v6201_v34  ;;  %v6266_v35 = vpop.f32.mrb[93].mxu1 }
 0xb13   : > { %v6272_v29 = vadd.f32 %v6266_v35, %v6202_v33  ;;  %v6268_v7 = vpop.f32.mrb[94].mxu1 }
 0xb14   : > { %v6283_v4 = vadd.f32 %v6281_v44, %v6271_v45  ;;  %v6269_v18 = vpop.f32.mrb[95].mxu1 }
 0xb15   : > { %v6284_v2 = vadd.f32 %v6281_v44, %v6272_v29 }
 0xb16   : > { %v6285_v49 = vsub.f32 0.0, %v6283_v4 }
 0xb17   : > { %v6286_v41 = vsub.f32 0.0, %v6284_v2 }
 0xb18   : > { %v6287_v9 = vmul.f32 1.442695, %v6285_v49 }
 0xb19   : > { %v6289_v31 = vmul.f32 1.442695, %v6286_v41 }
 0xb1a   : > { %8179 = vpow2.f32 %v6287_v9 }
 0xb1b   : > { %8181 = vpow2.f32 %v6289_v31 }
 0xb24   : > { %v8180_v62 = vpop.eup %8179 }
 0xb25   : > { %v8182_v42 = vpop.eup %8181  ;;  %v6291_v30 = vadd.f32 1.0, %v8180_v62 }
 0xb26   : > { %v6292_v51 = vadd.f32 1.0, %v8182_v42 }
 0xb27   : > { %8183 = vrcp.f32 %v6291_v30 }
 0xb28   : > { %8185 = vrcp.f32 %v6292_v51 }
 0xb31   : > { %v8184_v0 = vpop.eup %8183 }
 0xb32   : > { %v8186_v40 = vpop.eup %8185 }
 0xb33   : > { %v6299_v28 = vcombine.low %v8184_v0, %v8186_v40 }
 0xb35   : > { %6301 = vst [vmem:[%s480_s18] sm:$0xff] %v6299_v28 }
 0xb36 PF: > { %s10460_s12 = sld [smem:[#allocation10_spill]] }
 0xb3c   : > { %s27_s27 = sadd.s32 1, %s10460_s12  }
 0xb3d   : > { %p24_p5 = scmp.ge.s32.totalorder %s27_s27, 4  }
 0xb3f   :  { %26 = sbr.rel (!%p24_p5) target bundleno = 5 (0x5), region = 155 }
 0xb46   :  { %6323 = vsyncpa [#allocation4], 1 }
 0xb47   :  { %6325 = vsyncpa [#allocation4 + $0x1], 1 }
 0xb48   :  { %6326 = vsyncpa [#allocation6], 1 }

</bundles_post_ra>
